<compile_context>
chip_gen: v7x
topology: tpu7x:2x2x1
jax: 0.10.0
libtpu: 0.0.40
codegen_flags: <defaults>
</compile_context>

<pallas_src>
import functools

import numpy as np
import jax
import jax.numpy as jnp
from jax.experimental import pallas as pl
from jax.experimental.pallas import tpu as pltpu

# Geometry implied by the PyTorch module (fc1.in_features == 500 == 20*5*5
# forces a 1x32x32 input).
H_IN = W_IN = 32
KSZ = 5
C1, C2 = 10, 20            # conv1 / conv2 output channels
W1P = 14                   # stage-1 pooled width (28 / 2)
W2P = 5                    # stage-2 pooled width (10 / 2)
N1 = C1 * W1P              # 140 lanes: columns are co*14 + j (stage 1)
N2 = C2 * W2P              # 100 lanes: columns are co*5  + j (stage 2)
FC_HIDDEN = 50


def _round_up(n, m):
    return ((n + m - 1) // m) * m


# ----------------------------------------------------------------------------
# The fused kernel
# ----------------------------------------------------------------------------
def _simplenet_kernel(x_ref, t1_ref, b1e_ref, u2_ref, b2e_ref,
                      w1e_ref, b1f_ref, w2f_ref, b2f_ref,
                      out_ref,
                      a1_ref, p1_ref, a2_ref, p2_ref,
                      *, batch, lb):
    """Whole SimpleNet forward; all intermediates stay in VMEM.

    Row layout of every 2-D activation: row = height * lb + b (b fastest), so
      * a conv shift of +ki in height  == a ref slice at sublane offset lb*ki,
      * 2x2 max-pool along height      == elementwise max with +lb / +2*lb rows,
      * the per-sample rows fc1 needs  == a contiguous 8-aligned block.
    Columns pack (channel, width-pool phase), so conv + width-pool become a
    matmul with a pre-built Toeplitz weight followed by an elementwise max.
    """
    f32 = jnp.float32
    B, LB = batch, lb
    R1 = 28 * LB           # conv1 output rows
    RP1 = 27 * LB          # pooled-1 rows (valid at 2*LB*i + b)
    R2 = 19 * LB           # conv2 output rows
    RP2 = 17 * LB          # pooled-2 rows (valid at 4*LB*i + b)

    # ---- conv1: 5 row-shifted matmuls, per width-pool phase q ---------------
    a1 = []
    for q in range(2):
        acc = None
        for ki in range(KSZ):
            term = jnp.dot(x_ref[LB * ki:LB * ki + R1, :], t1_ref[q, ki],
                           preferred_element_type=f32)
            acc = term if acc is None else acc + term
        a1.append(acc + b1e_ref[...])
    a1_ref[...] = jnp.maximum(a1[0], a1[1])                      # max over width phase
    # max over height phase (+LB rows), then ReLU  == relu(max_pool2d(conv1, 2))
    p1_ref[...] = jnp.maximum(
        jnp.maximum(a1_ref[0:RP1, :], a1_ref[LB:LB + RP1, :]), 0.0)

    # ---- conv2 (Dropout2d == identity in eval) + 2x2 maxpool + ReLU ---------
    a2 = []
    for q in range(2):
        acc = None
        for ki in range(KSZ):
            term = jnp.dot(p1_ref[2 * LB * ki:2 * LB * ki + R2, :], u2_ref[q, ki],
                           preferred_element_type=f32)
            acc = term if acc is None else acc + term
        a2.append(acc + b2e_ref[...])
    a2_ref[...] = jnp.maximum(a2[0], a2[1])
    p2_ref[...] = jnp.maximum(
        jnp.maximum(a2_ref[0:RP2, :], a2_ref[2 * LB:2 * LB + RP2, :]), 0.0)

    # ---- fc1 + ReLU (F.dropout == identity in eval) --------------------------
    h = None
    for i in range(W2P):                                         # pooled-2 height idx
        term = jnp.dot(p2_ref[4 * LB * i:4 * LB * i + B, :], w1e_ref[i],
                       preferred_element_type=f32)
        h = term if h is None else h + term
    h1 = jnp.maximum(h + b1f_ref[...], 0.0)                      # [B, 50]

    # ---- fc2 + log_softmax ----------------------------------------------------
    logits = jnp.dot(h1, w2f_ref[...], preferred_element_type=f32) + b2f_ref[...]
    m = jnp.max(logits, axis=-1, keepdims=True)
    z = logits - m
    lse = jnp.log(jnp.sum(jnp.exp(z), axis=-1, keepdims=True))
    out_ref[...] = (z - lse).astype(out_ref.dtype)


# ----------------------------------------------------------------------------
# Wrapper: one pallas_call, full-array VMEM blocks, no grid
# ----------------------------------------------------------------------------
def simplenet_fused(prepared, x):
    """x: [B, 1, 32, 32] float32 (NCHW). Returns log-probs [B, num_classes]."""
    B = x.shape[0]
    LB = _round_up(B, 8)           # keep every row-shift slice 8-sublane aligned
    nc = prepared["w2f"].shape[1]

    # Row layout (height, batch) with batch fastest; pad batch slots to LB.
    x3 = x.reshape(B, H_IN, W_IN).astype(jnp.float32)
    x3 = jnp.pad(x3, ((0, LB - B), (0, 0), (0, 0)))
    x2d = jnp.transpose(x3, (1, 0, 2)).reshape(H_IN * LB, W_IN)

    kernel = functools.partial(_simplenet_kernel, batch=B, lb=LB)
    vmem = pl.BlockSpec(memory_space=pltpu.MemorySpace.VMEM)
    return pl.pallas_call(
        kernel,
        out_shape=jax.ShapeDtypeStruct((B, nc), jnp.float32),
        in_specs=[vmem] * 9,
        out_specs=vmem,
        scratch_shapes=[
            pltpu.VMEM((28 * LB, N1), jnp.float32),   # conv1 (width-pooled)
            pltpu.VMEM((27 * LB, N1), jnp.float32),   # pooled-1
            pltpu.VMEM((19 * LB, N2), jnp.float32),   # conv2 (width-pooled)
            pltpu.VMEM((17 * LB, N2), jnp.float32),   # pooled-2
        ],
    )(x2d, prepared["t1"], prepared["b1e"], prepared["u2"], prepared["b2e"],
      prepared["w1e"], prepared["b1f"], prepared["w2f"], prepared["b2f"])


# ----------------------------------------------------------------------------
# One-time weight folding (outside the per-step hot path)
# ----------------------------------------------------------------------------
def prepare_params(params):
    """Fold torch-layout weights into the kernel's matmul operands."""
    f32 = jnp.float32
    w1 = params["conv1_w"].astype(f32)     # [10, 1, 5, 5]
    b1 = params["conv1_b"].astype(f32)     # [10]
    w2 = params["conv2_w"].astype(f32)     # [20, 10, 5, 5]
    b2 = params["conv2_b"].astype(f32)     # [20]
    fw1 = params["fc1_w"].astype(f32)      # [50, 500]
    fb1 = params["fc1_b"].astype(f32)      # [50]
    fw2 = params["fc2_w"].astype(f32)      # [nc, 50]
    fb2 = params["fc2_b"].astype(f32)      # [nc]
    nc = fw2.shape[0]

    # Stage-1 Toeplitz: T1[q, ki, j_in, co*14 + j] = w1[co, 0, ki, j_in - (2j + q)]
    j_in = np.arange(W_IN)[:, None]                     # [32, 1]
    jj = np.arange(W1P)[None, :]                        # [1, 14]
    t1_q = []
    for q in range(2):
        t1_k = []
        for ki in range(KSZ):
            kj = j_in - (2 * jj + q)                    # [32, 14]
            valid = (kj >= 0) & (kj < KSZ)
            g = w1[:, 0, ki, :][:, np.clip(kj, 0, KSZ - 1)]        # [10, 32, 14]
            g = jnp.where(valid[None], g, 0.0)
            t1_k.append(jnp.transpose(g, (1, 0, 2)).reshape(W_IN, N1))
        t1_q.append(jnp.stack(t1_k, axis=0))
    t1 = jnp.stack(t1_q, axis=0)                        # [2, 5, 32, 140]

    # Stage-2 Toeplitz: U2[q, ki, cin*14 + j_in, co*5 + j] = w2[co, cin, ki, j_in - (2j + q)]
    j1 = np.arange(W1P)[:, None]                        # [14, 1]
    j2 = np.arange(W2P)[None, :]                        # [1, 5]
    u2_q = []
    for q in range(2):
        u2_k = []
        for ki in range(KSZ):
            kj = j1 - (2 * j2 + q)                      # [14, 5]
            valid = (kj >= 0) & (kj < KSZ)
            g = w2[:, :, ki, :][:, :, np.clip(kj, 0, KSZ - 1)]     # [20, 10, 14, 5]
            g = jnp.where(valid[None, None], g, 0.0)
            u2_k.append(jnp.transpose(g, (1, 2, 0, 3)).reshape(C1 * W1P, N2))
        u2_q.append(jnp.stack(u2_k, axis=0))
    u2 = jnp.stack(u2_q, axis=0)                        # [2, 5, 140, 100]

    return {
        "t1": t1,
        "b1e": jnp.broadcast_to(b1[:, None], (C1, W1P)).reshape(1, N1),
        "u2": u2,
        "b2e": jnp.broadcast_to(b2[:, None], (C2, W2P)).reshape(1, N2),
        # fc1 regrouped by pooled-2 height i: W1e[i][co*5 + j, n] = fc1_w[n, co*25 + i*5 + j]
        # (this reproduces torch's NCHW x.view(-1, 500) flatten order exactly)
        "w1e": jnp.transpose(fw1.reshape(FC_HIDDEN, C2, W2P, W2P),
                             (2, 1, 3, 0)).reshape(W2P, N2, FC_HIDDEN),
        "b1f": fb1.reshape(1, FC_HIDDEN),
        "w2f": fw2.T,                                    # [50, nc]
        "b2f": fb2.reshape(1, nc),
    }


# ----------------------------------------------------------------------------
# Plain-JAX reference (PyTorch eval-mode semantics) for verification
# ----------------------------------------------------------------------------
def simplenet_reference(params, x):
    def conv(inp, w, b):
        out = jax.lax.conv_general_dilated(
            inp, w, window_strides=(1, 1), padding="VALID",
            dimension_numbers=("NCHW", "OIHW", "NCHW"))
        return out + b[None, :, None, None]

    def pool2(t):
        return jax.lax.reduce_window(t, -jnp.inf, jax.lax.max,
                                     (1, 1, 2, 2), (1, 1, 2, 2), "VALID")

    h = jax.nn.relu(pool2(conv(x, params["conv1_w"], params["conv1_b"])))
    h = jax.nn.relu(pool2(conv(h, params["conv2_w"], params["conv2_b"])))
    h = h.reshape(h.shape[0], -1)
    h = jax.nn.relu(h @ params["fc1_w"].T + params["fc1_b"])
    logits = h @ params["fc2_w"].T + params["fc2_b"]
    return jax.nn.log_softmax(logits, axis=-1)


# ----------------------------------------------------------------------------
# Deterministic parameter init (mimics torch's uniform(-1/sqrt(fan_in), ...))
# ----------------------------------------------------------------------------
def init_params(key, num_classes):
    ks = jax.random.split(key, 8)

    def u(k, shape, fan_in):
        bound = 1.0 / (fan_in ** 0.5)
        return jax.random.uniform(k, shape, jnp.float32, -bound, bound)

    return {
        "conv1_w": u(ks[0], (10, 1, 5, 5), 1 * 5 * 5),
        "conv1_b": u(ks[1], (10,), 1 * 5 * 5),
        "conv2_w": u(ks[2], (20, 10, 5, 5), 10 * 5 * 5),
        "conv2_b": u(ks[3], (20,), 10 * 5 * 5),
        "fc1_w": u(ks[4], (50, 500), 500),
        "fc1_b": u(ks[5], (50,), 500),
        "fc2_w": u(ks[6], (num_classes, 50), 50),
        "fc2_b": u(ks[7], (num_classes,), 50),
    }


if __name__ == "__main__":
    num_classes = 10
    key = jax.random.PRNGKey(0)
    pkey, xkey = jax.random.split(key)
    params = init_params(pkey, num_classes)
    x = jax.random.normal(xkey, (2, 1, 32, 32), dtype=jnp.float32)

    prepared = prepare_params(params)          # one-time weight folding
    fwd = jax.jit(simplenet_fused)
    out = jax.block_until_ready(fwd(prepared, x))

    assert out.shape == (2, num_classes), out.shape
    # log_softmax rows must exponentiate-sum to 1
    assert jnp.allclose(jnp.sum(jnp.exp(out), axis=-1), 1.0, atol=1e-4)

    # Cross-check against a plain-JAX reference of the PyTorch module.
    ref = simplenet_reference(params, x)
    max_err = float(jnp.max(jnp.abs(out - ref)))
    assert max_err < 1e-1, f"kernel deviates from reference: max|diff|={max_err}"

    print("KERNEL_OK")
</pallas_src>

<mosaic_0001>
module attributes {stable_mosaic.version = 11 : i64} {
  func.func @_simplenet_kernel(%arg0: memref<256x32xf32, #tpu.memory_space<vmem>>, %arg1: memref<2x5x32x140xf32, #tpu.memory_space<vmem>>, %arg2: memref<1x140xf32, #tpu.memory_space<vmem>>, %arg3: memref<2x5x140x100xf32, #tpu.memory_space<vmem>>, %arg4: memref<1x100xf32, #tpu.memory_space<vmem>>, %arg5: memref<5x100x50xf32, #tpu.memory_space<vmem>>, %arg6: memref<1x50xf32, #tpu.memory_space<vmem>>, %arg7: memref<50x10xf32, #tpu.memory_space<vmem>>, %arg8: memref<1x10xf32, #tpu.memory_space<vmem>>, %arg9: memref<2x10xf32, #tpu.memory_space<vmem>>, %arg10: memref<224x140xf32, #tpu.memory_space<vmem>>, %arg11: memref<216x140xf32, #tpu.memory_space<vmem>>, %arg12: memref<152x100xf32, #tpu.memory_space<vmem>>, %arg13: memref<136x100xf32, #tpu.memory_space<vmem>>) attributes {dimension_semantics = [], scalar_prefetch = 0 : i64, scratch_operands = 4 : i64, tpu.core_type = #tpu.core_type<tc>} {
    %c0 = arith.constant 0 : index
    %c0_0 = arith.constant 0 : index
    %0 = vector.load %arg0[%c0, %c0_0] : memref<256x32xf32, #tpu.memory_space<vmem>>, vector<224x32xf32>
    %c0_1 = arith.constant 0 : index
    %c0_2 = arith.constant 0 : index
    %c0_3 = arith.constant 0 : index
    %c0_4 = arith.constant 0 : index
    %1 = vector.load %arg1[%c0_1, %c0_2, %c0_3, %c0_4] : memref<2x5x32x140xf32, #tpu.memory_space<vmem>>, vector<1x1x32x140xf32>
    %2 = vector.shape_cast %1 : vector<1x1x32x140xf32> to vector<32x140xf32>
    %cst = arith.constant dense<0.000000e+00> : vector<224x140xf32>
    %3 = tpu.matmul %0, %2, %cst {dimension_numbers = #tpu.dot_dimension_numbers<[1], [0], [0], [1], [0, 0, 1, 1], [], []>} : vector<224x32xf32>, vector<32x140xf32>, vector<224x140xf32> -> vector<224x140xf32>
    %c8 = arith.constant 8 : index
    %c0_5 = arith.constant 0 : index
    %4 = vector.load %arg0[%c8, %c0_5] : memref<256x32xf32, #tpu.memory_space<vmem>>, vector<224x32xf32>
    %c0_6 = arith.constant 0 : index
    %c1 = arith.constant 1 : index
    %c0_7 = arith.constant 0 : index
    %c0_8 = arith.constant 0 : index
    %5 = vector.load %arg1[%c0_6, %c1, %c0_7, %c0_8] : memref<2x5x32x140xf32, #tpu.memory_space<vmem>>, vector<1x1x32x140xf32>
    %6 = vector.shape_cast %5 : vector<1x1x32x140xf32> to vector<32x140xf32>
    %cst_9 = arith.constant dense<0.000000e+00> : vector<224x140xf32>
    %7 = tpu.matmul %4, %6, %cst_9 {dimension_numbers = #tpu.dot_dimension_numbers<[1], [0], [0], [1], [0, 0, 1, 1], [], []>} : vector<224x32xf32>, vector<32x140xf32>, vector<224x140xf32> -> vector<224x140xf32>
    %8 = arith.addf %3, %7 : vector<224x140xf32>
    %c16 = arith.constant 16 : index
    %c0_10 = arith.constant 0 : index
    %9 = vector.load %arg0[%c16, %c0_10] : memref<256x32xf32, #tpu.memory_space<vmem>>, vector<224x32xf32>
    %c0_11 = arith.constant 0 : index
    %c2 = arith.constant 2 : index
    %c0_12 = arith.constant 0 : index
    %c0_13 = arith.constant 0 : index
    %10 = vector.load %arg1[%c0_11, %c2, %c0_12, %c0_13] : memref<2x5x32x140xf32, #tpu.memory_space<vmem>>, vector<1x1x32x140xf32>
    %11 = vector.shape_cast %10 : vector<1x1x32x140xf32> to vector<32x140xf32>
    %cst_14 = arith.constant dense<0.000000e+00> : vector<224x140xf32>
    %12 = tpu.matmul %9, %11, %cst_14 {dimension_numbers = #tpu.dot_dimension_numbers<[1], [0], [0], [1], [0, 0, 1, 1], [], []>} : vector<224x32xf32>, vector<32x140xf32>, vector<224x140xf32> -> vector<224x140xf32>
    %13 = arith.addf %8, %12 : vector<224x140xf32>
    %c24 = arith.constant 24 : index
    %c0_15 = arith.constant 0 : index
    %14 = vector.load %arg0[%c24, %c0_15] : memref<256x32xf32, #tpu.memory_space<vmem>>, vector<224x32xf32>
    %c0_16 = arith.constant 0 : index
    %c3 = arith.constant 3 : index
    %c0_17 = arith.constant 0 : index
    %c0_18 = arith.constant 0 : index
    %15 = vector.load %arg1[%c0_16, %c3, %c0_17, %c0_18] : memref<2x5x32x140xf32, #tpu.memory_space<vmem>>, vector<1x1x32x140xf32>
    %16 = vector.shape_cast %15 : vector<1x1x32x140xf32> to vector<32x140xf32>
    %cst_19 = arith.constant dense<0.000000e+00> : vector<224x140xf32>
    %17 = tpu.matmul %14, %16, %cst_19 {dimension_numbers = #tpu.dot_dimension_numbers<[1], [0], [0], [1], [0, 0, 1, 1], [], []>} : vector<224x32xf32>, vector<32x140xf32>, vector<224x140xf32> -> vector<224x140xf32>
    %18 = arith.addf %13, %17 : vector<224x140xf32>
    %c32 = arith.constant 32 : index
    %c0_20 = arith.constant 0 : index
    %19 = vector.load %arg0[%c32, %c0_20] : memref<256x32xf32, #tpu.memory_space<vmem>>, vector<224x32xf32>
    %c0_21 = arith.constant 0 : index
    %c4 = arith.constant 4 : index
    %c0_22 = arith.constant 0 : index
    %c0_23 = arith.constant 0 : index
    %20 = vector.load %arg1[%c0_21, %c4, %c0_22, %c0_23] : memref<2x5x32x140xf32, #tpu.memory_space<vmem>>, vector<1x1x32x140xf32>
    %21 = vector.shape_cast %20 : vector<1x1x32x140xf32> to vector<32x140xf32>
    %cst_24 = arith.constant dense<0.000000e+00> : vector<224x140xf32>
    %22 = tpu.matmul %19, %21, %cst_24 {dimension_numbers = #tpu.dot_dimension_numbers<[1], [0], [0], [1], [0, 0, 1, 1], [], []>} : vector<224x32xf32>, vector<32x140xf32>, vector<224x140xf32> -> vector<224x140xf32>
    %23 = arith.addf %18, %22 : vector<224x140xf32>
    %c0_25 = arith.constant 0 : index
    %c0_26 = arith.constant 0 : index
    %24 = vector.load %arg2[%c0_25, %c0_26] : memref<1x140xf32, #tpu.memory_space<vmem>>, vector<1x140xf32>
    %25 = vector.broadcast %24 : vector<1x140xf32> to vector<224x140xf32>
    %26 = arith.addf %23, %25 : vector<224x140xf32>
    %c0_27 = arith.constant 0 : index
    %c0_28 = arith.constant 0 : index
    %27 = vector.load %arg0[%c0_27, %c0_28] : memref<256x32xf32, #tpu.memory_space<vmem>>, vector<224x32xf32>
    %c1_29 = arith.constant 1 : index
    %c0_30 = arith.constant 0 : index
    %c0_31 = arith.constant 0 : index
    %c0_32 = arith.constant 0 : index
    %28 = vector.load %arg1[%c1_29, %c0_30, %c0_31, %c0_32] : memref<2x5x32x140xf32, #tpu.memory_space<vmem>>, vector<1x1x32x140xf32>
    %29 = vector.shape_cast %28 : vector<1x1x32x140xf32> to vector<32x140xf32>
    %cst_33 = arith.constant dense<0.000000e+00> : vector<224x140xf32>
    %30 = tpu.matmul %27, %29, %cst_33 {dimension_numbers = #tpu.dot_dimension_numbers<[1], [0], [0], [1], [0, 0, 1, 1], [], []>} : vector<224x32xf32>, vector<32x140xf32>, vector<224x140xf32> -> vector<224x140xf32>
    %c8_34 = arith.constant 8 : index
    %c0_35 = arith.constant 0 : index
    %31 = vector.load %arg0[%c8_34, %c0_35] : memref<256x32xf32, #tpu.memory_space<vmem>>, vector<224x32xf32>
    %c1_36 = arith.constant 1 : index
    %c1_37 = arith.constant 1 : index
    %c0_38 = arith.constant 0 : index
    %c0_39 = arith.constant 0 : index
    %32 = vector.load %arg1[%c1_36, %c1_37, %c0_38, %c0_39] : memref<2x5x32x140xf32, #tpu.memory_space<vmem>>, vector<1x1x32x140xf32>
    %33 = vector.shape_cast %32 : vector<1x1x32x140xf32> to vector<32x140xf32>
    %cst_40 = arith.constant dense<0.000000e+00> : vector<224x140xf32>
    %34 = tpu.matmul %31, %33, %cst_40 {dimension_numbers = #tpu.dot_dimension_numbers<[1], [0], [0], [1], [0, 0, 1, 1], [], []>} : vector<224x32xf32>, vector<32x140xf32>, vector<224x140xf32> -> vector<224x140xf32>
    %35 = arith.addf %30, %34 : vector<224x140xf32>
    %c16_41 = arith.constant 16 : index
    %c0_42 = arith.constant 0 : index
    %36 = vector.load %arg0[%c16_41, %c0_42] : memref<256x32xf32, #tpu.memory_space<vmem>>, vector<224x32xf32>
    %c1_43 = arith.constant 1 : index
    %c2_44 = arith.constant 2 : index
    %c0_45 = arith.constant 0 : index
    %c0_46 = arith.constant 0 : index
    %37 = vector.load %arg1[%c1_43, %c2_44, %c0_45, %c0_46] : memref<2x5x32x140xf32, #tpu.memory_space<vmem>>, vector<1x1x32x140xf32>
    %38 = vector.shape_cast %37 : vector<1x1x32x140xf32> to vector<32x140xf32>
    %cst_47 = arith.constant dense<0.000000e+00> : vector<224x140xf32>
    %39 = tpu.matmul %36, %38, %cst_47 {dimension_numbers = #tpu.dot_dimension_numbers<[1], [0], [0], [1], [0, 0, 1, 1], [], []>} : vector<224x32xf32>, vector<32x140xf32>, vector<224x140xf32> -> vector<224x140xf32>
    %40 = arith.addf %35, %39 : vector<224x140xf32>
    %c24_48 = arith.constant 24 : index
    %c0_49 = arith.constant 0 : index
    %41 = vector.load %arg0[%c24_48, %c0_49] : memref<256x32xf32, #tpu.memory_space<vmem>>, vector<224x32xf32>
    %c1_50 = arith.constant 1 : index
    %c3_51 = arith.constant 3 : index
    %c0_52 = arith.constant 0 : index
    %c0_53 = arith.constant 0 : index
    %42 = vector.load %arg1[%c1_50, %c3_51, %c0_52, %c0_53] : memref<2x5x32x140xf32, #tpu.memory_space<vmem>>, vector<1x1x32x140xf32>
    %43 = vector.shape_cast %42 : vector<1x1x32x140xf32> to vector<32x140xf32>
    %cst_54 = arith.constant dense<0.000000e+00> : vector<224x140xf32>
    %44 = tpu.matmul %41, %43, %cst_54 {dimension_numbers = #tpu.dot_dimension_numbers<[1], [0], [0], [1], [0, 0, 1, 1], [], []>} : vector<224x32xf32>, vector<32x140xf32>, vector<224x140xf32> -> vector<224x140xf32>
    %45 = arith.addf %40, %44 : vector<224x140xf32>
    %c32_55 = arith.constant 32 : index
    %c0_56 = arith.constant 0 : index
    %46 = vector.load %arg0[%c32_55, %c0_56] : memref<256x32xf32, #tpu.memory_space<vmem>>, vector<224x32xf32>
    %c1_57 = arith.constant 1 : index
    %c4_58 = arith.constant 4 : index
    %c0_59 = arith.constant 0 : index
    %c0_60 = arith.constant 0 : index
    %47 = vector.load %arg1[%c1_57, %c4_58, %c0_59, %c0_60] : memref<2x5x32x140xf32, #tpu.memory_space<vmem>>, vector<1x1x32x140xf32>
    %48 = vector.shape_cast %47 : vector<1x1x32x140xf32> to vector<32x140xf32>
    %cst_61 = arith.constant dense<0.000000e+00> : vector<224x140xf32>
    %49 = tpu.matmul %46, %48, %cst_61 {dimension_numbers = #tpu.dot_dimension_numbers<[1], [0], [0], [1], [0, 0, 1, 1], [], []>} : vector<224x32xf32>, vector<32x140xf32>, vector<224x140xf32> -> vector<224x140xf32>
    %50 = arith.addf %45, %49 : vector<224x140xf32>
    %c0_62 = arith.constant 0 : index
    %c0_63 = arith.constant 0 : index
    %51 = vector.load %arg2[%c0_62, %c0_63] : memref<1x140xf32, #tpu.memory_space<vmem>>, vector<1x140xf32>
    %52 = vector.broadcast %51 : vector<1x140xf32> to vector<224x140xf32>
    %53 = arith.addf %50, %52 : vector<224x140xf32>
    %54 = arith.maximumf %26, %53 : vector<224x140xf32>
    %c0_64 = arith.constant 0 : index
    %c0_65 = arith.constant 0 : index
    %55 = vector.load %arg10[%c0_64, %c0_65] : memref<224x140xf32, #tpu.memory_space<vmem>>, vector<224x140xf32>
    tpu.vector_store %arg10[%c0_64, %c0_65], %54 {strides = array<i32>} : memref<224x140xf32, #tpu.memory_space<vmem>>, vector<224x140xf32>,
    %c0_66 = arith.constant 0 : index
    %c0_67 = arith.constant 0 : index
    %56 = vector.load %arg10[%c0_66, %c0_67] : memref<224x140xf32, #tpu.memory_space<vmem>>, vector<216x140xf32>
    %c8_68 = arith.constant 8 : index
    %c0_69 = arith.constant 0 : index
    %57 = vector.load %arg10[%c8_68, %c0_69] : memref<224x140xf32, #tpu.memory_space<vmem>>, vector<216x140xf32>
    %58 = arith.maximumf %56, %57 : vector<216x140xf32>
    %cst_70 = arith.constant 0.000000e+00 : f32
    %59 = vector.broadcast %cst_70 : f32 to vector<216x140xf32>
    %60 = arith.maximumf %58, %59 : vector<216x140xf32>
    %c0_71 = arith.constant 0 : index
    %c0_72 = arith.constant 0 : index
    %61 = vector.load %arg11[%c0_71, %c0_72] : memref<216x140xf32, #tpu.memory_space<vmem>>, vector<216x140xf32>
    tpu.vector_store %arg11[%c0_71, %c0_72], %60 {strides = array<i32>} : memref<216x140xf32, #tpu.memory_space<vmem>>, vector<216x140xf32>,
    %c0_73 = arith.constant 0 : index
    %c0_74 = arith.constant 0 : index
    %62 = vector.load %arg11[%c0_73, %c0_74] : memref<216x140xf32, #tpu.memory_space<vmem>>, vector<152x140xf32>
    %c0_75 = arith.constant 0 : index
    %c0_76 = arith.constant 0 : index
    %c0_77 = arith.constant 0 : index
    %c0_78 = arith.constant 0 : index
    %63 = vector.load %arg3[%c0_75, %c0_76, %c0_77, %c0_78] : memref<2x5x140x100xf32, #tpu.memory_space<vmem>>, vector<1x1x140x100xf32>
    %64 = vector.shape_cast %63 : vector<1x1x140x100xf32> to vector<140x100xf32>
    %cst_79 = arith.constant dense<0.000000e+00> : vector<152x100xf32>
    %65 = tpu.matmul %62, %64, %cst_79 {dimension_numbers = #tpu.dot_dimension_numbers<[1], [0], [0], [1], [0, 0, 1, 1], [], []>} : vector<152x140xf32>, vector<140x100xf32>, vector<152x100xf32> -> vector<152x100xf32>
    %c16_80 = arith.constant 16 : index
    %c0_81 = arith.constant 0 : index
    %66 = vector.load %arg11[%c16_80, %c0_81] : memref<216x140xf32, #tpu.memory_space<vmem>>, vector<152x140xf32>
    %c0_82 = arith.constant 0 : index
    %c1_83 = arith.constant 1 : index
    %c0_84 = arith.constant 0 : index
    %c0_85 = arith.constant 0 : index
    %67 = vector.load %arg3[%c0_82, %c1_83, %c0_84, %c0_85] : memref<2x5x140x100xf32, #tpu.memory_space<vmem>>, vector<1x1x140x100xf32>
    %68 = vector.shape_cast %67 : vector<1x1x140x100xf32> to vector<140x100xf32>
    %cst_86 = arith.constant dense<0.000000e+00> : vector<152x100xf32>
    %69 = tpu.matmul %66, %68, %cst_86 {dimension_numbers = #tpu.dot_dimension_numbers<[1], [0], [0], [1], [0, 0, 1, 1], [], []>} : vector<152x140xf32>, vector<140x100xf32>, vector<152x100xf32> -> vector<152x100xf32>
    %70 = arith.addf %65, %69 : vector<152x100xf32>
    %c32_87 = arith.constant 32 : index
    %c0_88 = arith.constant 0 : index
    %71 = vector.load %arg11[%c32_87, %c0_88] : memref<216x140xf32, #tpu.memory_space<vmem>>, vector<152x140xf32>
    %c0_89 = arith.constant 0 : index
    %c2_90 = arith.constant 2 : index
    %c0_91 = arith.constant 0 : index
    %c0_92 = arith.constant 0 : index
    %72 = vector.load %arg3[%c0_89, %c2_90, %c0_91, %c0_92] : memref<2x5x140x100xf32, #tpu.memory_space<vmem>>, vector<1x1x140x100xf32>
    %73 = vector.shape_cast %72 : vector<1x1x140x100xf32> to vector<140x100xf32>
    %cst_93 = arith.constant dense<0.000000e+00> : vector<152x100xf32>
    %74 = tpu.matmul %71, %73, %cst_93 {dimension_numbers = #tpu.dot_dimension_numbers<[1], [0], [0], [1], [0, 0, 1, 1], [], []>} : vector<152x140xf32>, vector<140x100xf32>, vector<152x100xf32> -> vector<152x100xf32>
    %75 = arith.addf %70, %74 : vector<152x100xf32>
    %c48 = arith.constant 48 : index
    %c0_94 = arith.constant 0 : index
    %76 = vector.load %arg11[%c48, %c0_94] : memref<216x140xf32, #tpu.memory_space<vmem>>, vector<152x140xf32>
    %c0_95 = arith.constant 0 : index
    %c3_96 = arith.constant 3 : index
    %c0_97 = arith.constant 0 : index
    %c0_98 = arith.constant 0 : index
    %77 = vector.load %arg3[%c0_95, %c3_96, %c0_97, %c0_98] : memref<2x5x140x100xf32, #tpu.memory_space<vmem>>, vector<1x1x140x100xf32>
    %78 = vector.shape_cast %77 : vector<1x1x140x100xf32> to vector<140x100xf32>
    %cst_99 = arith.constant dense<0.000000e+00> : vector<152x100xf32>
    %79 = tpu.matmul %76, %78, %cst_99 {dimension_numbers = #tpu.dot_dimension_numbers<[1], [0], [0], [1], [0, 0, 1, 1], [], []>} : vector<152x140xf32>, vector<140x100xf32>, vector<152x100xf32> -> vector<152x100xf32>
    %80 = arith.addf %75, %79 : vector<152x100xf32>
    %c64 = arith.constant 64 : index
    %c0_100 = arith.constant 0 : index
    %81 = vector.load %arg11[%c64, %c0_100] : memref<216x140xf32, #tpu.memory_space<vmem>>, vector<152x140xf32>
    %c0_101 = arith.constant 0 : index
    %c4_102 = arith.constant 4 : index
    %c0_103 = arith.constant 0 : index
    %c0_104 = arith.constant 0 : index
    %82 = vector.load %arg3[%c0_101, %c4_102, %c0_103, %c0_104] : memref<2x5x140x100xf32, #tpu.memory_space<vmem>>, vector<1x1x140x100xf32>
    %83 = vector.shape_cast %82 : vector<1x1x140x100xf32> to vector<140x100xf32>
    %cst_105 = arith.constant dense<0.000000e+00> : vector<152x100xf32>
    %84 = tpu.matmul %81, %83, %cst_105 {dimension_numbers = #tpu.dot_dimension_numbers<[1], [0], [0], [1], [0, 0, 1, 1], [], []>} : vector<152x140xf32>, vector<140x100xf32>, vector<152x100xf32> -> vector<152x100xf32>
    %85 = arith.addf %80, %84 : vector<152x100xf32>
    %c0_106 = arith.constant 0 : index
    %c0_107 = arith.constant 0 : index
    %86 = vector.load %arg4[%c0_106, %c0_107] : memref<1x100xf32, #tpu.memory_space<vmem>>, vector<1x100xf32>
    %87 = vector.broadcast %86 : vector<1x100xf32> to vector<152x100xf32>
    %88 = arith.addf %85, %87 : vector<152x100xf32>
    %c0_108 = arith.constant 0 : index
    %c0_109 = arith.constant 0 : index
    %89 = vector.load %arg11[%c0_108, %c0_109] : memref<216x140xf32, #tpu.memory_space<vmem>>, vector<152x140xf32>
    %c1_110 = arith.constant 1 : index
    %c0_111 = arith.constant 0 : index
    %c0_112 = arith.constant 0 : index
    %c0_113 = arith.constant 0 : index
    %90 = vector.load %arg3[%c1_110, %c0_111, %c0_112, %c0_113] : memref<2x5x140x100xf32, #tpu.memory_space<vmem>>, vector<1x1x140x100xf32>
    %91 = vector.shape_cast %90 : vector<1x1x140x100xf32> to vector<140x100xf32>
    %cst_114 = arith.constant dense<0.000000e+00> : vector<152x100xf32>
    %92 = tpu.matmul %89, %91, %cst_114 {dimension_numbers = #tpu.dot_dimension_numbers<[1], [0], [0], [1], [0, 0, 1, 1], [], []>} : vector<152x140xf32>, vector<140x100xf32>, vector<152x100xf32> -> vector<152x100xf32>
    %c16_115 = arith.constant 16 : index
    %c0_116 = arith.constant 0 : index
    %93 = vector.load %arg11[%c16_115, %c0_116] : memref<216x140xf32, #tpu.memory_space<vmem>>, vector<152x140xf32>
    %c1_117 = arith.constant 1 : index
    %c1_118 = arith.constant 1 : index
    %c0_119 = arith.constant 0 : index
    %c0_120 = arith.constant 0 : index
    %94 = vector.load %arg3[%c1_117, %c1_118, %c0_119, %c0_120] : memref<2x5x140x100xf32, #tpu.memory_space<vmem>>, vector<1x1x140x100xf32>
    %95 = vector.shape_cast %94 : vector<1x1x140x100xf32> to vector<140x100xf32>
    %cst_121 = arith.constant dense<0.000000e+00> : vector<152x100xf32>
    %96 = tpu.matmul %93, %95, %cst_121 {dimension_numbers = #tpu.dot_dimension_numbers<[1], [0], [0], [1], [0, 0, 1, 1], [], []>} : vector<152x140xf32>, vector<140x100xf32>, vector<152x100xf32> -> vector<152x100xf32>
    %97 = arith.addf %92, %96 : vector<152x100xf32>
    %c32_122 = arith.constant 32 : index
    %c0_123 = arith.constant 0 : index
    %98 = vector.load %arg11[%c32_122, %c0_123] : memref<216x140xf32, #tpu.memory_space<vmem>>, vector<152x140xf32>
    %c1_124 = arith.constant 1 : index
    %c2_125 = arith.constant 2 : index
    %c0_126 = arith.constant 0 : index
    %c0_127 = arith.constant 0 : index
    %99 = vector.load %arg3[%c1_124, %c2_125, %c0_126, %c0_127] : memref<2x5x140x100xf32, #tpu.memory_space<vmem>>, vector<1x1x140x100xf32>
    %100 = vector.shape_cast %99 : vector<1x1x140x100xf32> to vector<140x100xf32>
    %cst_128 = arith.constant dense<0.000000e+00> : vector<152x100xf32>
    %101 = tpu.matmul %98, %100, %cst_128 {dimension_numbers = #tpu.dot_dimension_numbers<[1], [0], [0], [1], [0, 0, 1, 1], [], []>} : vector<152x140xf32>, vector<140x100xf32>, vector<152x100xf32> -> vector<152x100xf32>
    %102 = arith.addf %97, %101 : vector<152x100xf32>
    %c48_129 = arith.constant 48 : index
    %c0_130 = arith.constant 0 : index
    %103 = vector.load %arg11[%c48_129, %c0_130] : memref<216x140xf32, #tpu.memory_space<vmem>>, vector<152x140xf32>
    %c1_131 = arith.constant 1 : index
    %c3_132 = arith.constant 3 : index
    %c0_133 = arith.constant 0 : index
    %c0_134 = arith.constant 0 : index
    %104 = vector.load %arg3[%c1_131, %c3_132, %c0_133, %c0_134] : memref<2x5x140x100xf32, #tpu.memory_space<vmem>>, vector<1x1x140x100xf32>
    %105 = vector.shape_cast %104 : vector<1x1x140x100xf32> to vector<140x100xf32>
    %cst_135 = arith.constant dense<0.000000e+00> : vector<152x100xf32>
    %106 = tpu.matmul %103, %105, %cst_135 {dimension_numbers = #tpu.dot_dimension_numbers<[1], [0], [0], [1], [0, 0, 1, 1], [], []>} : vector<152x140xf32>, vector<140x100xf32>, vector<152x100xf32> -> vector<152x100xf32>
    %107 = arith.addf %102, %106 : vector<152x100xf32>
    %c64_136 = arith.constant 64 : index
    %c0_137 = arith.constant 0 : index
    %108 = vector.load %arg11[%c64_136, %c0_137] : memref<216x140xf32, #tpu.memory_space<vmem>>, vector<152x140xf32>
    %c1_138 = arith.constant 1 : index
    %c4_139 = arith.constant 4 : index
    %c0_140 = arith.constant 0 : index
    %c0_141 = arith.constant 0 : index
    %109 = vector.load %arg3[%c1_138, %c4_139, %c0_140, %c0_141] : memref<2x5x140x100xf32, #tpu.memory_space<vmem>>, vector<1x1x140x100xf32>
    %110 = vector.shape_cast %109 : vector<1x1x140x100xf32> to vector<140x100xf32>
    %cst_142 = arith.constant dense<0.000000e+00> : vector<152x100xf32>
    %111 = tpu.matmul %108, %110, %cst_142 {dimension_numbers = #tpu.dot_dimension_numbers<[1], [0], [0], [1], [0, 0, 1, 1], [], []>} : vector<152x140xf32>, vector<140x100xf32>, vector<152x100xf32> -> vector<152x100xf32>
    %112 = arith.addf %107, %111 : vector<152x100xf32>
    %c0_143 = arith.constant 0 : index
    %c0_144 = arith.constant 0 : index
    %113 = vector.load %arg4[%c0_143, %c0_144] : memref<1x100xf32, #tpu.memory_space<vmem>>, vector<1x100xf32>
    %114 = vector.broadcast %113 : vector<1x100xf32> to vector<152x100xf32>
    %115 = arith.addf %112, %114 : vector<152x100xf32>
    %116 = arith.maximumf %88, %115 : vector<152x100xf32>
    %c0_145 = arith.constant 0 : index
    %c0_146 = arith.constant 0 : index
    %117 = vector.load %arg12[%c0_145, %c0_146] : memref<152x100xf32, #tpu.memory_space<vmem>>, vector<152x100xf32>
    tpu.vector_store %arg12[%c0_145, %c0_146], %116 {strides = array<i32>} : memref<152x100xf32, #tpu.memory_space<vmem>>, vector<152x100xf32>,
    %c0_147 = arith.constant 0 : index
    %c0_148 = arith.constant 0 : index
    %118 = vector.load %arg12[%c0_147, %c0_148] : memref<152x100xf32, #tpu.memory_space<vmem>>, vector<136x100xf32>
    %c16_149 = arith.constant 16 : index
    %c0_150 = arith.constant 0 : index
    %119 = vector.load %arg12[%c16_149, %c0_150] : memref<152x100xf32, #tpu.memory_space<vmem>>, vector<136x100xf32>
    %120 = arith.maximumf %118, %119 : vector<136x100xf32>
    %cst_151 = arith.constant 0.000000e+00 : f32
    %121 = vector.broadcast %cst_151 : f32 to vector<136x100xf32>
    %122 = arith.maximumf %120, %121 : vector<136x100xf32>
    %c0_152 = arith.constant 0 : index
    %c0_153 = arith.constant 0 : index
    %123 = vector.load %arg13[%c0_152, %c0_153] : memref<136x100xf32, #tpu.memory_space<vmem>>, vector<136x100xf32>
    tpu.vector_store %arg13[%c0_152, %c0_153], %122 {strides = array<i32>} : memref<136x100xf32, #tpu.memory_space<vmem>>, vector<136x100xf32>,
    %c0_154 = arith.constant 0 : index
    %c0_155 = arith.constant 0 : index
    %124 = vector.load %arg13[%c0_154, %c0_155] : memref<136x100xf32, #tpu.memory_space<vmem>>, vector<2x100xf32>
    %c0_156 = arith.constant 0 : index
    %c0_157 = arith.constant 0 : index
    %c0_158 = arith.constant 0 : index
    %125 = vector.load %arg5[%c0_156, %c0_157, %c0_158] : memref<5x100x50xf32, #tpu.memory_space<vmem>>, vector<1x100x50xf32>
    %126 = vector.shape_cast %125 : vector<1x100x50xf32> to vector<100x50xf32>
    %cst_159 = arith.constant dense<0.000000e+00> : vector<2x50xf32>
    %127 = tpu.matmul %124, %126, %cst_159 {dimension_numbers = #tpu.dot_dimension_numbers<[1], [0], [0], [1], [0, 0, 1, 1], [], []>} : vector<2x100xf32>, vector<100x50xf32>, vector<2x50xf32> -> vector<2x50xf32>
    %c32_160 = arith.constant 32 : index
    %c0_161 = arith.constant 0 : index
    %128 = vector.load %arg13[%c32_160, %c0_161] : memref<136x100xf32, #tpu.memory_space<vmem>>, vector<2x100xf32>
    %c1_162 = arith.constant 1 : index
    %c0_163 = arith.constant 0 : index
    %c0_164 = arith.constant 0 : index
    %129 = vector.load %arg5[%c1_162, %c0_163, %c0_164] : memref<5x100x50xf32, #tpu.memory_space<vmem>>, vector<1x100x50xf32>
    %130 = vector.shape_cast %129 : vector<1x100x50xf32> to vector<100x50xf32>
    %cst_165 = arith.constant dense<0.000000e+00> : vector<2x50xf32>
    %131 = tpu.matmul %128, %130, %cst_165 {dimension_numbers = #tpu.dot_dimension_numbers<[1], [0], [0], [1], [0, 0, 1, 1], [], []>} : vector<2x100xf32>, vector<100x50xf32>, vector<2x50xf32> -> vector<2x50xf32>
    %132 = arith.addf %127, %131 : vector<2x50xf32>
    %c64_166 = arith.constant 64 : index
    %c0_167 = arith.constant 0 : index
    %133 = vector.load %arg13[%c64_166, %c0_167] : memref<136x100xf32, #tpu.memory_space<vmem>>, vector<2x100xf32>
    %c2_168 = arith.constant 2 : index
    %c0_169 = arith.constant 0 : index
    %c0_170 = arith.constant 0 : index
    %134 = vector.load %arg5[%c2_168, %c0_169, %c0_170] : memref<5x100x50xf32, #tpu.memory_space<vmem>>, vector<1x100x50xf32>
    %135 = vector.shape_cast %134 : vector<1x100x50xf32> to vector<100x50xf32>
    %cst_171 = arith.constant dense<0.000000e+00> : vector<2x50xf32>
    %136 = tpu.matmul %133, %135, %cst_171 {dimension_numbers = #tpu.dot_dimension_numbers<[1], [0], [0], [1], [0, 0, 1, 1], [], []>} : vector<2x100xf32>, vector<100x50xf32>, vector<2x50xf32> -> vector<2x50xf32>
    %137 = arith.addf %132, %136 : vector<2x50xf32>
    %c96 = arith.constant 96 : index
    %c0_172 = arith.constant 0 : index
    %138 = vector.load %arg13[%c96, %c0_172] : memref<136x100xf32, #tpu.memory_space<vmem>>, vector<2x100xf32>
    %c3_173 = arith.constant 3 : index
    %c0_174 = arith.constant 0 : index
    %c0_175 = arith.constant 0 : index
    %139 = vector.load %arg5[%c3_173, %c0_174, %c0_175] : memref<5x100x50xf32, #tpu.memory_space<vmem>>, vector<1x100x50xf32>
    %140 = vector.shape_cast %139 : vector<1x100x50xf32> to vector<100x50xf32>
    %cst_176 = arith.constant dense<0.000000e+00> : vector<2x50xf32>
    %141 = tpu.matmul %138, %140, %cst_176 {dimension_numbers = #tpu.dot_dimension_numbers<[1], [0], [0], [1], [0, 0, 1, 1], [], []>} : vector<2x100xf32>, vector<100x50xf32>, vector<2x50xf32> -> vector<2x50xf32>
    %142 = arith.addf %137, %141 : vector<2x50xf32>
    %c128 = arith.constant 128 : index
    %c0_177 = arith.constant 0 : index
    %143 = vector.load %arg13[%c128, %c0_177] : memref<136x100xf32, #tpu.memory_space<vmem>>, vector<2x100xf32>
    %c4_178 = arith.constant 4 : index
    %c0_179 = arith.constant 0 : index
    %c0_180 = arith.constant 0 : index
    %144 = vector.load %arg5[%c4_178, %c0_179, %c0_180] : memref<5x100x50xf32, #tpu.memory_space<vmem>>, vector<1x100x50xf32>
    %145 = vector.shape_cast %144 : vector<1x100x50xf32> to vector<100x50xf32>
    %cst_181 = arith.constant dense<0.000000e+00> : vector<2x50xf32>
    %146 = tpu.matmul %143, %145, %cst_181 {dimension_numbers = #tpu.dot_dimension_numbers<[1], [0], [0], [1], [0, 0, 1, 1], [], []>} : vector<2x100xf32>, vector<100x50xf32>, vector<2x50xf32> -> vector<2x50xf32>
    %147 = arith.addf %142, %146 : vector<2x50xf32>
    %c0_182 = arith.constant 0 : index
    %c0_183 = arith.constant 0 : index
    %148 = vector.load %arg6[%c0_182, %c0_183] : memref<1x50xf32, #tpu.memory_space<vmem>>, vector<1x50xf32>
    %149 = vector.broadcast %148 : vector<1x50xf32> to vector<2x50xf32>
    %150 = arith.addf %147, %149 : vector<2x50xf32>
    %cst_184 = arith.constant 0.000000e+00 : f32
    %151 = vector.broadcast %cst_184 : f32 to vector<2x50xf32>
    %152 = arith.maximumf %150, %151 : vector<2x50xf32>
    %c0_185 = arith.constant 0 : index
    %c0_186 = arith.constant 0 : index
    %153 = vector.load %arg7[%c0_185, %c0_186] : memref<50x10xf32, #tpu.memory_space<vmem>>, vector<50x10xf32>
    %cst_187 = arith.constant dense<0.000000e+00> : vector<2x10xf32>
    %154 = tpu.matmul %152, %153, %cst_187 {dimension_numbers = #tpu.dot_dimension_numbers<[1], [0], [0], [1], [0, 0, 1, 1], [], []>} : vector<2x50xf32>, vector<50x10xf32>, vector<2x10xf32> -> vector<2x10xf32>
    %c0_188 = arith.constant 0 : index
    %c0_189 = arith.constant 0 : index
    %155 = vector.load %arg8[%c0_188, %c0_189] : memref<1x10xf32, #tpu.memory_space<vmem>>, vector<1x10xf32>
    %156 = vector.broadcast %155 : vector<1x10xf32> to vector<2x10xf32>
    %157 = arith.addf %154, %156 : vector<2x10xf32>
    %cst_190 = arith.constant dense<0xFF800000> : vector<2xf32>
    %158 = vector.multi_reduction <maximumf>, %157, %cst_190 [1] : vector<2x10xf32> to vector<2xf32>
    %159 = vector.shape_cast %158 : vector<2xf32> to vector<2x1xf32>
    %160 = vector.broadcast %159 : vector<2x1xf32> to vector<2x10xf32>
    %161 = arith.subf %157, %160 : vector<2x10xf32>
    %162 = math.exp %161 : vector<2x10xf32>
    %cst_191 = arith.constant dense<0.000000e+00> : vector<2xf32>
    %163 = vector.multi_reduction <add>, %162, %cst_191 [1] : vector<2x10xf32> to vector<2xf32>
    %164 = vector.shape_cast %163 : vector<2xf32> to vector<2x1xf32>
    %165 = math.log %164 : vector<2x1xf32>
    %166 = vector.broadcast %165 : vector<2x1xf32> to vector<2x10xf32>
    %167 = arith.subf %161, %166 : vector<2x10xf32>
    %c0_192 = arith.constant 0 : index
    %c0_193 = arith.constant 0 : index
    %168 = vector.load %arg9[%c0_192, %c0_193] : memref<2x10xf32, #tpu.memory_space<vmem>>, vector<2x10xf32>
    tpu.vector_store %arg9[%c0_192, %c0_193], %167 {strides = array<i32>} : memref<2x10xf32, #tpu.memory_space<vmem>>, vector<2x10xf32>,
    return
  }
}

</mosaic_0001>

<bundles_post_ra>
// kernel: simplenet_fused.1
= control target key start
LH: loop header
LB: loop body
LE: loop exit
PB: predicated region body
PF: predicated region fallthrough
CT: control target
= control target key end

     0   :  { %v12435_v7 = vmov 0.0   ;;  %vm79_vm0 = vcmask 261120   ;;  %s12425_s0 = inlined_call_operand.vmem [shape: f32[256,32], index: 0, kind: input, shape index: {}]   ;;  %s12426_s1 = inlined_call_operand.vmem [shape: f32[2,5,32,140], index: 1, kind: input, shape index: {}]   ;;  %s12427_s2 = inlined_call_operand.vmem [shape: f32[1,140], index: 2, kind: input, shape index: {}]   ;;  %s12428_s3 = inlined_call_operand.vmem [shape: f32[2,5,140,100], index: 3, kind: input, shape index: {}]   ;;  %s12429_s4 = inlined_call_operand.vmem [shape: f32[1,100], index: 4, kind: input, shape index: {}]   ;;  %s12430_s5 = inlined_call_operand.vmem [shape: f32[5,100,50], index: 5, kind: input, shape index: {}]   ;;  %s12431_s6 = inlined_call_operand.vmem [shape: f32[1,50], index: 6, kind: input, shape index: {}]   ;;  %s12432_s7 = inlined_call_operand.vmem [shape: f32[50,10], index: 7, kind: input, shape index: {}]   ;;  %s12433_s8 = inlined_call_operand.vmem [shape: f32[1,10], index: 8, kind: input, shape index: {}]   ;;  %s12434_s9 = inlined_call_operand.hbm [shape: f32[2,10], index: 9, kind: output, shape index: {}]  }
   0x1   :  { %v6761_v0 = vld [vmem:[%s12426_s1 + $0x48] sm:$0xff]  ;;  %v6763_v1 = vld [vmem:[%s12426_s1 + $0x58] sm:$0xff]  ;;  %v6760_v5 = vld [vmem:[%s12426_s1 + $0x40] sm:$0xff]  ;;  %228 = vmatprep.mubr.f32.mxu0 %v12435_v7  ;;  %2013 = vmatprep.mubr.f32.mxu1 %v12435_v7 }
   0x2   :  { %v6941_v2 = vld [vmem:[%s12426_s1 + $0x188] sm:$0xff]  ;;  %v7781_v3 = vpack.c.bf16 %v6763_v1, %v6761_v0  ;;  %v6943_v4 = vld [vmem:[%s12426_s1 + $0x198] sm:$0xff]  ;;  %v6762_v6 = vld [vmem:[%s12426_s1 + $0x50] sm:$0xff] }
   0x3   :  { %v7821_v8 = vpack.c.bf16 %v6943_v4, %v6941_v2  ;;  %v7783_v9 = vpack.c.bf16 %v6762_v6, %v6760_v5  ;;  %v6940_v10 = vld [vmem:[%s12426_s1 + $0x180] sm:$0xff]  ;;  %v6942_v11 = vld [vmem:[%s12426_s1 + $0x190] sm:$0xff]  ;;  %v6765_v12 = vld [vmem:[%s12426_s1 + $0x68] sm:$0xff] }
   0x4   :  { %7782 = vmatprep.subr.bf16.mxu0 %v7781_v3  ;;  %v7823_v13 = vpack.c.bf16 %v6942_v11, %v6940_v10  ;;  %v6767_v14 = vld [vmem:[%s12426_s1 + $0x78] sm:$0xff]  ;;  %v6945_v15 = vld [vmem:[%s12426_s1 + $0x1a8] sm:$0xff]  ;;  %v6764_v19 = vld [vmem:[%s12426_s1 + $0x60] sm:$0xff] }
   0x5   :  { %v6947_v16 = vld [vmem:[%s12426_s1 + $0x1b8] sm:$0xff]  ;;  %7822 = vmatprep.subr.bf16.mxu1 %v7821_v8  ;;  %7784 = vmatpush1.bf16.msra.mxu0 %v7783_v9  ;;  %v7785_v17 = vpack.c.bf16 %v6767_v14, %v6765_v12  ;;  %v6766_v20 = vld [vmem:[%s12426_s1 + $0x70] sm:$0xff]  ;;  %v6944_v21 = vld [vmem:[%s12426_s1 + $0x1a0] sm:$0xff] }
   0x6   :  { %v7825_v18 = vpack.c.bf16 %v6947_v16, %v6945_v15  ;;  %7824 = vmatpush1.bf16.msra.mxu1 %v7823_v13  ;;  %v7787_v22 = vpack.c.bf16 %v6766_v20, %v6764_v19  ;;  %v6946_v23 = vld [vmem:[%s12426_s1 + $0x1b0] sm:$0xff]  ;;  %v62_v24 = vld [vmem:[%s12426_s1 + $0x8] sm:$0xff]  ;;  %v64_v26 = vld [vmem:[%s12426_s1 + $0x18] sm:$0xff] }
   0x7   :  { %7786 = vmatprep.subr.bf16.mxu0 %v7785_v17  ;;  %v7827_v25 = vpack.c.bf16 %v6946_v23, %v6944_v21  ;;  %v6933_v27 = vld [vmem:[%s12426_s1 + $0x148] sm:$0xff]  ;;  %v6935_v28 = vld [vmem:[%s12426_s1 + $0x158] sm:$0xff]  ;;  %v7789_v29 = vpack.c.bf16 %v64_v26, %v62_v24  ;;  %v61_v31 = vld [vmem:[%s12426_s1] sm:$0xff] }
   0x8   :  { %7826 = vmatprep.subr.bf16.mxu1 %v7825_v18  ;;  %v7829_v30 = vpack.c.bf16 %v6935_v28, %v6933_v27  ;;  %v63_v32 = vld [vmem:[%s12426_s1 + $0x10] sm:$0xff]  ;;  %v6932_v33 = vld [vmem:[%s12426_s1 + $0x140] sm:$0xff]  ;;  %v8906_v34 = vld [vmem:[%s12425_s0 + $0x8] sm:$0xff] }
   0x9   :  { %7788 = vmatpush1.bf16.msra.mxu0 %v7787_v22  ;;  %v7791_v35 = vpack.c.bf16 %v63_v32, %v61_v31  ;;  %v6934_v36 = vld [vmem:[%s12426_s1 + $0x150] sm:$0xff]  ;;  %v66_v39 = vld [vmem:[%s12426_s1 + $0x28] sm:$0xff]  ;;  %v68_v40 = vld [vmem:[%s12426_s1 + $0x38] sm:$0xff] }
   0xa   :  { %7828 = vmatpush1.bf16.msra.mxu1 %v7827_v25  ;;  %7790 = vmatprep.subr.bf16.mxu0 %v7789_v29  ;;  %v7831_v37 = vpack.c.bf16 %v6934_v36, %v6932_v33  ;;  %v8918_v38 = vld [vmem:[%s12425_s0 + $0x10] sm:$0xff]  ;;  %v6937_v41 = vld [vmem:[%s12426_s1 + $0x168] sm:$0xff]  ;;  %v7793_v42 = vpack.c.bf16 %v68_v40, %v66_v39  ;;  %v6939_v43 = vld [vmem:[%s12426_s1 + $0x178] sm:$0xff] }
   0xb   :  { %7830 = vmatprep.subr.bf16.mxu1 %v7829_v30  ;;  %v65_v44 = vld [vmem:[%s12426_s1 + $0x20] sm:$0xff]  ;;  %v67_v45 = vld [vmem:[%s12426_s1 + $0x30] sm:$0xff]  ;;  %v7833_v46 = vpack.c.bf16 %v6939_v43, %v6937_v41  ;;  %v8954_v50 = vld [vmem:[%s12425_s0 + $0x18] sm:$0xff] }
   0xc   :  { %6768 = vmatmul.mubr.msk.f32.vlgmr.msra.gmra.mrb[0].mxu0 %vm79_vm0, %v8906_v34  ;;  %v7795_v47 = vpack.c.bf16 %v67_v45, %v65_v44  ;;  %v6936_v48 = vld [vmem:[%s12426_s1 + $0x160] sm:$0xff]  ;;  %v6938_v49 = vld [vmem:[%s12426_s1 + $0x170] sm:$0xff]  ;;  %v6825_v53 = vld [vmem:[%s12426_s1 + $0x88] sm:$0xff] }
   0xd   :  { %6948 = vmatmul.mubr.msk.f32.vlgmr.msra.gmra.mrb[0].mxu1 %vm79_vm0, %v8906_v34  ;;  %7792 = vmatpush1.bf16.msra.mxu0 %v7791_v35  ;;  %v7835_v51 = vpack.c.bf16 %v6938_v49, %v6936_v48  ;;  %v8965_v52 = vld [vmem:[%s12425_s0 + $0x20] sm:$0xff]  ;;  %v6827_v54 = vld [vmem:[%s12426_s1 + $0x98] sm:$0xff]  ;;  %v7005_v56 = vld [vmem:[%s12426_s1 + $0x1c8] sm:$0xff] }
   0xe   :  { %7832 = vmatpush1.bf16.msra.mxu1 %v7831_v37  ;;  %234 = vmatprep.mubr.f32.mxu0 %v12435_v7  ;;  %v7797_v55 = vpack.c.bf16 %v6827_v54, %v6825_v53  ;;  %v7007_v57 = vld [vmem:[%s12426_s1 + $0x1d8] sm:$0xff] }
   0xf   :  { %2019 = vmatprep.mubr.f32.mxu1 %v12435_v7  ;;  %7794 = vmatprep.subr.bf16.mxu0 %v7793_v42  ;;  %v7837_v58 = vpack.c.bf16 %v7007_v57, %v7005_v56 }
  0x10   :  { %6769 = vmatmul.mubr.msk.f32.gmra.mrb[2].mxu0 %vm79_vm0, %v8918_v38  ;;  %7834 = vmatprep.subr.bf16.mxu1 %v7833_v46 }
  0x11   :  { %6949 = vmatmul.mubr.msk.f32.gmra.mrb[2].mxu1 %vm79_vm0, %v8918_v38  ;;  %240 = vmatprep.mubr.f32.mxu0 %v12435_v7 }
  0x12   :  { %2025 = vmatprep.mubr.f32.mxu1 %v12435_v7  ;;  %7796 = vmatpush1.bf16.msra.mxu0 %v7795_v47 }
  0x13   :  { %7836 = vmatpush1.bf16.msra.mxu1 %v7835_v51  ;;  %7798 = vmatprep.subr.bf16.mxu0 %v7797_v55 }
  0x14   :  { %6770 = vmatmul.mubr.msk.f32.gmra.mrb[4].mxu0 %vm79_vm0, %v8954_v50 }
  0x15   :  { %6950 = vmatmul.mubr.msk.f32.gmra.mrb[4].mxu1 %vm79_vm0, %v8954_v50  ;;  %246 = vmatprep.mubr.f32.mxu0 %v12435_v7 }
  0x16   :  { %2031 = vmatprep.mubr.f32.mxu1 %v12435_v7 }
  0x18   :  { %6771 = vmatmul.mubr.msk.f32.gmra.mrb[6].mxu0 %vm79_vm0, %v8965_v52 }
  0x19   :  { %14 = vsyncpa [#allocation7], 0  ;;  %6951 = vmatmul.mubr.msk.f32.gmra.mrb[6].mxu1 %vm79_vm0, %v8965_v52  ;;  %252 = vmatprep.mubr.f32.mxu0 %v12435_v7  ;;  %v8988_v59 = vld [vmem:[%s12425_s0 + $0x28] sm:$0xff]  ;;  %v8999_v60 = vld [vmem:[%s12425_s0 + $0x30] sm:$0xff]  ;;  %vm3832_vm1 = vcmask 1043456   ;;  %vm8779_vm2 = vmmov 1  }
  0x1a   :  { %2037 = vmatprep.mubr.f32.mxu1 %v12435_v7  ;;  %7838 = vmatprep.subr.bf16.mxu1 %v7837_v58  ;;  %v9010_v61 = vld [vmem:[%s12425_s0 + $0x38] sm:$0xff]  ;;  %v9021_v62 = vld [vmem:[%s12425_s0 + $0x40] sm:$0xff]  ;;  %v9032_v63 = vld [vmem:[%s12425_s0 + $0x48] sm:$0xff]  ;;  %vm3422_vm4 = vcmask 97280   ;;  %vm8780_vm5 = vmmov 0   ;;  %vm6084_vm6 = vcmask 818176  }
  0x1b   :  { %v9043_v0 = vld [vmem:[%s12425_s0 + $0x50] sm:$0xff]  ;;  %v9054_v1 = vld [vmem:[%s12425_s0 + $0x58] sm:$0xff]  ;;  %v9065_v2 = vld [vmem:[%s12425_s0 + $0x60] sm:$0xff]  ;;  %vm6658_vm7 = vcmask 1041408   ;;  %vm6654_vm8 = vcmask 408576   ;;  %vm6732_vm9 = vcmask 74752  }
  0x1c   :  { %6772 = vmatmul.mubr.msk.f32.gmra.mrb[8].mxu0 %vm79_vm0, %v8988_v59  ;;  %v9076_v3 = vld [vmem:[%s12425_s0 + $0x68] sm:$0xff]  ;;  %v9087_v4 = vld [vmem:[%s12425_s0 + $0x70] sm:$0xff]  ;;  %v9098_v5 = vld [vmem:[%s12425_s0 + $0x78] sm:$0xff] }
  0x1d   :  { %6952 = vmatmul.mubr.msk.f32.gmra.mrb[8].mxu1 %vm79_vm0, %v8988_v59  ;;  %258 = vmatprep.mubr.f32.mxu0 %v12435_v7  ;;  %v9109_v6 = vld [vmem:[%s12425_s0 + $0x80] sm:$0xff]  ;;  %v9120_v8 = vld [vmem:[%s12425_s0 + $0x88] sm:$0xff]  ;;  %v9131_v9 = vld [vmem:[%s12425_s0 + $0x90] sm:$0xff] }
  0x1e   :  { %2043 = vmatprep.mubr.f32.mxu1 %v12435_v7  ;;  %v9142_v10 = vld [vmem:[%s12425_s0 + $0x98] sm:$0xff]  ;;  %v9153_v11 = vld [vmem:[%s12425_s0 + $0xa0] sm:$0xff]  ;;  %v9164_v12 = vld [vmem:[%s12425_s0 + $0xa8] sm:$0xff] }
  0x1f   :  { %v9175_v13 = vld [vmem:[%s12425_s0 + $0xb0] sm:$0xff]  ;;  %v9186_v14 = vld [vmem:[%s12425_s0 + $0xb8] sm:$0xff]  ;;  %v9197_v15 = vld [vmem:[%s12425_s0 + $0xc0] sm:$0xff] }
  0x20   :  { %6773 = vmatmul.mubr.msk.f32.gmra.mrb[10].mxu0 %vm79_vm0, %v8999_v60  ;;  %v9208_v16 = vld [vmem:[%s12425_s0 + $0xc8] sm:$0xff]  ;;  %v9219_v17 = vld [vmem:[%s12425_s0 + $0xd0] sm:$0xff]  ;;  %v9230_v18 = vld [vmem:[%s12425_s0 + $0xd8] sm:$0xff] }
  0x21   :  { %6953 = vmatmul.mubr.msk.f32.gmra.mrb[10].mxu1 %vm79_vm0, %v8999_v60  ;;  %264 = vmatprep.mubr.f32.mxu0 %v12435_v7  ;;  %v9241_v19 = vld [vmem:[%s12425_s0 + $0xe0] sm:$0xff]  ;;  %v6826_v21 = vld [vmem:[%s12426_s1 + $0x90] sm:$0xff]  ;;  %v6829_v24 = vld [vmem:[%s12426_s1 + $0xa8] sm:$0xff] }
  0x22   :  { %2049 = vmatprep.mubr.f32.mxu1 %v12435_v7  ;;  %v6824_v20 = vld [vmem:[%s12426_s1 + $0x80] sm:$0xff]  ;;  %v7006_v23 = vld [vmem:[%s12426_s1 + $0x1d0] sm:$0xff]  ;;  %v6831_v25 = vld [vmem:[%s12426_s1 + $0xb8] sm:$0xff] }
  0x23   :  { %v7004_v22 = vld [vmem:[%s12426_s1 + $0x1c0] sm:$0xff]  ;;  %v7799_v27 = vpack.c.bf16 %v6826_v21, %v6824_v20  ;;  %v7009_v28 = vld [vmem:[%s12426_s1 + $0x1e8] sm:$0xff]  ;;  %v7011_v29 = vld [vmem:[%s12426_s1 + $0x1f8] sm:$0xff]  ;;  %v7801_v31 = vpack.c.bf16 %v6831_v25, %v6829_v24 }
  0x24   :  { %6774 = vmatmul.mubr.msk.f32.gmra.mrb[12].mxu0 %vm79_vm0, %v9010_v61  ;;  %v33_v26 = vld [vmem:[%s12425_s0] sm:$0xff]  ;;  %v7839_v30 = vpack.c.bf16 %v7006_v23, %v7004_v22  ;;  %v6830_v33 = vld [vmem:[%s12426_s1 + $0xb0] sm:$0xff]  ;;  %v7841_v36 = vpack.c.bf16 %v7011_v29, %v7009_v28  ;;  %v6861_v39 = vld [vmem:[%s12426_s1 + $0xc8] sm:$0xff] }
  0x25   :  { %6954 = vmatmul.mubr.msk.f32.gmra.mrb[12].mxu1 %vm79_vm0, %v9010_v61  ;;  %270 = vmatprep.mubr.f32.mxu0 %v12435_v7  ;;  %v6828_v32 = vld [vmem:[%s12426_s1 + $0xa0] sm:$0xff]  ;;  %v7010_v37 = vld [vmem:[%s12426_s1 + $0x1f0] sm:$0xff]  ;;  %v6863_v40 = vld [vmem:[%s12426_s1 + $0xd8] sm:$0xff] }
  0x26   :  { %2055 = vmatprep.mubr.f32.mxu1 %v12435_v7  ;;  %v7008_v35 = vld [vmem:[%s12426_s1 + $0x1e0] sm:$0xff]  ;;  %v7041_v41 = vld [vmem:[%s12426_s1 + $0x208] sm:$0xff]  ;;  %v7043_v42 = vld [vmem:[%s12426_s1 + $0x218] sm:$0xff]  ;;  %v7803_v43 = vpack.c.bf16 %v6830_v33, %v6828_v32  ;;  %v7805_v45 = vpack.c.bf16 %v6863_v40, %v6861_v39 }
  0x27   :  { %v7843_v44 = vpack.c.bf16 %v7010_v37, %v7008_v35  ;;  %v7845_v46 = vpack.c.bf16 %v7043_v42, %v7041_v41  ;;  %v6862_v47 = vld [vmem:[%s12426_s1 + $0xd0] sm:$0xff]  ;;  %v7040_v48 = vld [vmem:[%s12426_s1 + $0x200] sm:$0xff]  ;;  %v6865_v51 = vld [vmem:[%s12426_s1 + $0xe8] sm:$0xff] }
  0x28   :  { %6775 = vmatmul.mubr.msk.f32.gmra.mrb[14].mxu0 %vm79_vm0, %v9021_v62  ;;  %v7042_v49 = vld [vmem:[%s12426_s1 + $0x210] sm:$0xff]  ;;  %v6867_v53 = vld [vmem:[%s12426_s1 + $0xf8] sm:$0xff]  ;;  %v7045_v55 = vld [vmem:[%s12426_s1 + $0x228] sm:$0xff] }
  0x29   :  { %6955 = vmatmul.mubr.msk.f32.gmra.mrb[14].mxu1 %vm79_vm0, %v9021_v62  ;;  %276 = vmatprep.mubr.f32.mxu0 %v12435_v7  ;;  %v7047_v56 = vld [vmem:[%s12426_s1 + $0x238] sm:$0xff]  ;;  %v7847_v57 = vpack.c.bf16 %v7042_v49, %v7040_v48  ;;  %v7809_v58 = vpack.c.bf16 %v6867_v53, %v6865_v51  ;;  %v6864_v20 = vld [vmem:[%s12426_s1 + $0xe0] sm:$0xff]  ;;  %v6866_v21 = vld [vmem:[%s12426_s1 + $0xf0] sm:$0xff] }
  0x2a   :  { %2061 = vmatprep.mubr.f32.mxu1 %v12435_v7  ;;  %v7044_v22 = vld [vmem:[%s12426_s1 + $0x220] sm:$0xff]  ;;  %v7849_v23 = vpack.c.bf16 %v7047_v56, %v7045_v55  ;;  %v7046_v24 = vld [vmem:[%s12426_s1 + $0x230] sm:$0xff]  ;;  %v6897_v25 = vld [vmem:[%s12426_s1 + $0x108] sm:$0xff]  ;;  %v7811_v29 = vpack.c.bf16 %v6866_v21, %v6864_v20 }
  0x2b   :  { %v7079_v28 = vld [vmem:[%s12426_s1 + $0x258] sm:$0xff]  ;;  %v9679_v32 = vld [vmem:[%s12425_s0 + $0xe8] sm:$0xff]  ;;  %v6896_v33 = vld [vmem:[%s12426_s1 + $0x100] sm:$0xff] }
  0x2c   :  { %6776 = vmatmul.mubr.msk.f32.gmra.mrb[16].mxu0 %vm79_vm0, %v9032_v63  ;;  %v6898_v35 = vld [vmem:[%s12426_s1 + $0x110] sm:$0xff]  ;;  %v6901_v39 = vld [vmem:[%s12426_s1 + $0x128] sm:$0xff]  ;;  %v6903_v40 = vld [vmem:[%s12426_s1 + $0x138] sm:$0xff] }
  0x2d   :  { %6956 = vmatmul.mubr.msk.f32.gmra.mrb[16].mxu1 %vm79_vm0, %v9032_v63  ;;  %282 = vmatprep.mubr.f32.mxu0 %v12435_v7  ;;  %v7078_v37 = vld [vmem:[%s12426_s1 + $0x250] sm:$0xff]  ;;  %v7815_v41 = vpack.c.bf16 %v6898_v35, %v6896_v33  ;;  %v7081_v42 = vld [vmem:[%s12426_s1 + $0x268] sm:$0xff]  ;;  %v7080_v48 = vld [vmem:[%s12426_s1 + $0x260] sm:$0xff] }
  0x2e   :  { %2067 = vmatprep.mubr.f32.mxu1 %v12435_v7  ;;  %v7082_v49 = vld [vmem:[%s12426_s1 + $0x270] sm:$0xff]  ;;  %v1456_v55 = vld [vmem:[%s12425_s0 + $0x38] sm:$0xff]  ;;  %v3742_v21 = vld [vmem:[%s12428_s3 + $0x40] sm:$0xff] }
  0x2f   :  { %v7859_v53 = vpack.c.bf16 %v7082_v49, %v7080_v48  ;;  %v7121_v20 = vld [vmem:[%s12428_s3 + $0xd8] sm:$0xff]  ;;  %v1459_v33 = vld [vmem:[%s12425_s0 + $0x50] sm:$0xff]  ;;  %v1473_v48 = vld [vmem:[%s12425_s0 + $0xc0] sm:$0xff] }
  0x30   :  { %6777 = vmatmul.mubr.msk.f32.gmra.mrb[18].mxu0 %vm79_vm0, %v9043_v0  ;;  %v1460_v35 = vld [vmem:[%s12425_s0 + $0x58] sm:$0xff]  ;;  %v1474_v49 = vld [vmem:[%s12425_s0 + $0xc8] sm:$0xff]  ;;  %vm10209_vm3 = vmpackc.low %vm3832_vm1, %vm8779_vm2 }
  0x31   :  { %6957 = vmatmul.mubr.msk.f32.gmra.mrb[18].mxu1 %vm79_vm0, %v9043_v0  ;;  %288 = vmatprep.mubr.f32.mxu0 %v12435_v7 }
  0x32   :  { %2073 = vmatprep.mubr.f32.mxu1 %v12435_v7 }
  0x34   :  { %6778 = vmatmul.mubr.msk.f32.gmra.mrb[20].mxu0 %vm79_vm0, %v9054_v1 }
  0x35   :  { %6958 = vmatmul.mubr.msk.f32.gmra.mrb[20].mxu1 %vm79_vm0, %v9054_v1  ;;  %294 = vmatprep.mubr.f32.mxu0 %v12435_v7 }
  0x36   :  { %2079 = vmatprep.mubr.f32.mxu1 %v12435_v7 }
  0x38   :  { %6779 = vmatmul.mubr.msk.f32.gmra.mrb[22].mxu0 %vm79_vm0, %v9065_v2 }
  0x39   :  { %6959 = vmatmul.mubr.msk.f32.gmra.mrb[22].mxu1 %vm79_vm0, %v9065_v2  ;;  %300 = vmatprep.mubr.f32.mxu0 %v12435_v7 }
  0x3a   :  { %2085 = vmatprep.mubr.f32.mxu1 %v12435_v7 }
  0x3c   :  { %6780 = vmatmul.mubr.msk.f32.gmra.mrb[24].mxu0 %vm79_vm0, %v9076_v3 }
  0x3d   :  { %6960 = vmatmul.mubr.msk.f32.gmra.mrb[24].mxu1 %vm79_vm0, %v9076_v3  ;;  %306 = vmatprep.mubr.f32.mxu0 %v12435_v7 }
  0x3e   :  { %2091 = vmatprep.mubr.f32.mxu1 %v12435_v7 }
  0x40   :  { %6781 = vmatmul.mubr.msk.f32.gmra.mrb[26].mxu0 %vm79_vm0, %v9087_v4 }
  0x41   :  { %6961 = vmatmul.mubr.msk.f32.gmra.mrb[26].mxu1 %vm79_vm0, %v9087_v4  ;;  %312 = vmatprep.mubr.f32.mxu0 %v12435_v7 }
  0x42   :  { %2097 = vmatprep.mubr.f32.mxu1 %v12435_v7 }
  0x44   :  { %6782 = vmatmul.mubr.msk.f32.gmra.mrb[28].mxu0 %vm79_vm0, %v9098_v5 }
  0x45   :  { %6962 = vmatmul.mubr.msk.f32.gmra.mrb[28].mxu1 %vm79_vm0, %v9098_v5  ;;  %318 = vmatprep.mubr.f32.mxu0 %v12435_v7 }
  0x46   :  { %2103 = vmatprep.mubr.f32.mxu1 %v12435_v7 }
  0x48   :  { %6783 = vmatmul.mubr.msk.f32.gmra.mrb[30].mxu0 %vm79_vm0, %v9109_v6 }
  0x49   :  { %6963 = vmatmul.mubr.msk.f32.gmra.mrb[30].mxu1 %vm79_vm0, %v9109_v6  ;;  %324 = vmatprep.mubr.f32.mxu0 %v12435_v7 }
  0x4a   :  { %2109 = vmatprep.mubr.f32.mxu1 %v12435_v7 }
  0x4c   :  { %6784 = vmatmul.mubr.msk.f32.gmra.mrb[32].mxu0 %vm79_vm0, %v9120_v8 }
  0x4d   :  { %6964 = vmatmul.mubr.msk.f32.gmra.mrb[32].mxu1 %vm79_vm0, %v9120_v8  ;;  %330 = vmatprep.mubr.f32.mxu0 %v12435_v7 }
  0x4e   :  { %2115 = vmatprep.mubr.f32.mxu1 %v12435_v7 }
  0x50   :  { %6785 = vmatmul.mubr.msk.f32.gmra.mrb[34].mxu0 %vm79_vm0, %v9131_v9 }
  0x51   :  { %6965 = vmatmul.mubr.msk.f32.gmra.mrb[34].mxu1 %vm79_vm0, %v9131_v9  ;;  %336 = vmatprep.mubr.f32.mxu0 %v12435_v7 }
  0x52   :  { %2121 = vmatprep.mubr.f32.mxu1 %v12435_v7 }
  0x54   :  { %6786 = vmatmul.mubr.msk.f32.gmra.mrb[36].mxu0 %vm79_vm0, %v9142_v10 }
  0x55   :  { %6966 = vmatmul.mubr.msk.f32.gmra.mrb[36].mxu1 %vm79_vm0, %v9142_v10  ;;  %342 = vmatprep.mubr.f32.mxu0 %v12435_v7 }
  0x56   :  { %2127 = vmatprep.mubr.f32.mxu1 %v12435_v7 }
  0x58   :  { %6787 = vmatmul.mubr.msk.f32.gmra.mrb[38].mxu0 %vm79_vm0, %v9153_v11 }
  0x59   :  { %6967 = vmatmul.mubr.msk.f32.gmra.mrb[38].mxu1 %vm79_vm0, %v9153_v11  ;;  %348 = vmatprep.mubr.f32.mxu0 %v12435_v7 }
  0x5a   :  { %2133 = vmatprep.mubr.f32.mxu1 %v12435_v7 }
  0x5c   :  { %6788 = vmatmul.mubr.msk.f32.gmra.mrb[40].mxu0 %vm79_vm0, %v9164_v12 }
  0x5d   :  { %6968 = vmatmul.mubr.msk.f32.gmra.mrb[40].mxu1 %vm79_vm0, %v9164_v12  ;;  %354 = vmatprep.mubr.f32.mxu0 %v12435_v7 }
  0x5e   :  { %2139 = vmatprep.mubr.f32.mxu1 %v12435_v7 }
  0x60   :  { %6789 = vmatmul.mubr.msk.f32.gmra.mrb[42].mxu0 %vm79_vm0, %v9175_v13 }
  0x61   :  { %6969 = vmatmul.mubr.msk.f32.gmra.mrb[42].mxu1 %vm79_vm0, %v9175_v13  ;;  %360 = vmatprep.mubr.f32.mxu0 %v12435_v7 }
  0x62   :  { %2145 = vmatprep.mubr.f32.mxu1 %v12435_v7 }
  0x64   :  { %6790 = vmatmul.mubr.msk.f32.gmra.mrb[44].mxu0 %vm79_vm0, %v9186_v14 }
  0x65   :  { %6970 = vmatmul.mubr.msk.f32.gmra.mrb[44].mxu1 %vm79_vm0, %v9186_v14  ;;  %366 = vmatprep.mubr.f32.mxu0 %v12435_v7 }
  0x66   :  { %2151 = vmatprep.mubr.f32.mxu1 %v12435_v7 }
  0x68   :  { %6791 = vmatmul.mubr.msk.f32.gmra.mrb[46].mxu0 %vm79_vm0, %v9197_v15 }
  0x69   :  { %6971 = vmatmul.mubr.msk.f32.gmra.mrb[46].mxu1 %vm79_vm0, %v9197_v15  ;;  %372 = vmatprep.mubr.f32.mxu0 %v12435_v7 }
  0x6a   :  { %2157 = vmatprep.mubr.f32.mxu1 %v12435_v7 }
  0x6c   :  { %6792 = vmatmul.mubr.msk.f32.gmra.mrb[48].mxu0 %vm79_vm0, %v9208_v16 }
  0x6d   :  { %6972 = vmatmul.mubr.msk.f32.gmra.mrb[48].mxu1 %vm79_vm0, %v9208_v16  ;;  %378 = vmatprep.mubr.f32.mxu0 %v12435_v7 }
  0x6e   :  { %2163 = vmatprep.mubr.f32.mxu1 %v12435_v7 }
  0x70   :  { %6793 = vmatmul.mubr.msk.f32.gmra.mrb[50].mxu0 %vm79_vm0, %v9219_v17 }
  0x71   :  { %6973 = vmatmul.mubr.msk.f32.gmra.mrb[50].mxu1 %vm79_vm0, %v9219_v17  ;;  %384 = vmatprep.mubr.f32.mxu0 %v12435_v7 }
  0x72   :  { %2169 = vmatprep.mubr.f32.mxu1 %v12435_v7 }
  0x74   :  { %6794 = vmatmul.mubr.msk.f32.gmra.mrb[52].mxu0 %vm79_vm0, %v9230_v18 }
  0x75   :  { %6974 = vmatmul.mubr.msk.f32.gmra.mrb[52].mxu1 %vm79_vm0, %v9230_v18  ;;  %390 = vmatprep.mubr.f32.mxu0 %v12435_v7 }
  0x76   :  { %2175 = vmatprep.mubr.f32.mxu1 %v12435_v7 }
  0x78   :  { %6795 = vmatmul.mubr.msk.f32.gmra.mrb[54].mxu0 %vm79_vm0, %v9241_v19 }
  0x79   :  { %6975 = vmatmul.mubr.msk.f32.gmra.mrb[54].mxu1 %vm79_vm0, %v9241_v19  ;;  %464 = vmatprep.mubr.f32.mxu0 %v12435_v7 }
  0x7a   :  { %2246 = vmatprep.mubr.f32.mxu1 %v12435_v7 }
  0x7c   :  { %6796 = vmatmul.mubr.msk.f32.vlgmr.msra.gmra.mrb[0].mxu0 %vm79_vm0, %v33_v26 }
  0x7d   :  { %6976 = vmatmul.mubr.msk.f32.vlgmr.msra.gmra.mrb[0].mxu1 %vm79_vm0, %v33_v26  ;;  %7800 = vmatpush1.bf16.msra.mxu0 %v7799_v27  ;;  %v6899_v26 = vld [vmem:[%s12426_s1 + $0x118] sm:$0xff]  ;;  %v7077_v27 = vld [vmem:[%s12426_s1 + $0x248] sm:$0xff] }
  0x7e   :  { %7840 = vmatpush1.bf16.msra.mxu1 %v7839_v30  ;;  %470 = vmatprep.mubr.f32.mxu0 %v12435_v7  ;;  %v7851_v30 = vpack.c.bf16 %v7046_v24, %v7044_v22  ;;  %v3743_v22 = vld [vmem:[%s12428_s3 + $0x48] sm:$0xff] }
  0x7f   :  { %2252 = vmatprep.mubr.f32.mxu1 %v12435_v7  ;;  %7802 = vmatprep.subr.bf16.mxu0 %v7801_v31  ;;  %v7813_v31 = vpack.c.bf16 %v6899_v26, %v6897_v25  ;;  %v7902_v25 = vpack.c.bf16 %v3743_v22, %v3742_v21  ;;  %v7122_v26 = vld [vmem:[%s12428_s3 + $0xe0] sm:$0xff] }
  0x80   :  { %6797 = vmatmul.mubr.msk.f32.gmra.mrb[2].mxu0 %vm79_vm0, %v8906_v34  ;;  %7842 = vmatprep.subr.bf16.mxu1 %v7841_v36  ;;  %v7076_v36 = vld [vmem:[%s12426_s1 + $0x240] sm:$0xff] }
  0x81   :  { %6977 = vmatmul.mubr.msk.f32.gmra.mrb[2].mxu1 %vm79_vm0, %v8906_v34  ;;  %476 = vmatprep.mubr.f32.mxu0 %v12435_v7  ;;  %v6860_v34 = vld [vmem:[%s12426_s1 + $0xc0] sm:$0xff] }
  0x82   :  { %2258 = vmatprep.mubr.f32.mxu1 %v12435_v7  ;;  %7804 = vmatpush1.bf16.msra.mxu0 %v7803_v43  ;;  %v7807_v54 = vpack.c.bf16 %v6862_v47, %v6860_v34  ;;  %v7083_v43 = vld [vmem:[%s12426_s1 + $0x278] sm:$0xff]  ;;  %v6902_v34 = vld [vmem:[%s12426_s1 + $0x130] sm:$0xff] }
  0x83   :  { %7844 = vmatpush1.bf16.msra.mxu1 %v7843_v44  ;;  %7806 = vmatprep.subr.bf16.mxu0 %v7805_v45  ;;  %v7855_v44 = vpack.c.bf16 %v7078_v37, %v7076_v36  ;;  %v7817_v45 = vpack.c.bf16 %v6903_v40, %v6901_v39  ;;  %v7857_v47 = vpack.c.bf16 %v7083_v43, %v7081_v42  ;;  %v1461_v36 = vld [vmem:[%s12425_s0 + $0x60] sm:$0xff]  ;;  %v1462_v37 = vld [vmem:[%s12425_s0 + $0x68] sm:$0xff]  ;;  %v1463_v39 = vld [vmem:[%s12425_s0 + $0x70] sm:$0xff] }
  0x84   :  { %6798 = vmatmul.mubr.msk.f32.gmra.mrb[4].mxu0 %vm79_vm0, %v8918_v38  ;;  %7846 = vmatprep.subr.bf16.mxu1 %v7845_v46  ;;  %v6900_v46 = vld [vmem:[%s12426_s1 + $0x120] sm:$0xff]  ;;  %v1464_v40 = vld [vmem:[%s12425_s0 + $0x78] sm:$0xff]  ;;  %v1466_v42 = vld [vmem:[%s12425_s0 + $0x88] sm:$0xff] }
  0x85   :  { %6978 = vmatmul.mubr.msk.f32.gmra.mrb[4].mxu1 %vm79_vm0, %v8918_v38  ;;  %482 = vmatprep.mubr.f32.mxu0 %v12435_v7  ;;  %v7819_v51 = vpack.c.bf16 %v6902_v34, %v6900_v46  ;;  %v1467_v43 = vld [vmem:[%s12425_s0 + $0x90] sm:$0xff]  ;;  %v1470_v46 = vld [vmem:[%s12425_s0 + $0xa8] sm:$0xff] }
  0x86   :  { %2264 = vmatprep.mubr.f32.mxu1 %v12435_v7  ;;  %v1471_v34 = vld [vmem:[%s12425_s0 + $0xb0] sm:$0xff] }
  0x88   :  { %6799 = vmatmul.mubr.msk.f32.gmra.mrb[6].mxu0 %vm79_vm0, %v8954_v50 }
  0x89   :  { %6979 = vmatmul.mubr.msk.f32.gmra.mrb[6].mxu1 %vm79_vm0, %v8954_v50  ;;  %488 = vmatprep.mubr.f32.mxu0 %v12435_v7 }
  0x8a   :  { %2270 = vmatprep.mubr.f32.mxu1 %v12435_v7 }
  0x8c   :  { %6800 = vmatmul.mubr.msk.f32.gmra.mrb[8].mxu0 %vm79_vm0, %v8965_v52 }
  0x8d   :  { %6980 = vmatmul.mubr.msk.f32.gmra.mrb[8].mxu1 %vm79_vm0, %v8965_v52  ;;  %494 = vmatprep.mubr.f32.mxu0 %v12435_v7 }
  0x8e   :  { %2276 = vmatprep.mubr.f32.mxu1 %v12435_v7 }
  0x90   :  { %6801 = vmatmul.mubr.msk.f32.gmra.mrb[10].mxu0 %vm79_vm0, %v8988_v59 }
  0x91   :  { %6981 = vmatmul.mubr.msk.f32.gmra.mrb[10].mxu1 %vm79_vm0, %v8988_v59  ;;  %500 = vmatprep.mubr.f32.mxu0 %v12435_v7 }
  0x92   :  { %2282 = vmatprep.mubr.f32.mxu1 %v12435_v7 }
  0x94   :  { %6802 = vmatmul.mubr.msk.f32.gmra.mrb[12].mxu0 %vm79_vm0, %v8999_v60 }
  0x95   :  { %6982 = vmatmul.mubr.msk.f32.gmra.mrb[12].mxu1 %vm79_vm0, %v8999_v60  ;;  %506 = vmatprep.mubr.f32.mxu0 %v12435_v7 }
  0x96   :  { %2288 = vmatprep.mubr.f32.mxu1 %v12435_v7 }
  0x98   :  { %6803 = vmatmul.mubr.msk.f32.gmra.mrb[14].mxu0 %vm79_vm0, %v9010_v61 }
  0x99   :  { %6983 = vmatmul.mubr.msk.f32.gmra.mrb[14].mxu1 %vm79_vm0, %v9010_v61  ;;  %512 = vmatprep.mubr.f32.mxu0 %v12435_v7 }
  0x9a   :  { %2294 = vmatprep.mubr.f32.mxu1 %v12435_v7 }
  0x9c   :  { %6804 = vmatmul.mubr.msk.f32.gmra.mrb[16].mxu0 %vm79_vm0, %v9021_v62 }
  0x9d   :  { %6984 = vmatmul.mubr.msk.f32.gmra.mrb[16].mxu1 %vm79_vm0, %v9021_v62  ;;  %518 = vmatprep.mubr.f32.mxu0 %v12435_v7 }
  0x9e   :  { %2300 = vmatprep.mubr.f32.mxu1 %v12435_v7 }
  0xa0   :  { %6805 = vmatmul.mubr.msk.f32.gmra.mrb[18].mxu0 %vm79_vm0, %v9032_v63 }
  0xa1   :  { %6985 = vmatmul.mubr.msk.f32.gmra.mrb[18].mxu1 %vm79_vm0, %v9032_v63  ;;  %524 = vmatprep.mubr.f32.mxu0 %v12435_v7 }
  0xa2   :  { %2306 = vmatprep.mubr.f32.mxu1 %v12435_v7 }
  0xa4   :  { %6806 = vmatmul.mubr.msk.f32.gmra.mrb[20].mxu0 %vm79_vm0, %v9043_v0 }
  0xa5   :  { %6986 = vmatmul.mubr.msk.f32.gmra.mrb[20].mxu1 %vm79_vm0, %v9043_v0  ;;  %530 = vmatprep.mubr.f32.mxu0 %v12435_v7 }
  0xa6   :  { %2312 = vmatprep.mubr.f32.mxu1 %v12435_v7 }
  0xa8   :  { %6807 = vmatmul.mubr.msk.f32.gmra.mrb[22].mxu0 %vm79_vm0, %v9054_v1 }
  0xa9   :  { %6987 = vmatmul.mubr.msk.f32.gmra.mrb[22].mxu1 %vm79_vm0, %v9054_v1  ;;  %536 = vmatprep.mubr.f32.mxu0 %v12435_v7 }
  0xaa   :  { %2318 = vmatprep.mubr.f32.mxu1 %v12435_v7 }
  0xac   :  { %6808 = vmatmul.mubr.msk.f32.gmra.mrb[24].mxu0 %vm79_vm0, %v9065_v2 }
  0xad   :  { %6988 = vmatmul.mubr.msk.f32.gmra.mrb[24].mxu1 %vm79_vm0, %v9065_v2  ;;  %542 = vmatprep.mubr.f32.mxu0 %v12435_v7 }
  0xae   :  { %2324 = vmatprep.mubr.f32.mxu1 %v12435_v7 }
  0xb0   :  { %6809 = vmatmul.mubr.msk.f32.gmra.mrb[26].mxu0 %vm79_vm0, %v9076_v3 }
  0xb1   :  { %6989 = vmatmul.mubr.msk.f32.gmra.mrb[26].mxu1 %vm79_vm0, %v9076_v3  ;;  %548 = vmatprep.mubr.f32.mxu0 %v12435_v7 }
  0xb2   :  { %2330 = vmatprep.mubr.f32.mxu1 %v12435_v7 }
  0xb4   :  { %6810 = vmatmul.mubr.msk.f32.gmra.mrb[28].mxu0 %vm79_vm0, %v9087_v4 }
  0xb5   :  { %6990 = vmatmul.mubr.msk.f32.gmra.mrb[28].mxu1 %vm79_vm0, %v9087_v4  ;;  %554 = vmatprep.mubr.f32.mxu0 %v12435_v7 }
  0xb6   :  { %2336 = vmatprep.mubr.f32.mxu1 %v12435_v7 }
  0xb8   :  { %6811 = vmatmul.mubr.msk.f32.gmra.mrb[30].mxu0 %vm79_vm0, %v9098_v5 }
  0xb9   :  { %6991 = vmatmul.mubr.msk.f32.gmra.mrb[30].mxu1 %vm79_vm0, %v9098_v5  ;;  %560 = vmatprep.mubr.f32.mxu0 %v12435_v7 }
  0xba   :  { %2342 = vmatprep.mubr.f32.mxu1 %v12435_v7 }
  0xbc   :  { %6812 = vmatmul.mubr.msk.f32.gmra.mrb[32].mxu0 %vm79_vm0, %v9109_v6 }
  0xbd   :  { %6992 = vmatmul.mubr.msk.f32.gmra.mrb[32].mxu1 %vm79_vm0, %v9109_v6  ;;  %566 = vmatprep.mubr.f32.mxu0 %v12435_v7 }
  0xbe   :  { %2348 = vmatprep.mubr.f32.mxu1 %v12435_v7 }
  0xc0   :  { %6813 = vmatmul.mubr.msk.f32.gmra.mrb[34].mxu0 %vm79_vm0, %v9120_v8 }
  0xc1   :  { %6993 = vmatmul.mubr.msk.f32.gmra.mrb[34].mxu1 %vm79_vm0, %v9120_v8  ;;  %572 = vmatprep.mubr.f32.mxu0 %v12435_v7 }
  0xc2   :  { %2354 = vmatprep.mubr.f32.mxu1 %v12435_v7 }
  0xc4   :  { %6814 = vmatmul.mubr.msk.f32.gmra.mrb[36].mxu0 %vm79_vm0, %v9131_v9 }
  0xc5   :  { %6994 = vmatmul.mubr.msk.f32.gmra.mrb[36].mxu1 %vm79_vm0, %v9131_v9  ;;  %578 = vmatprep.mubr.f32.mxu0 %v12435_v7 }
  0xc6   :  { %2360 = vmatprep.mubr.f32.mxu1 %v12435_v7 }
  0xc8   :  { %6815 = vmatmul.mubr.msk.f32.gmra.mrb[38].mxu0 %vm79_vm0, %v9142_v10 }
  0xc9   :  { %6995 = vmatmul.mubr.msk.f32.gmra.mrb[38].mxu1 %vm79_vm0, %v9142_v10  ;;  %584 = vmatprep.mubr.f32.mxu0 %v12435_v7 }
  0xca   :  { %2366 = vmatprep.mubr.f32.mxu1 %v12435_v7 }
  0xcc   :  { %6816 = vmatmul.mubr.msk.f32.gmra.mrb[40].mxu0 %vm79_vm0, %v9153_v11 }
  0xcd   :  { %6996 = vmatmul.mubr.msk.f32.gmra.mrb[40].mxu1 %vm79_vm0, %v9153_v11  ;;  %590 = vmatprep.mubr.f32.mxu0 %v12435_v7 }
  0xce   :  { %2372 = vmatprep.mubr.f32.mxu1 %v12435_v7 }
  0xd0   :  { %6817 = vmatmul.mubr.msk.f32.gmra.mrb[42].mxu0 %vm79_vm0, %v9164_v12 }
  0xd1   :  { %6997 = vmatmul.mubr.msk.f32.gmra.mrb[42].mxu1 %vm79_vm0, %v9164_v12  ;;  %596 = vmatprep.mubr.f32.mxu0 %v12435_v7 }
  0xd2   :  { %2378 = vmatprep.mubr.f32.mxu1 %v12435_v7 }
  0xd4   :  { %6818 = vmatmul.mubr.msk.f32.gmra.mrb[44].mxu0 %vm79_vm0, %v9175_v13 }
  0xd5   :  { %6998 = vmatmul.mubr.msk.f32.gmra.mrb[44].mxu1 %vm79_vm0, %v9175_v13  ;;  %602 = vmatprep.mubr.f32.mxu0 %v12435_v7 }
  0xd6   :  { %2384 = vmatprep.mubr.f32.mxu1 %v12435_v7 }
  0xd8   :  { %6819 = vmatmul.mubr.msk.f32.gmra.mrb[46].mxu0 %vm79_vm0, %v9186_v14 }
  0xd9   :  { %6999 = vmatmul.mubr.msk.f32.gmra.mrb[46].mxu1 %vm79_vm0, %v9186_v14  ;;  %608 = vmatprep.mubr.f32.mxu0 %v12435_v7 }
  0xda   :  { %2390 = vmatprep.mubr.f32.mxu1 %v12435_v7 }
  0xdc   :  { %6820 = vmatmul.mubr.msk.f32.gmra.mrb[48].mxu0 %vm79_vm0, %v9197_v15 }
  0xdd   :  { %7000 = vmatmul.mubr.msk.f32.gmra.mrb[48].mxu1 %vm79_vm0, %v9197_v15  ;;  %614 = vmatprep.mubr.f32.mxu0 %v12435_v7 }
  0xde   :  { %2396 = vmatprep.mubr.f32.mxu1 %v12435_v7 }
  0xe0   :  { %6821 = vmatmul.mubr.msk.f32.gmra.mrb[50].mxu0 %vm79_vm0, %v9208_v16 }
  0xe1   :  { %7001 = vmatmul.mubr.msk.f32.gmra.mrb[50].mxu1 %vm79_vm0, %v9208_v16  ;;  %620 = vmatprep.mubr.f32.mxu0 %v12435_v7 }
  0xe2   :  { %2402 = vmatprep.mubr.f32.mxu1 %v12435_v7 }
  0xe4   :  { %6822 = vmatmul.mubr.msk.f32.gmra.mrb[52].mxu0 %vm79_vm0, %v9219_v17 }
  0xe5   :  { %7002 = vmatmul.mubr.msk.f32.gmra.mrb[52].mxu1 %vm79_vm0, %v9219_v17  ;;  %626 = vmatprep.mubr.f32.mxu0 %v12435_v7 }
  0xe6   :  { %2408 = vmatprep.mubr.f32.mxu1 %v12435_v7 }
  0xe8   :  { %6823 = vmatmul.mubr.msk.f32.gmra.mrb[54].mxu0 %vm79_vm0, %v9230_v18 }
  0xe9   :  { %7003 = vmatmul.mubr.msk.f32.gmra.mrb[54].mxu1 %vm79_vm0, %v9230_v18  ;;  %818 = vmatprep.mubr.f32.mxu0 %v12435_v7 }
  0xea   :  { %2488 = vmatprep.mubr.f32.mxu1 %v12435_v7 }
  0xec   :  { %6832 = vmatmul.mubr.msk.f32.vlgmr.msra.gmra.mrb[0].mxu0 %vm79_vm0, %v8918_v38 }
  0xed   :  { %7012 = vmatmul.mubr.msk.f32.vlgmr.msra.gmra.mrb[0].mxu1 %vm79_vm0, %v8918_v38  ;;  %7808 = vmatpush1.bf16.msra.mxu0 %v7807_v54  ;;  %v7853_v38 = vpack.c.bf16 %v7079_v28, %v7077_v27  ;;  %v3741_v54 = vld [vmem:[%s12428_s3 + $0x38] sm:$0xff]  ;;  %v7123_v27 = vld [vmem:[%s12428_s3 + $0xe8] sm:$0xff]  ;;  %v3744_v28 = vld [vmem:[%s12428_s3 + $0x50] sm:$0xff] }
  0xee   :  { %7848 = vmatpush1.bf16.msra.mxu1 %v7847_v57  ;;  %824 = vmatprep.mubr.f32.mxu0 %v12435_v7 }
  0xef   :  { %2494 = vmatprep.mubr.f32.mxu1 %v12435_v7  ;;  %7810 = vmatprep.subr.bf16.mxu0 %v7809_v58  ;;  %v7120_v58 = vld [vmem:[%s12428_s3 + $0xd0] sm:$0xff] }
  0xf0   :  { %6833 = vmatmul.mubr.msk.f32.gmra.mrb[2].mxu0 %vm79_vm0, %v8954_v50  ;;  %7850 = vmatprep.subr.bf16.mxu1 %v7849_v23  ;;  %v1457_v23 = vld [vmem:[%s12425_s0 + $0x40] sm:$0xff]  ;;  %v7874_v24 = vpack.c.bf16 %v7121_v20, %v7120_v58 }
  0xf1   :  { %7013 = vmatmul.mubr.msk.f32.gmra.mrb[2].mxu1 %vm79_vm0, %v8954_v50  ;;  %830 = vmatprep.mubr.f32.mxu0 %v12435_v7 }
  0xf2   :  { %2500 = vmatprep.mubr.f32.mxu1 %v12435_v7  ;;  %7812 = vmatpush1.bf16.msra.mxu0 %v7811_v29  ;;  %v3745_v29 = vld [vmem:[%s12428_s3 + $0x58] sm:$0xff] }
  0xf3   :  { %7852 = vmatpush1.bf16.msra.mxu1 %v7851_v30  ;;  %7814 = vmatprep.subr.bf16.mxu0 %v7813_v31  ;;  %v1458_v30 = vld [vmem:[%s12425_s0 + $0x48] sm:$0xff]  ;;  %v7877_v31 = vpack.c.bf16 %v7123_v27, %v7122_v26 }
  0xf4   :  { %6834 = vmatmul.mubr.msk.f32.gmra.mrb[4].mxu0 %vm79_vm0, %v8965_v52  ;;  %7854 = vmatprep.subr.bf16.mxu1 %v7853_v38  ;;  %v7905_v38 = vpack.c.bf16 %v3745_v29, %v3744_v28 }
  0xf5   :  { %7014 = vmatmul.mubr.msk.f32.gmra.mrb[4].mxu1 %vm79_vm0, %v8965_v52  ;;  %836 = vmatprep.mubr.f32.mxu0 %v12435_v7 }
  0xf6   :  { %2506 = vmatprep.mubr.f32.mxu1 %v12435_v7 }
  0xf8   :  { %6835 = vmatmul.mubr.msk.f32.gmra.mrb[6].mxu0 %vm79_vm0, %v8988_v59 }
  0xf9   :  { %7015 = vmatmul.mubr.msk.f32.gmra.mrb[6].mxu1 %vm79_vm0, %v8988_v59  ;;  %842 = vmatprep.mubr.f32.mxu0 %v12435_v7 }
  0xfa   :  { %2512 = vmatprep.mubr.f32.mxu1 %v12435_v7 }
  0xfc   :  { %6836 = vmatmul.mubr.msk.f32.gmra.mrb[8].mxu0 %vm79_vm0, %v8999_v60 }
  0xfd   :  { %7016 = vmatmul.mubr.msk.f32.gmra.mrb[8].mxu1 %vm79_vm0, %v8999_v60  ;;  %848 = vmatprep.mubr.f32.mxu0 %v12435_v7 }
  0xfe   :  { %2518 = vmatprep.mubr.f32.mxu1 %v12435_v7 }
 0x100   :  { %6837 = vmatmul.mubr.msk.f32.gmra.mrb[10].mxu0 %vm79_vm0, %v9010_v61 }
 0x101   :  { %7017 = vmatmul.mubr.msk.f32.gmra.mrb[10].mxu1 %vm79_vm0, %v9010_v61  ;;  %854 = vmatprep.mubr.f32.mxu0 %v12435_v7 }
 0x102   :  { %2524 = vmatprep.mubr.f32.mxu1 %v12435_v7 }
 0x104   :  { %6838 = vmatmul.mubr.msk.f32.gmra.mrb[12].mxu0 %vm79_vm0, %v9021_v62 }
 0x105   :  { %7018 = vmatmul.mubr.msk.f32.gmra.mrb[12].mxu1 %vm79_vm0, %v9021_v62  ;;  %860 = vmatprep.mubr.f32.mxu0 %v12435_v7 }
 0x106   :  { %2530 = vmatprep.mubr.f32.mxu1 %v12435_v7 }
 0x108   :  { %6839 = vmatmul.mubr.msk.f32.gmra.mrb[14].mxu0 %vm79_vm0, %v9032_v63 }
 0x109   :  { %7019 = vmatmul.mubr.msk.f32.gmra.mrb[14].mxu1 %vm79_vm0, %v9032_v63  ;;  %866 = vmatprep.mubr.f32.mxu0 %v12435_v7 }
 0x10a   :  { %2536 = vmatprep.mubr.f32.mxu1 %v12435_v7 }
 0x10c   :  { %6840 = vmatmul.mubr.msk.f32.gmra.mrb[16].mxu0 %vm79_vm0, %v9043_v0 }
 0x10d   :  { %7020 = vmatmul.mubr.msk.f32.gmra.mrb[16].mxu1 %vm79_vm0, %v9043_v0  ;;  %872 = vmatprep.mubr.f32.mxu0 %v12435_v7 }
 0x10e   :  { %2542 = vmatprep.mubr.f32.mxu1 %v12435_v7 }
 0x110   :  { %6841 = vmatmul.mubr.msk.f32.gmra.mrb[18].mxu0 %vm79_vm0, %v9054_v1 }
 0x111   :  { %7021 = vmatmul.mubr.msk.f32.gmra.mrb[18].mxu1 %vm79_vm0, %v9054_v1  ;;  %878 = vmatprep.mubr.f32.mxu0 %v12435_v7 }
 0x112   :  { %2548 = vmatprep.mubr.f32.mxu1 %v12435_v7 }
 0x114   :  { %6842 = vmatmul.mubr.msk.f32.gmra.mrb[20].mxu0 %vm79_vm0, %v9065_v2 }
 0x115   :  { %7022 = vmatmul.mubr.msk.f32.gmra.mrb[20].mxu1 %vm79_vm0, %v9065_v2  ;;  %884 = vmatprep.mubr.f32.mxu0 %v12435_v7 }
 0x116   :  { %2554 = vmatprep.mubr.f32.mxu1 %v12435_v7 }
 0x118   :  { %6843 = vmatmul.mubr.msk.f32.gmra.mrb[22].mxu0 %vm79_vm0, %v9076_v3 }
 0x119   :  { %7023 = vmatmul.mubr.msk.f32.gmra.mrb[22].mxu1 %vm79_vm0, %v9076_v3  ;;  %890 = vmatprep.mubr.f32.mxu0 %v12435_v7 }
 0x11a   :  { %2560 = vmatprep.mubr.f32.mxu1 %v12435_v7 }
 0x11c   :  { %6844 = vmatmul.mubr.msk.f32.gmra.mrb[24].mxu0 %vm79_vm0, %v9087_v4 }
 0x11d   :  { %7024 = vmatmul.mubr.msk.f32.gmra.mrb[24].mxu1 %vm79_vm0, %v9087_v4  ;;  %896 = vmatprep.mubr.f32.mxu0 %v12435_v7 }
 0x11e   :  { %2566 = vmatprep.mubr.f32.mxu1 %v12435_v7 }
 0x120   :  { %6845 = vmatmul.mubr.msk.f32.gmra.mrb[26].mxu0 %vm79_vm0, %v9098_v5 }
 0x121   :  { %7025 = vmatmul.mubr.msk.f32.gmra.mrb[26].mxu1 %vm79_vm0, %v9098_v5  ;;  %902 = vmatprep.mubr.f32.mxu0 %v12435_v7 }
 0x122   :  { %2572 = vmatprep.mubr.f32.mxu1 %v12435_v7 }
 0x124   :  { %6846 = vmatmul.mubr.msk.f32.gmra.mrb[28].mxu0 %vm79_vm0, %v9109_v6 }
 0x125   :  { %7026 = vmatmul.mubr.msk.f32.gmra.mrb[28].mxu1 %vm79_vm0, %v9109_v6  ;;  %908 = vmatprep.mubr.f32.mxu0 %v12435_v7 }
 0x126   :  { %2578 = vmatprep.mubr.f32.mxu1 %v12435_v7 }
 0x128   :  { %6847 = vmatmul.mubr.msk.f32.gmra.mrb[30].mxu0 %vm79_vm0, %v9120_v8 }
 0x129   :  { %7027 = vmatmul.mubr.msk.f32.gmra.mrb[30].mxu1 %vm79_vm0, %v9120_v8  ;;  %914 = vmatprep.mubr.f32.mxu0 %v12435_v7 }
 0x12a   :  { %2584 = vmatprep.mubr.f32.mxu1 %v12435_v7 }
 0x12c   :  { %6848 = vmatmul.mubr.msk.f32.gmra.mrb[32].mxu0 %vm79_vm0, %v9131_v9 }
 0x12d   :  { %7028 = vmatmul.mubr.msk.f32.gmra.mrb[32].mxu1 %vm79_vm0, %v9131_v9  ;;  %920 = vmatprep.mubr.f32.mxu0 %v12435_v7 }
 0x12e   :  { %2590 = vmatprep.mubr.f32.mxu1 %v12435_v7 }
 0x130   :  { %6849 = vmatmul.mubr.msk.f32.gmra.mrb[34].mxu0 %vm79_vm0, %v9142_v10 }
 0x131   :  { %7029 = vmatmul.mubr.msk.f32.gmra.mrb[34].mxu1 %vm79_vm0, %v9142_v10  ;;  %926 = vmatprep.mubr.f32.mxu0 %v12435_v7 }
 0x132   :  { %2596 = vmatprep.mubr.f32.mxu1 %v12435_v7 }
 0x134   :  { %6850 = vmatmul.mubr.msk.f32.gmra.mrb[36].mxu0 %vm79_vm0, %v9153_v11 }
 0x135   :  { %7030 = vmatmul.mubr.msk.f32.gmra.mrb[36].mxu1 %vm79_vm0, %v9153_v11  ;;  %932 = vmatprep.mubr.f32.mxu0 %v12435_v7 }
 0x136   :  { %2602 = vmatprep.mubr.f32.mxu1 %v12435_v7 }
 0x138   :  { %6851 = vmatmul.mubr.msk.f32.gmra.mrb[38].mxu0 %vm79_vm0, %v9164_v12 }
 0x139   :  { %7031 = vmatmul.mubr.msk.f32.gmra.mrb[38].mxu1 %vm79_vm0, %v9164_v12  ;;  %938 = vmatprep.mubr.f32.mxu0 %v12435_v7 }
 0x13a   :  { %2608 = vmatprep.mubr.f32.mxu1 %v12435_v7 }
 0x13c   :  { %6852 = vmatmul.mubr.msk.f32.gmra.mrb[40].mxu0 %vm79_vm0, %v9175_v13 }
 0x13d   :  { %7032 = vmatmul.mubr.msk.f32.gmra.mrb[40].mxu1 %vm79_vm0, %v9175_v13  ;;  %944 = vmatprep.mubr.f32.mxu0 %v12435_v7 }
 0x13e   :  { %2614 = vmatprep.mubr.f32.mxu1 %v12435_v7 }
 0x140   :  { %6853 = vmatmul.mubr.msk.f32.gmra.mrb[42].mxu0 %vm79_vm0, %v9186_v14 }
 0x141   :  { %7033 = vmatmul.mubr.msk.f32.gmra.mrb[42].mxu1 %vm79_vm0, %v9186_v14  ;;  %950 = vmatprep.mubr.f32.mxu0 %v12435_v7 }
 0x142   :  { %2620 = vmatprep.mubr.f32.mxu1 %v12435_v7 }
 0x144   :  { %6854 = vmatmul.mubr.msk.f32.gmra.mrb[44].mxu0 %vm79_vm0, %v9197_v15 }
 0x145   :  { %7034 = vmatmul.mubr.msk.f32.gmra.mrb[44].mxu1 %vm79_vm0, %v9197_v15  ;;  %956 = vmatprep.mubr.f32.mxu0 %v12435_v7 }
 0x146   :  { %2626 = vmatprep.mubr.f32.mxu1 %v12435_v7 }
 0x148   :  { %6855 = vmatmul.mubr.msk.f32.gmra.mrb[46].mxu0 %vm79_vm0, %v9208_v16 }
 0x149   :  { %7035 = vmatmul.mubr.msk.f32.gmra.mrb[46].mxu1 %vm79_vm0, %v9208_v16  ;;  %962 = vmatprep.mubr.f32.mxu0 %v12435_v7 }
 0x14a   :  { %2632 = vmatprep.mubr.f32.mxu1 %v12435_v7 }
 0x14c   :  { %6856 = vmatmul.mubr.msk.f32.gmra.mrb[48].mxu0 %vm79_vm0, %v9219_v17 }
 0x14d   :  { %7036 = vmatmul.mubr.msk.f32.gmra.mrb[48].mxu1 %vm79_vm0, %v9219_v17  ;;  %968 = vmatprep.mubr.f32.mxu0 %v12435_v7 }
 0x14e   :  { %2638 = vmatprep.mubr.f32.mxu1 %v12435_v7 }
 0x150   :  { %6857 = vmatmul.mubr.msk.f32.gmra.mrb[50].mxu0 %vm79_vm0, %v9230_v18 }
 0x151   :  { %7037 = vmatmul.mubr.msk.f32.gmra.mrb[50].mxu1 %vm79_vm0, %v9230_v18  ;;  %974 = vmatprep.mubr.f32.mxu0 %v12435_v7 }
 0x152   :  { %2644 = vmatprep.mubr.f32.mxu1 %v12435_v7 }
 0x154   :  { %6858 = vmatmul.mubr.msk.f32.gmra.mrb[52].mxu0 %vm79_vm0, %v9241_v19 }
 0x155   :  { %7038 = vmatmul.mubr.msk.f32.gmra.mrb[52].mxu1 %vm79_vm0, %v9241_v19  ;;  %980 = vmatprep.mubr.f32.mxu0 %v12435_v7 }
 0x156   :  { %2650 = vmatprep.mubr.f32.mxu1 %v12435_v7 }
 0x158   :  { %6859 = vmatmul.mubr.msk.f32.gmra.mrb[54].mxu0 %vm79_vm0, %v9679_v32 }
 0x159   :  { %7039 = vmatmul.mubr.msk.f32.gmra.mrb[54].mxu1 %vm79_vm0, %v9679_v32  ;;  %1228 = vmatprep.mubr.f32.mxu0 %v12435_v7 }
 0x15a   :  { %2786 = vmatprep.mubr.f32.mxu1 %v12435_v7 }
 0x15c   :  { %6868 = vmatmul.mubr.msk.f32.vlgmr.msra.gmra.mrb[0].mxu0 %vm79_vm0, %v8954_v50 }
 0x15d   :  { %7048 = vmatmul.mubr.msk.f32.vlgmr.msra.gmra.mrb[0].mxu1 %vm79_vm0, %v8954_v50  ;;  %7816 = vmatpush1.bf16.msra.mxu0 %v7815_v41  ;;  %v12440_v50 = vmov 0.0|0.0   ;;  %v1465_v41 = vld [vmem:[%s12425_s0 + $0x80] sm:$0xff] }
 0x15e   :  { %7856 = vmatpush1.bf16.msra.mxu1 %v7855_v44  ;;  %1234 = vmatprep.mubr.f32.mxu0 %v12435_v7  ;;  %v1468_v44 = vld [vmem:[%s12425_s0 + $0x98] sm:$0xff] }
 0x15f   :  { %2792 = vmatprep.mubr.f32.mxu1 %v12435_v7  ;;  %7818 = vmatprep.subr.bf16.mxu0 %v7817_v45  ;;  %v1469_v45 = vld [vmem:[%s12425_s0 + $0xa0] sm:$0xff] }
 0x160   :  { %6869 = vmatmul.mubr.msk.f32.gmra.mrb[2].mxu0 %vm79_vm0, %v8965_v52  ;;  %7858 = vmatprep.subr.bf16.mxu1 %v7857_v47  ;;  %v1472_v47 = vld [vmem:[%s12425_s0 + $0xb8] sm:$0xff] }
 0x161   :  { %7049 = vmatmul.mubr.msk.f32.gmra.mrb[2].mxu1 %vm79_vm0, %v8965_v52  ;;  %1240 = vmatprep.mubr.f32.mxu0 %v12435_v7  ;;  %v9890_v52 = vld [vmem:[%s12425_s0 + $0xf0] sm:$0xff] }
 0x162   :  { %2798 = vmatprep.mubr.f32.mxu1 %v12435_v7  ;;  %7820 = vmatpush1.bf16.msra.mxu0 %v7819_v51  ;;  %v1475_v51 = vld [vmem:[%s12425_s0 + $0xd0] sm:$0xff] }
 0x163   :  { %7860 = vmatpush1.bf16.msra.mxu1 %v7859_v53  ;;  %7861 = vmatprep.subr.bf16.mxu0 %v12440_v50  ;;  %v1476_v53 = vld [vmem:[%s12425_s0 + $0xd8] sm:$0xff] }
 0x164   :  { %6870 = vmatmul.mubr.msk.f32.gmra.mrb[4].mxu0 %vm79_vm0, %v8988_v59  ;;  %7889 = vmatprep.subr.bf16.mxu1 %v12440_v50 }
 0x165   :  { %7050 = vmatmul.mubr.msk.f32.gmra.mrb[4].mxu1 %vm79_vm0, %v8988_v59  ;;  %1246 = vmatprep.mubr.f32.mxu0 %v12435_v7  ;;  %v7112_v59 = vld [vmem:[%s12428_s3 + $0x90] sm:$0xff] }
 0x166   :  { %2804 = vmatprep.mubr.f32.mxu1 %v12435_v7 }
 0x168   :  { %6871 = vmatmul.mubr.msk.f32.gmra.mrb[6].mxu0 %vm79_vm0, %v8999_v60 }
 0x169   :  { %7051 = vmatmul.mubr.msk.f32.gmra.mrb[6].mxu1 %vm79_vm0, %v8999_v60  ;;  %1252 = vmatprep.mubr.f32.mxu0 %v12435_v7  ;;  %v7113_v60 = vld [vmem:[%s12428_s3 + $0x98] sm:$0xff] }
 0x16a   :  { %2810 = vmatprep.mubr.f32.mxu1 %v12435_v7 }
 0x16c   :  { %6872 = vmatmul.mubr.msk.f32.gmra.mrb[8].mxu0 %vm79_vm0, %v9010_v61 }
 0x16d   :  { %7052 = vmatmul.mubr.msk.f32.gmra.mrb[8].mxu1 %vm79_vm0, %v9010_v61  ;;  %1258 = vmatprep.mubr.f32.mxu0 %v12435_v7  ;;  %v3734_v61 = vld [vmem:[%s12428_s3] sm:$0xff] }
 0x16e   :  { %2816 = vmatprep.mubr.f32.mxu1 %v12435_v7 }
 0x170   :  { %6873 = vmatmul.mubr.msk.f32.gmra.mrb[10].mxu0 %vm79_vm0, %v9021_v62 }
 0x171   :  { %7053 = vmatmul.mubr.msk.f32.gmra.mrb[10].mxu1 %vm79_vm0, %v9021_v62  ;;  %1264 = vmatprep.mubr.f32.mxu0 %v12435_v7  ;;  %v3735_v62 = vld [vmem:[%s12428_s3 + $0x8] sm:$0xff] }
 0x172   :  { %2822 = vmatprep.mubr.f32.mxu1 %v12435_v7 }
 0x174   :  { %6874 = vmatmul.mubr.msk.f32.gmra.mrb[12].mxu0 %vm79_vm0, %v9032_v63 }
 0x175   :  { %7054 = vmatmul.mubr.msk.f32.gmra.mrb[12].mxu1 %vm79_vm0, %v9032_v63  ;;  %1270 = vmatprep.mubr.f32.mxu0 %v12435_v7  ;;  %v1453_v63 = vld [vmem:[%s12425_s0 + $0x20] sm:$0xff] }
 0x176   :  { %2828 = vmatprep.mubr.f32.mxu1 %v12435_v7 }
 0x178   :  { %6875 = vmatmul.mubr.msk.f32.gmra.mrb[14].mxu0 %vm79_vm0, %v9043_v0 }
 0x179   :  { %7055 = vmatmul.mubr.msk.f32.gmra.mrb[14].mxu1 %vm79_vm0, %v9043_v0  ;;  %1276 = vmatprep.mubr.f32.mxu0 %v12435_v7  ;;  %v7862_v0 = vpack.c.bf16 %v7113_v60, %v7112_v59  ;;  %v1477_v59 = vld [vmem:[%s12425_s0 + $0xe0] sm:$0xff]  ;;  %v7124_v60 = vld [vmem:[%s12428_s3 + $0xf0] sm:$0xff] }
 0x17a   :  { %2834 = vmatprep.mubr.f32.mxu1 %v12435_v7 }
 0x17c   :  { %6876 = vmatmul.mubr.msk.f32.gmra.mrb[16].mxu0 %vm79_vm0, %v9054_v1 }
 0x17d   :  { %7056 = vmatmul.mubr.msk.f32.gmra.mrb[16].mxu1 %vm79_vm0, %v9054_v1  ;;  %1282 = vmatprep.mubr.f32.mxu0 %v12435_v7  ;;  %v7890_v1 = vpack.c.bf16 %v3735_v62, %v3734_v61  ;;  %v7125_v61 = vld [vmem:[%s12428_s3 + $0xf8] sm:$0xff] }
 0x17e   :  { %2840 = vmatprep.mubr.f32.mxu1 %v12435_v7  ;;  %v7880_v62 = vpack.c.bf16 %v7125_v61, %v7124_v60 }
 0x180   :  { %6877 = vmatmul.mubr.msk.f32.gmra.mrb[18].mxu0 %vm79_vm0, %v9065_v2 }
 0x181   :  { %7057 = vmatmul.mubr.msk.f32.gmra.mrb[18].mxu1 %vm79_vm0, %v9065_v2  ;;  %1288 = vmatprep.mubr.f32.mxu0 %v12435_v7  ;;  %v7114_v2 = vld [vmem:[%s12428_s3 + $0xa0] sm:$0xff] }
 0x182   :  { %2846 = vmatprep.mubr.f32.mxu1 %v12435_v7 }
 0x184   :  { %6878 = vmatmul.mubr.msk.f32.gmra.mrb[20].mxu0 %vm79_vm0, %v9076_v3 }
 0x185   :  { %7058 = vmatmul.mubr.msk.f32.gmra.mrb[20].mxu1 %vm79_vm0, %v9076_v3  ;;  %1294 = vmatprep.mubr.f32.mxu0 %v12435_v7  ;;  %v7115_v3 = vld [vmem:[%s12428_s3 + $0xa8] sm:$0xff] }
 0x186   :  { %2852 = vmatprep.mubr.f32.mxu1 %v12435_v7 }
 0x188   :  { %6879 = vmatmul.mubr.msk.f32.gmra.mrb[22].mxu0 %vm79_vm0, %v9087_v4 }
 0x189   :  { %7059 = vmatmul.mubr.msk.f32.gmra.mrb[22].mxu1 %vm79_vm0, %v9087_v4  ;;  %1300 = vmatprep.mubr.f32.mxu0 %v12435_v7  ;;  %v3736_v4 = vld [vmem:[%s12428_s3 + $0x10] sm:$0xff] }
 0x18a   :  { %2858 = vmatprep.mubr.f32.mxu1 %v12435_v7 }
 0x18c   :  { %6880 = vmatmul.mubr.msk.f32.gmra.mrb[24].mxu0 %vm79_vm0, %v9098_v5 }
 0x18d   :  { %7060 = vmatmul.mubr.msk.f32.gmra.mrb[24].mxu1 %vm79_vm0, %v9098_v5  ;;  %1306 = vmatprep.mubr.f32.mxu0 %v12435_v7  ;;  %v3737_v5 = vld [vmem:[%s12428_s3 + $0x18] sm:$0xff] }
 0x18e   :  { %2864 = vmatprep.mubr.f32.mxu1 %v12435_v7 }
 0x190   :  { %6881 = vmatmul.mubr.msk.f32.gmra.mrb[26].mxu0 %vm79_vm0, %v9109_v6 }
 0x191   :  { %7061 = vmatmul.mubr.msk.f32.gmra.mrb[26].mxu1 %vm79_vm0, %v9109_v6  ;;  %1312 = vmatprep.mubr.f32.mxu0 %v12435_v7  ;;  %v1454_v6 = vld [vmem:[%s12425_s0 + $0x28] sm:$0xff] }
 0x192   :  { %2870 = vmatprep.mubr.f32.mxu1 %v12435_v7 }
 0x194   :  { %6882 = vmatmul.mubr.msk.f32.gmra.mrb[28].mxu0 %vm79_vm0, %v9120_v8 }
 0x195   :  { %7062 = vmatmul.mubr.msk.f32.gmra.mrb[28].mxu1 %vm79_vm0, %v9120_v8  ;;  %1318 = vmatprep.mubr.f32.mxu0 %v12435_v7  ;;  %v7865_v8 = vpack.c.bf16 %v7115_v3, %v7114_v2  ;;  %v3748_v2 = vld [vmem:[%s12428_s3 + $0x70] sm:$0xff]  ;;  %v3749_v3 = vld [vmem:[%s12428_s3 + $0x78] sm:$0xff] }
 0x196   :  { %2876 = vmatprep.mubr.f32.mxu1 %v12435_v7 }
 0x198   :  { %6883 = vmatmul.mubr.msk.f32.gmra.mrb[30].mxu0 %vm79_vm0, %v9131_v9 }
 0x199   :  { %7063 = vmatmul.mubr.msk.f32.gmra.mrb[30].mxu1 %vm79_vm0, %v9131_v9  ;;  %1324 = vmatprep.mubr.f32.mxu0 %v12435_v7  ;;  %v7893_v9 = vpack.c.bf16 %v3737_v5, %v3736_v4  ;;  %v7911_v4 = vpack.c.bf16 %v3749_v3, %v3748_v2  ;;  %v3751_v5 = vld [vmem:[%s12428_s3 + $0x88] sm:$0xf] }
 0x19a   :  { %2882 = vmatprep.mubr.f32.mxu1 %v12435_v7 }
 0x19c   :  { %6884 = vmatmul.mubr.msk.f32.gmra.mrb[32].mxu0 %vm79_vm0, %v9142_v10 }
 0x19d   :  { %7064 = vmatmul.mubr.msk.f32.gmra.mrb[32].mxu1 %vm79_vm0, %v9142_v10  ;;  %1330 = vmatprep.mubr.f32.mxu0 %v12435_v7  ;;  %v7116_v10 = vld [vmem:[%s12428_s3 + $0xb0] sm:$0xff] }
 0x19e   :  { %2888 = vmatprep.mubr.f32.mxu1 %v12435_v7 }
 0x1a0   :  { %6885 = vmatmul.mubr.msk.f32.gmra.mrb[34].mxu0 %vm79_vm0, %v9153_v11 }
 0x1a1   :  { %7065 = vmatmul.mubr.msk.f32.gmra.mrb[34].mxu1 %vm79_vm0, %v9153_v11  ;;  %1336 = vmatprep.mubr.f32.mxu0 %v12435_v7  ;;  %v7117_v11 = vld [vmem:[%s12428_s3 + $0xb8] sm:$0xff] }
 0x1a2   :  { %2894 = vmatprep.mubr.f32.mxu1 %v12435_v7 }
 0x1a4   :  { %6886 = vmatmul.mubr.msk.f32.gmra.mrb[36].mxu0 %vm79_vm0, %v9164_v12 }
 0x1a5   :  { %7066 = vmatmul.mubr.msk.f32.gmra.mrb[36].mxu1 %vm79_vm0, %v9164_v12  ;;  %1342 = vmatprep.mubr.f32.mxu0 %v12435_v7  ;;  %v3738_v12 = vld [vmem:[%s12428_s3 + $0x20] sm:$0xff] }
 0x1a6   :  { %2900 = vmatprep.mubr.f32.mxu1 %v12435_v7 }
 0x1a8   :  { %6887 = vmatmul.mubr.msk.f32.gmra.mrb[38].mxu0 %vm79_vm0, %v9175_v13 }
 0x1a9   :  { %7067 = vmatmul.mubr.msk.f32.gmra.mrb[38].mxu1 %vm79_vm0, %v9175_v13  ;;  %1348 = vmatprep.mubr.f32.mxu0 %v12435_v7  ;;  %v3739_v13 = vld [vmem:[%s12428_s3 + $0x28] sm:$0xff] }
 0x1aa   :  { %2906 = vmatprep.mubr.f32.mxu1 %v12435_v7 }
 0x1ac   :  { %6888 = vmatmul.mubr.msk.f32.gmra.mrb[40].mxu0 %vm79_vm0, %v9186_v14 }
 0x1ad   :  { %7068 = vmatmul.mubr.msk.f32.gmra.mrb[40].mxu1 %vm79_vm0, %v9186_v14  ;;  %1354 = vmatprep.mubr.f32.mxu0 %v12435_v7  ;;  %v1455_v14 = vld [vmem:[%s12425_s0 + $0x30] sm:$0xff] }
 0x1ae   :  { %2912 = vmatprep.mubr.f32.mxu1 %v12435_v7 }
 0x1b0   :  { %6889 = vmatmul.mubr.msk.f32.gmra.mrb[42].mxu0 %vm79_vm0, %v9197_v15 }
 0x1b1   :  { %7069 = vmatmul.mubr.msk.f32.gmra.mrb[42].mxu1 %vm79_vm0, %v9197_v15  ;;  %1360 = vmatprep.mubr.f32.mxu0 %v12435_v7  ;;  %v7868_v15 = vpack.c.bf16 %v7117_v11, %v7116_v10 }
 0x1b2   :  { %2918 = vmatprep.mubr.f32.mxu1 %v12435_v7 }
 0x1b4   :  { %6890 = vmatmul.mubr.msk.f32.gmra.mrb[44].mxu0 %vm79_vm0, %v9208_v16 }
 0x1b5   :  { %7070 = vmatmul.mubr.msk.f32.gmra.mrb[44].mxu1 %vm79_vm0, %v9208_v16  ;;  %1366 = vmatprep.mubr.f32.mxu0 %v12435_v7  ;;  %v7896_v16 = vpack.c.bf16 %v3739_v13, %v3738_v12  ;;  %v7128_v12 = vld [vmem:[%s12428_s3 + $0x110] sm:$0xff]  ;;  %v7129_v13 = vld [vmem:[%s12428_s3 + $0x118] sm:$0xf] }
 0x1b6   :  { %2924 = vmatprep.mubr.f32.mxu1 %v12435_v7 }
 0x1b8   :  { %6891 = vmatmul.mubr.msk.f32.gmra.mrb[46].mxu0 %vm79_vm0, %v9219_v17 }
 0x1b9   :  { %7071 = vmatmul.mubr.msk.f32.gmra.mrb[46].mxu1 %vm79_vm0, %v9219_v17  ;;  %1372 = vmatprep.mubr.f32.mxu0 %v12435_v7  ;;  %v7118_v17 = vld [vmem:[%s12428_s3 + $0xc0] sm:$0xff] }
 0x1ba   :  { %2930 = vmatprep.mubr.f32.mxu1 %v12435_v7 }
 0x1bc   :  { %6892 = vmatmul.mubr.msk.f32.gmra.mrb[48].mxu0 %vm79_vm0, %v9230_v18 }
 0x1bd   :  { %7072 = vmatmul.mubr.msk.f32.gmra.mrb[48].mxu1 %vm79_vm0, %v9230_v18  ;;  %1378 = vmatprep.mubr.f32.mxu0 %v12435_v7  ;;  %v7119_v18 = vld [vmem:[%s12428_s3 + $0xc8] sm:$0xff] }
 0x1be   :  { %2936 = vmatprep.mubr.f32.mxu1 %v12435_v7  ;;  %v7871_v56 = vpack.c.bf16 %v7119_v18, %v7118_v17  ;;  %v1863_v18 = vld [vmem:[%s12427_s2] sm:$0x3] }
 0x1c0   :  { %6893 = vmatmul.mubr.msk.f32.gmra.mrb[50].mxu0 %vm79_vm0, %v9241_v19 }
 0x1c1   :  { %7073 = vmatmul.mubr.msk.f32.gmra.mrb[50].mxu1 %vm79_vm0, %v9241_v19  ;;  %1384 = vmatprep.mubr.f32.mxu0 %v12435_v7  ;;  %v3740_v19 = vld [vmem:[%s12428_s3 + $0x30] sm:$0xff] }
 0x1c2   :  { %2942 = vmatprep.mubr.f32.mxu1 %v12435_v7  ;;  %v7899_v57 = vpack.c.bf16 %v3741_v54, %v3740_v19 }
 0x1c4   :  { %6894 = vmatmul.mubr.msk.f32.gmra.mrb[52].mxu0 %vm79_vm0, %v9679_v32 }
 0x1c5   :  { %7074 = vmatmul.mubr.msk.f32.gmra.mrb[52].mxu1 %vm79_vm0, %v9679_v32  ;;  %1390 = vmatprep.mubr.f32.mxu0 %v12435_v7 }
 0x1c6   :  { %2948 = vmatprep.mubr.f32.mxu1 %v12435_v7 }
 0x1c8   :  { %6895 = vmatmul.mubr.msk.f32.gmra.mrb[54].mxu0 %vm79_vm0, %v9890_v52 }
 0x1c9   :  { %7075 = vmatmul.mubr.msk.f32.gmra.mrb[54].mxu1 %vm79_vm0, %v9890_v52  ;;  %1638 = vmatprep.mubr.f32.mxu0 %v12435_v7 }
 0x1ca   :  { %3084 = vmatprep.mubr.f32.mxu1 %v12435_v7 }
 0x1cc   :  { %6904 = vmatmul.mubr.msk.f32.vlgmr.msra.gmra.mrb[0].mxu0 %vm79_vm0, %v1453_v63 }
 0x1cd   :  { %7084 = vmatmul.mubr.msk.f32.vlgmr.msra.gmra.mrb[0].mxu1 %vm79_vm0, %v1453_v63  ;;  %1644 = vmatprep.mubr.f32.mxu0 %v12435_v7  ;;  %v3746_v63 = vld [vmem:[%s12428_s3 + $0x60] sm:$0xff] }
 0x1ce   :  { %3090 = vmatprep.mubr.f32.mxu1 %v12435_v7  ;;  %7863 = vmatpush1.bf16.msra.mxu0 %v7862_v0  ;;  %v3747_v0 = vld [vmem:[%s12428_s3 + $0x68] sm:$0xff] }
 0x1cf   :  { %7891 = vmatpush1.bf16.msra.mxu1 %v7890_v1  ;;  %7864 = vmatprep.subr.bf16.mxu0 %v12440_v50  ;;  %v7908_v1 = vpack.c.bf16 %v3747_v0, %v3746_v63 }
 0x1d0   :  { %6905 = vmatmul.mubr.msk.f32.gmra.mrb[2].mxu0 %vm79_vm0, %v1454_v6  ;;  %7892 = vmatprep.subr.bf16.mxu1 %v12440_v50 }
 0x1d1   :  { %7085 = vmatmul.mubr.msk.f32.gmra.mrb[2].mxu1 %vm79_vm0, %v1454_v6  ;;  %1650 = vmatprep.mubr.f32.mxu0 %v12435_v7  ;;  %v7126_v6 = vld [vmem:[%s12428_s3 + $0x100] sm:$0xff] }
 0x1d2   :  { %3096 = vmatprep.mubr.f32.mxu1 %v12435_v7  ;;  %7866 = vmatpush1.bf16.msra.mxu0 %v7865_v8  ;;  %v7127_v8 = vld [vmem:[%s12428_s3 + $0x108] sm:$0xff] }
 0x1d3   :  { %7894 = vmatpush1.bf16.msra.mxu1 %v7893_v9  ;;  %7867 = vmatprep.subr.bf16.mxu0 %v12440_v50  ;;  %v7883_v10 = vpack.c.bf16 %v7127_v8, %v7126_v6 }
 0x1d4   :  { %6906 = vmatmul.mubr.msk.f32.gmra.mrb[4].mxu0 %vm79_vm0, %v1455_v14  ;;  %7895 = vmatprep.subr.bf16.mxu1 %v12440_v50 }
 0x1d5   :  { %7086 = vmatmul.mubr.msk.f32.gmra.mrb[4].mxu1 %vm79_vm0, %v1455_v14  ;;  %1656 = vmatprep.mubr.f32.mxu0 %v12435_v7  ;;  %v7886_v14 = vpack.c.bf16 %v7129_v13, %v7128_v12 }
 0x1d6   :  { %3102 = vmatprep.mubr.f32.mxu1 %v12435_v7  ;;  %7869 = vmatpush1.bf16.msra.mxu0 %v7868_v15  ;;  %v1865_v15 = vlaneseq }
 0x1d7   :  { %7897 = vmatpush1.bf16.msra.mxu1 %v7896_v16  ;;  %7870 = vmatprep.subr.bf16.mxu0 %v12440_v50 }
 0x1d8   :  { %6907 = vmatmul.mubr.msk.f32.gmra.mrb[6].mxu0 %vm79_vm0, %v1456_v55  ;;  %7898 = vmatprep.subr.bf16.mxu1 %v12440_v50  ;;  %v1866_v16 = vshrl.u32 %v1865_v15, 7 }
 0x1d9   :  { %7087 = vmatmul.mubr.msk.f32.gmra.mrb[6].mxu1 %vm79_vm0, %v1456_v55  ;;  %1662 = vmatprep.mubr.f32.mxu0 %v12435_v7 }
 0x1da   :  { %3108 = vmatprep.mubr.f32.mxu1 %v12435_v7  ;;  %7872 = vmatpush1.bf16.msra.mxu0 %v7871_v56  ;;  %v1867_v17 = vsub.s32 0, %v1866_v16  ;;  %v1871_v19 = vsub.s32 1, %v1866_v16 }
 0x1db   :  { %7900 = vmatpush1.bf16.msra.mxu1 %v7899_v57  ;;  %7873 = vmatprep.subr.bf16.mxu0 %v12440_v50 }
 0x1dc   :  { %6908 = vmatmul.mubr.msk.f32.gmra.mrb[8].mxu0 %vm79_vm0, %v1457_v23  ;;  %7901 = vmatprep.subr.bf16.mxu1 %v12440_v50  ;;  %v10229_v54 = vrot.slane %v1863_v18, %v1867_v17  ;;  %v10231_v55 = vrot.slane %v1863_v18, %v1871_v19 }
 0x1dd   :  { %7088 = vmatmul.mubr.msk.f32.gmra.mrb[8].mxu1 %vm79_vm0, %v1457_v23  ;;  %1668 = vmatprep.mubr.f32.mxu0 %v12435_v7 }
 0x1de   :  { %3114 = vmatprep.mubr.f32.mxu1 %v12435_v7  ;;  %7875 = vmatpush1.bf16.msra.mxu0 %v7874_v24 }
 0x1df   :  { %7903 = vmatpush1.bf16.msra.mxu1 %v7902_v25  ;;  %7876 = vmatprep.subr.bf16.mxu0 %v12440_v50 }
 0x1e0   :  { %6909 = vmatmul.mubr.msk.f32.gmra.mrb[10].mxu0 %vm79_vm0, %v1458_v30  ;;  %7904 = vmatprep.subr.bf16.mxu1 %v12440_v50 }
 0x1e1   :  { %7089 = vmatmul.mubr.msk.f32.gmra.mrb[10].mxu1 %vm79_vm0, %v1458_v30  ;;  %1674 = vmatprep.mubr.f32.mxu0 %v12435_v7 }
 0x1e2   :  { %3120 = vmatprep.mubr.f32.mxu1 %v12435_v7  ;;  %7878 = vmatpush1.bf16.msra.mxu0 %v7877_v31 }
 0x1e3   :  { %7906 = vmatpush1.bf16.msra.mxu1 %v7905_v38  ;;  %7879 = vmatprep.subr.bf16.mxu0 %v12440_v50 }
 0x1e4   :  { %6910 = vmatmul.mubr.msk.f32.gmra.mrb[12].mxu0 %vm79_vm0, %v1459_v33  ;;  %7907 = vmatprep.subr.bf16.mxu1 %v12440_v50 }
 0x1e5   :  { %7090 = vmatmul.mubr.msk.f32.gmra.mrb[12].mxu1 %vm79_vm0, %v1459_v33  ;;  %1680 = vmatprep.mubr.f32.mxu0 %v12435_v7 }
 0x1e6   :  { %3126 = vmatprep.mubr.f32.mxu1 %v12435_v7  ;;  %7881 = vmatpush1.bf16.msra.mxu0 %v7880_v62 }
 0x1e7   :  { %7882 = vmatprep.subr.bf16.mxu0 %v12440_v50  ;;  %7909 = vmatpush1.bf16.msra.mxu1 %v7908_v1 }
 0x1e8   :  { %6911 = vmatmul.mubr.msk.f32.gmra.mrb[14].mxu0 %vm79_vm0, %v1460_v35  ;;  %7910 = vmatprep.subr.bf16.mxu1 %v12440_v50 }
 0x1e9   :  { %7091 = vmatmul.mubr.msk.f32.gmra.mrb[14].mxu1 %vm79_vm0, %v1460_v35  ;;  %1686 = vmatprep.mubr.f32.mxu0 %v12435_v7 }
 0x1ea   :  { %3132 = vmatprep.mubr.f32.mxu1 %v12435_v7  ;;  %7884 = vmatpush1.bf16.msra.mxu0 %v7883_v10 }
 0x1eb   :  { %7912 = vmatpush1.bf16.msra.mxu1 %v7911_v4  ;;  %7885 = vmatprep.subr.bf16.mxu0 %v12440_v50 }
 0x1ec   :  { %6912 = vmatmul.mubr.msk.f32.gmra.mrb[16].mxu0 %vm79_vm0, %v1461_v36  ;;  %7913 = vmatprep.subr.bf16.mxu1 %v12440_v50 }
 0x1ed   :  { %7092 = vmatmul.mubr.msk.f32.gmra.mrb[16].mxu1 %vm79_vm0, %v1461_v36  ;;  %1692 = vmatprep.mubr.f32.mxu0 %v12435_v7 }
 0x1ee   :  { %3138 = vmatprep.mubr.f32.mxu1 %v12435_v7  ;;  %7888 = vmatpush1.bf16.msk.msra.mxu0 %vm10209_vm3, %v7886_v14 }
 0x1ef   :  { %7917 = vmatprep.subr.bf16.mxu0 %v12440_v50 }
 0x1f0   :  { %6913 = vmatmul.mubr.msk.f32.gmra.mrb[18].mxu0 %vm79_vm0, %v1462_v37 }
 0x1f1   :  { %7093 = vmatmul.mubr.msk.f32.gmra.mrb[18].mxu1 %vm79_vm0, %v1462_v37  ;;  %1698 = vmatprep.mubr.f32.mxu0 %v12435_v7 }
 0x1f2   :  { %3144 = vmatprep.mubr.f32.mxu1 %v12435_v7 }
 0x1f4   :  { %6914 = vmatmul.mubr.msk.f32.gmra.mrb[20].mxu0 %vm79_vm0, %v1463_v39 }
 0x1f5   :  { %7094 = vmatmul.mubr.msk.f32.gmra.mrb[20].mxu1 %vm79_vm0, %v1463_v39  ;;  %1704 = vmatprep.mubr.f32.mxu0 %v12435_v7 }
 0x1f6   :  { %3150 = vmatprep.mubr.f32.mxu1 %v12435_v7 }
 0x1f8   :  { %6915 = vmatmul.mubr.msk.f32.gmra.mrb[22].mxu0 %vm79_vm0, %v1464_v40 }
 0x1f9   :  { %7095 = vmatmul.mubr.msk.f32.gmra.mrb[22].mxu1 %vm79_vm0, %v1464_v40  ;;  %1710 = vmatprep.mubr.f32.mxu0 %v12435_v7 }
 0x1fa   :  { %3156 = vmatprep.mubr.f32.mxu1 %v12435_v7 }
 0x1fc   :  { %6916 = vmatmul.mubr.msk.f32.gmra.mrb[24].mxu0 %vm79_vm0, %v1465_v41 }
 0x1fd   :  { %7096 = vmatmul.mubr.msk.f32.gmra.mrb[24].mxu1 %vm79_vm0, %v1465_v41  ;;  %1716 = vmatprep.mubr.f32.mxu0 %v12435_v7 }
 0x1fe   :  { %3162 = vmatprep.mubr.f32.mxu1 %v12435_v7 }
 0x200   :  { %6917 = vmatmul.mubr.msk.f32.gmra.mrb[26].mxu0 %vm79_vm0, %v1466_v42 }
 0x201   :  { %7097 = vmatmul.mubr.msk.f32.gmra.mrb[26].mxu1 %vm79_vm0, %v1466_v42  ;;  %1722 = vmatprep.mubr.f32.mxu0 %v12435_v7 }
 0x202   :  { %3168 = vmatprep.mubr.f32.mxu1 %v12435_v7 }
 0x204   :  { %6918 = vmatmul.mubr.msk.f32.gmra.mrb[28].mxu0 %vm79_vm0, %v1467_v43 }
 0x205   :  { %7098 = vmatmul.mubr.msk.f32.gmra.mrb[28].mxu1 %vm79_vm0, %v1467_v43  ;;  %1728 = vmatprep.mubr.f32.mxu0 %v12435_v7 }
 0x206   :  { %3174 = vmatprep.mubr.f32.mxu1 %v12435_v7 }
 0x208   :  { %6919 = vmatmul.mubr.msk.f32.gmra.mrb[30].mxu0 %vm79_vm0, %v1468_v44 }
 0x209   :  { %7099 = vmatmul.mubr.msk.f32.gmra.mrb[30].mxu1 %vm79_vm0, %v1468_v44  ;;  %1734 = vmatprep.mubr.f32.mxu0 %v12435_v7 }
 0x20a   :  { %3180 = vmatprep.mubr.f32.mxu1 %v12435_v7 }
 0x20c   :  { %6920 = vmatmul.mubr.msk.f32.gmra.mrb[32].mxu0 %vm79_vm0, %v1469_v45 }
 0x20d   :  { %7100 = vmatmul.mubr.msk.f32.gmra.mrb[32].mxu1 %vm79_vm0, %v1469_v45  ;;  %1740 = vmatprep.mubr.f32.mxu0 %v12435_v7 }
 0x20e   :  { %3186 = vmatprep.mubr.f32.mxu1 %v12435_v7 }
 0x210   :  { %6921 = vmatmul.mubr.msk.f32.gmra.mrb[34].mxu0 %vm79_vm0, %v1470_v46 }
 0x211   :  { %7101 = vmatmul.mubr.msk.f32.gmra.mrb[34].mxu1 %vm79_vm0, %v1470_v46  ;;  %1746 = vmatprep.mubr.f32.mxu0 %v12435_v7 }
 0x212   :  { %3192 = vmatprep.mubr.f32.mxu1 %v12435_v7 }
 0x214   :  { %6922 = vmatmul.mubr.msk.f32.gmra.mrb[36].mxu0 %vm79_vm0, %v1471_v34 }
 0x215   :  { %7102 = vmatmul.mubr.msk.f32.gmra.mrb[36].mxu1 %vm79_vm0, %v1471_v34  ;;  %1752 = vmatprep.mubr.f32.mxu0 %v12435_v7 }
 0x216   :  { %3198 = vmatprep.mubr.f32.mxu1 %v12435_v7 }
 0x218   :  { %6923 = vmatmul.mubr.msk.f32.gmra.mrb[38].mxu0 %vm79_vm0, %v1472_v47 }
 0x219   :  { %7103 = vmatmul.mubr.msk.f32.gmra.mrb[38].mxu1 %vm79_vm0, %v1472_v47  ;;  %1758 = vmatprep.mubr.f32.mxu0 %v12435_v7 }
 0x21a   :  { %3204 = vmatprep.mubr.f32.mxu1 %v12435_v7 }
 0x21c   :  { %6924 = vmatmul.mubr.msk.f32.gmra.mrb[40].mxu0 %vm79_vm0, %v1473_v48 }
 0x21d   :  { %7104 = vmatmul.mubr.msk.f32.gmra.mrb[40].mxu1 %vm79_vm0, %v1473_v48  ;;  %1764 = vmatprep.mubr.f32.mxu0 %v12435_v7 }
 0x21e   :  { %3210 = vmatprep.mubr.f32.mxu1 %v12435_v7 }
 0x220   :  { %6925 = vmatmul.mubr.msk.f32.gmra.mrb[42].mxu0 %vm79_vm0, %v1474_v49 }
 0x221   :  { %7105 = vmatmul.mubr.msk.f32.gmra.mrb[42].mxu1 %vm79_vm0, %v1474_v49  ;;  %1770 = vmatprep.mubr.f32.mxu0 %v12435_v7 }
 0x222   :  { %3216 = vmatprep.mubr.f32.mxu1 %v12435_v7 }
 0x224   :  { %6926 = vmatmul.mubr.msk.f32.gmra.mrb[44].mxu0 %vm79_vm0, %v1475_v51 }
 0x225   :  { %7106 = vmatmul.mubr.msk.f32.gmra.mrb[44].mxu1 %vm79_vm0, %v1475_v51  ;;  %1776 = vmatprep.mubr.f32.mxu0 %v12435_v7 }
 0x226   :  { %3222 = vmatprep.mubr.f32.mxu1 %v12435_v7 }
 0x228   :  { %6927 = vmatmul.mubr.msk.f32.gmra.mrb[46].mxu0 %vm79_vm0, %v1476_v53 }
 0x229   :  { %7107 = vmatmul.mubr.msk.f32.gmra.mrb[46].mxu1 %vm79_vm0, %v1476_v53  ;;  %1782 = vmatprep.mubr.f32.mxu0 %v12435_v7 }
 0x22a   :  { %3228 = vmatprep.mubr.f32.mxu1 %v12435_v7 }
 0x22c   :  { %6928 = vmatmul.mubr.msk.f32.gmra.mrb[48].mxu0 %vm79_vm0, %v1477_v59 }
 0x22d   :  { %7108 = vmatmul.mubr.msk.f32.gmra.mrb[48].mxu1 %vm79_vm0, %v1477_v59  ;;  %1788 = vmatprep.mubr.f32.mxu0 %v12435_v7 }
 0x22e   :  { %3234 = vmatprep.mubr.f32.mxu1 %v12435_v7 }
 0x230   :  { %6929 = vmatmul.mubr.msk.f32.gmra.mrb[50].mxu0 %vm79_vm0, %v9679_v32 }
 0x231   :  { %7109 = vmatmul.mubr.msk.f32.gmra.mrb[50].mxu1 %vm79_vm0, %v9679_v32  ;;  %1794 = vmatprep.mubr.f32.mxu0 %v12435_v7  ;;  %v1480_v32 = vld [vmem:[%s12425_s0 + $0xf8] sm:$0xff] }
 0x232   :  { %3240 = vmatprep.mubr.f32.mxu1 %v12435_v7 }
 0x234   :  { %6930 = vmatmul.mubr.msk.f32.gmra.mrb[52].mxu0 %vm79_vm0, %v9890_v52 }
 0x235   :  { %7110 = vmatmul.mubr.msk.f32.gmra.mrb[52].mxu1 %vm79_vm0, %v9890_v52  ;;  %1800 = vmatprep.mubr.f32.mxu0 %v12435_v7  ;;  %v3750_v52 = vld [vmem:[%s12428_s3 + $0x80] sm:$0xff] }
 0x236   :  { %3246 = vmatprep.mubr.f32.mxu1 %v12435_v7  ;;  %v7914_v9 = vpack.c.bf16 %v3751_v5, %v3750_v52  ;;  %v7299_v7 = vld [vmem:[%s12428_s3 + $0x340] sm:$0xff] }
 0x238   :  { %6931 = vmatmul.mubr.msk.f32.gmra.mrb[54].mxu0 %vm79_vm0, %v1480_v32  ;;  %7916 = vmatpush1.bf16.msk.msra.mxu1 %vm10209_vm3, %v7914_v9 }
 0x239   :  { %7111 = vmatmul.mubr.msk.f32.gmra.mrb[54].mxu1 %vm79_vm0, %v1480_v32  ;;  %7945 = vmatprep.subr.bf16.mxu1 %v12440_v50 }
 0x29f   :  { %v1640_v56 = vpop.f32.mrb[0].mxu0 }
 0x2a0   :  { %v1875_v57 = vadd.f32 %v10229_v54, %v1640_v56  ;;  %v3086_v58 = vpop.f32.mrb[0].mxu1  ;;  %v1642_v20 = vpop.f32.mrb[1].mxu0 }
 0x2a1   :  { %v3309_v21 = vadd.f32 %v3086_v58, %v10229_v54  ;;  %v1876_v22 = vadd.f32 %v10231_v55, %v1642_v20  ;;  %v3088_v23 = vpop.f32.mrb[1].mxu1 }
 0x2a2   :  { %v3310_v24 = vadd.f32 %v3088_v23, %v10231_v55 }
 0x2a3   :  { %v3365_v25 = vmax.f32 %v1875_v57, %v3309_v21  ;;  %v1646_v26 = vpop.f32.mrb[2].mxu0 }
 0x2a4   :  { %v3366_v27 = vmax.f32 %v1876_v22, %v3310_v24  ;;  %v1877_v28 = vadd.f32 %v10229_v54, %v1646_v26  ;;  %v3092_v29 = vpop.f32.mrb[2].mxu1  ;;  %v1648_v30 = vpop.f32.mrb[3].mxu0 }
 0x2a5   :  { %v3311_v31 = vadd.f32 %v3092_v29, %v10229_v54  ;;  %v1878_v38 = vadd.f32 %v10231_v55, %v1648_v30  ;;  %v3094_v33 = vpop.f32.mrb[3].mxu1 }
 0x2a6   :  { %3423 = vst.msk [vmem:[#allocation2 + $0x8] sm:$0xff] %vm3422_vm4, %v3366_v27  ;;  %v3312_v35 = vadd.f32 %v3094_v33, %v10231_v55 }
 0x2a7   :  { %v3367_v36 = vmax.f32 %v1877_v28, %v3311_v31  ;;  %v1652_v37 = vpop.f32.mrb[4].mxu0 }
 0x2a8   :  { %v3368_v39 = vmax.f32 %v1878_v38, %v3312_v35  ;;  %v1879_v40 = vadd.f32 %v10229_v54, %v1652_v37  ;;  %v3098_v41 = vpop.f32.mrb[4].mxu1  ;;  %v1654_v42 = vpop.f32.mrb[5].mxu0 }
 0x2a9   :  { %v10243_v43 = vmax.f32 %v3365_v25, %v3367_v36  ;;  %v3313_v44 = vadd.f32 %v3098_v41, %v10229_v54  ;;  %v1880_v45 = vadd.f32 %v10231_v55, %v1654_v42  ;;  %v3100_v46 = vpop.f32.mrb[5].mxu1 }
 0x2aa   :  { %3425 = vst.msk [vmem:[#allocation2 + $0x18] sm:$0xff] %vm3422_vm4, %v3368_v39  ;;  %v3314_v34 = vadd.f32 %v3100_v46, %v10231_v55  ;;  %v7209_v46 = vld [vmem:[%s12428_s3 + $0x1b8] sm:$0xff] }
 0x2ab   :  { %v3588_v47 = vmax.f32 %v10243_v43, 0.0  ;;  %v3369_v48 = vmax.f32 %v1879_v40, %v3313_v44  ;;  %v1658_v49 = vpop.f32.mrb[6].mxu0 }
 0x2ac   :  { %v3370_v51 = vmax.f32 %v1880_v45, %v3314_v34  ;;  %v1881_v53 = vadd.f32 %v10229_v54, %v1658_v49  ;;  %v3104_v59 = vpop.f32.mrb[6].mxu1  ;;  %v1660_v60 = vpop.f32.mrb[7].mxu0  ;;  %v7208_v45 = vld [vmem:[%s12428_s3 + $0x1b0] sm:$0xff] }
 0x2ad   :  { %3642 = vst [vmem:[#allocation3] sm:$0xff] %v3588_v47  ;;  %v3315_v61 = vadd.f32 %v3104_v59, %v10229_v54  ;;  %v1882_v62 = vadd.f32 %v10231_v55, %v1660_v60  ;;  %v3106_v63 = vpop.f32.mrb[7].mxu1  ;;  %v3536_v0 = vmax.f32 %v3367_v36, %v3369_v48  ;;  %v3479_v8 = vld [vmem:[#allocation2 + $0x8] sm:$0xff] }
 0x2ae   :  { %3427 = vst.msk [vmem:[#allocation2 + $0x28] sm:$0xff] %vm3422_vm4, %v3370_v51  ;;  %v3316_v1 = vadd.f32 %v3106_v63, %v10231_v55 }
 0x2af   :  { %v3371_v32 = vmax.f32 %v1881_v53, %v3315_v61  ;;  %v1664_v2 = vpop.f32.mrb[8].mxu0  ;;  %v10257_v3 = vmax.f32 %v3536_v0, 0.0  ;;  %v7946_v0 = vpack.c.bf16 %v7209_v46, %v7208_v45 }
 0x2b0   :  { %v3372_v4 = vmax.f32 %v1882_v62, %v3316_v1  ;;  %v1883_v52 = vadd.f32 %v10229_v54, %v1664_v2  ;;  %v3110_v5 = vpop.f32.mrb[8].mxu1  ;;  %v1666_v6 = vpop.f32.mrb[9].mxu0  ;;  %v7210_v1 = vld [vmem:[%s12428_s3 + $0x1c0] sm:$0xff] }
 0x2b1   :  { %v3481_v9 = vld [vmem:[#allocation2 + $0x18] sm:$0xff]  ;;  %v3538_v10 = vmax.f32 %v3369_v48, %v3371_v32  ;;  %v3317_v12 = vadd.f32 %v3110_v5, %v10229_v54  ;;  %v1884_v13 = vadd.f32 %v10231_v55, %v1666_v6  ;;  %v3112_v14 = vpop.f32.mrb[9].mxu1  ;;  %3644 = vst [vmem:[#allocation3 + $0x10] sm:$0xff] %v10257_v3 }
 0x2b2   :  { %v3535_v15 = vmax.f32 %v3479_v8, %v3481_v9  ;;  %3429 = vst.msk [vmem:[#allocation2 + $0x38] sm:$0xff] %vm3422_vm4, %v3372_v4  ;;  %v3318_v16 = vadd.f32 %v3112_v14, %v10231_v55  ;;  %v7211_v8 = vld [vmem:[%s12428_s3 + $0x1c8] sm:$0xff] }
 0x2b3   :  { %v10265_v17 = vmax.f32 %v3538_v10, 0.0  ;;  %v3373_v18 = vmax.f32 %v1883_v52, %v3317_v12  ;;  %v1670_v19 = vpop.f32.mrb[10].mxu0  ;;  %v7949_v43 = vpack.c.bf16 %v7211_v8, %v7210_v1 }
 0x2b4   :  { %v3374_v56 = vmax.f32 %v1884_v13, %v3318_v16  ;;  %v1885_v57 = vadd.f32 %v10229_v54, %v1670_v19  ;;  %v3116_v58 = vpop.f32.mrb[10].mxu1  ;;  %v1672_v20 = vpop.f32.mrb[11].mxu0  ;;  %v3589_v21 = vmax.f32 %v3535_v15, 0.0 }
 0x2b5   :  { %v3483_v22 = vld [vmem:[#allocation2 + $0x28] sm:$0xff]  ;;  %3646 = vst [vmem:[#allocation3 + $0x20] sm:$0xff] %v10265_v17  ;;  %v3540_v23 = vmax.f32 %v3371_v32, %v3373_v18  ;;  %v3319_v24 = vadd.f32 %v3116_v58, %v10229_v54  ;;  %v1886_v25 = vadd.f32 %v10231_v55, %v1672_v20  ;;  %v3118_v26 = vpop.f32.mrb[11].mxu1 }
 0x2b6   :  { %v3537_v27 = vmax.f32 %v3481_v9, %v3483_v22  ;;  %3431 = vst.msk [vmem:[#allocation2 + $0x48] sm:$0xff] %vm3422_vm4, %v3374_v56  ;;  %v3320_v28 = vadd.f32 %v3118_v26, %v10231_v55  ;;  %3643 = vst.msk [vmem:[#allocation3 + $0x8] sm:$0xff] %vm3422_vm4, %v3589_v21  ;;  %v7170_v56 = vld [vmem:[%s12428_s3 + $0x120] sm:$0xff]  ;;  %v7213_v26 = vld [vmem:[%s12428_s3 + $0x1d8] sm:$0xff] }
 0x2b7   :  { %v3375_v29 = vmax.f32 %v1885_v57, %v3319_v24  ;;  %v1676_v30 = vpop.f32.mrb[12].mxu0  ;;  %v10274_v31 = vmax.f32 %v3540_v23, 0.0  ;;  %v7171_v57 = vld [vmem:[%s12428_s3 + $0x128] sm:$0xff] }
 0x2b8   :  { %v3376_v38 = vmax.f32 %v1886_v25, %v3320_v28  ;;  %v1887_v33 = vadd.f32 %v10229_v54, %v1676_v30  ;;  %v3122_v35 = vpop.f32.mrb[12].mxu1  ;;  %v1678_v36 = vpop.f32.mrb[13].mxu0  ;;  %v3591_v37 = vmax.f32 %v3537_v27, 0.0 }
 0x2b9   :  { %v3485_v39 = vld [vmem:[#allocation2 + $0x38] sm:$0xff]  ;;  %v3542_v40 = vmax.f32 %v3373_v18, %v3375_v29  ;;  %v3321_v41 = vadd.f32 %v3122_v35, %v10229_v54  ;;  %v1888_v42 = vadd.f32 %v10231_v55, %v1678_v36  ;;  %v3124_v44 = vpop.f32.mrb[13].mxu1  ;;  %3648 = vst [vmem:[#allocation3 + $0x30] sm:$0xff] %v10274_v31 }
 0x2ba   :  { %v3539_v34 = vmax.f32 %v3483_v22, %v3485_v39  ;;  %3433 = vst.msk [vmem:[#allocation2 + $0x58] sm:$0xff] %vm3422_vm4, %v3376_v38  ;;  %v3322_v48 = vadd.f32 %v3124_v44, %v10231_v55  ;;  %3645 = vst.msk [vmem:[#allocation3 + $0x18] sm:$0xff] %vm3422_vm4, %v3591_v37  ;;  %v7918_v38 = vpack.c.bf16 %v7171_v57, %v7170_v56  ;;  %v10350_v44 = vld [vmem:[%s12428_s3 + $0x1e0] sm:$0xff] }
 0x2bb   :  { %v3377_v49 = vmax.f32 %v1887_v33, %v3321_v41  ;;  %v1682_v51 = vpop.f32.mrb[14].mxu0  ;;  %v10289_v53 = vmax.f32 %v3542_v40, 0.0  ;;  %v10342_v41 = vld [vmem:[%s12428_s3 + $0x130] sm:$0xff] }
 0x2bc   :  { %v3378_v59 = vmax.f32 %v1888_v42, %v3322_v48  ;;  %v1889_v60 = vadd.f32 %v10229_v54, %v1682_v51  ;;  %v3128_v61 = vpop.f32.mrb[14].mxu1  ;;  %v1684_v62 = vpop.f32.mrb[15].mxu0  ;;  %v3593_v63 = vmax.f32 %v3539_v34, 0.0  ;;  %v7173_v42 = vld [vmem:[%s12428_s3 + $0x138] sm:$0xff] }
 0x2bd   :  { %v3487_v32 = vld [vmem:[#allocation2 + $0x48] sm:$0xff]  ;;  %v3544_v2 = vmax.f32 %v3375_v29, %v3377_v49  ;;  %v3323_v4 = vadd.f32 %v3128_v61, %v10229_v54  ;;  %v1890_v52 = vadd.f32 %v10231_v55, %v1684_v62  ;;  %v3130_v5 = vpop.f32.mrb[15].mxu1  ;;  %3650 = vst [vmem:[#allocation3 + $0x40] sm:$0xff] %v10289_v53 }
 0x2be   :  { %v3697_v6 = vld [vmem:[#allocation3 + $0x8] sm:$0xff]  ;;  %v3541_v9 = vmax.f32 %v3485_v39, %v3487_v32  ;;  %3435 = vst.msk [vmem:[#allocation2 + $0x68] sm:$0xff] %vm3422_vm4, %v3378_v59  ;;  %v3324_v10 = vadd.f32 %v3130_v5, %v10231_v55  ;;  %3647 = vst.msk [vmem:[#allocation3 + $0x28] sm:$0xff] %vm3422_vm4, %v3593_v63 }
 0x2bf   :  { %7151 = vmatprep.mubr.msk.f32.mxu1 %vm3422_vm4, %v3697_v6  ;;  %v10305_v12 = vmax.f32 %v1889_v60, %v3323_v4  ;;  %v1688_v13 = vpop.f32.mrb[16].mxu0  ;;  %v10309_v14 = vmax.f32 %v3544_v2, 0.0  ;;  %v7215_v59 = vld [vmem:[%s12428_s3 + $0x1e8] sm:$0xff]  ;;  %v10377_v6 = vld [vmem:[%s12428_s3 + $0x140] sm:$0xff] }
 0x2c0   :  { %4070 = vmatmul.mubr.f32.vlgmr.msra.gmra.mrb[56].mxu1 %v3588_v47  ;;  %v3380_v15 = vmax.f32 %v1890_v52, %v3324_v10  ;;  %v1891_v16 = vadd.f32 %v10229_v54, %v1688_v13  ;;  %v3134_v18 = vpop.f32.mrb[16].mxu1  ;;  %v1690_v19 = vpop.f32.mrb[17].mxu0  ;;  %v3595_v58 = vmax.f32 %v3541_v9, 0.0  ;;  %v7212_v47 = vld [vmem:[%s12428_s3 + $0x1d0] sm:$0xff]  ;;  %v7955_v8 = vpack.c.bf16 %v7215_v59, %v10350_v44  ;;  %v10461_v59 = vld [vmem:[%s12428_s3 + $0x160] sm:$0xff] }
 0x2c1   :  { %7947 = vmatpush1.bf16.msra.mxu1 %v7946_v0  ;;  %v3489_v20 = vld [vmem:[#allocation2 + $0x58] sm:$0xff]  ;;  %v3546_v21 = vmax.f32 %v3377_v49, %v10305_v12  ;;  %v3325_v22 = vadd.f32 %v3134_v18, %v10229_v54  ;;  %v1892_v23 = vadd.f32 %v10231_v55, %v1690_v19  ;;  %v3136_v24 = vpop.f32.mrb[17].mxu1  ;;  %3652 = vst [vmem:[#allocation3 + $0x50] sm:$0xff] %v10309_v14  ;;  %v10388_v9 = vld [vmem:[%s12428_s3 + $0x1f0] sm:$0xff] }
 0x2c2   :  { %v3699_v25 = vld [vmem:[#allocation3 + $0x18] sm:$0xff]  ;;  %7948 = vmatprep.subr.bf16.mxu1 %v12440_v50  ;;  %v3543_v27 = vmax.f32 %v3487_v32, %v3489_v20  ;;  %3437 = vst.msk [vmem:[#allocation2 + $0x78] sm:$0xff] %vm3422_vm4, %v3380_v15  ;;  %v3326_v28 = vadd.f32 %v3136_v24, %v10231_v55  ;;  %3649 = vst.msk [vmem:[#allocation3 + $0x38] sm:$0xff] %vm3422_vm4, %v3595_v58  ;;  %v7921_v0 = vpack.c.bf16 %v7173_v42, %v10342_v41 }
 0x2c3   :  { %7152 = vmatprep.mubr.msk.f32.mxu1 %vm3422_vm4, %v3699_v25  ;;  %v10333_v29 = vmax.f32 %v1891_v16, %v3325_v22  ;;  %v1694_v30 = vpop.f32.mrb[18].mxu0  ;;  %v10336_v33 = vmax.f32 %v3546_v21, 0.0  ;;  %v7217_v19 = vld [vmem:[%s12428_s3 + $0x1f8] sm:$0xff] }
 0x2c4   :  { %4075 = vmatmul.mubr.f32.gmra.mrb[58].mxu1 %v10257_v3  ;;  %v3382_v35 = vmax.f32 %v1892_v23, %v3326_v28  ;;  %v1893_v36 = vadd.f32 %v10229_v54, %v1694_v30  ;;  %v3140_v37 = vpop.f32.mrb[18].mxu1  ;;  %v1696_v39 = vpop.f32.mrb[19].mxu0  ;;  %v3597_v40 = vmax.f32 %v3543_v27, 0.0  ;;  %v7952_v3 = vpack.c.bf16 %v7213_v26, %v7212_v47  ;;  %v10417_v26 = vld [vmem:[%s12428_s3 + $0x150] sm:$0xff]  ;;  %v10428_v28 = vld [vmem:[%s12428_s3 + $0x200] sm:$0xff] }
 0x2c5   :  { %7950 = vmatpush1.bf16.msra.mxu1 %v7949_v43  ;;  %v3491_v45 = vld [vmem:[#allocation2 + $0x68] sm:$0xff]  ;;  %v3548_v46 = vmax.f32 %v10305_v12, %v10333_v29  ;;  %v3327_v34 = vadd.f32 %v3140_v37, %v10229_v54  ;;  %v1894_v48 = vadd.f32 %v10231_v55, %v1696_v39  ;;  %v3142_v49 = vpop.f32.mrb[19].mxu1  ;;  %3654 = vst [vmem:[#allocation3 + $0x60] sm:$0xff] %v10336_v33 }
 0x2c6   :  { %v3701_v51 = vld [vmem:[#allocation3 + $0x28] sm:$0xff]  ;;  %7951 = vmatprep.subr.bf16.mxu1 %v12440_v50  ;;  %v3545_v60 = vmax.f32 %v3489_v20, %v3491_v45  ;;  %3439 = vst.msk [vmem:[#allocation2 + $0x88] sm:$0xff] %vm3422_vm4, %v3382_v35  ;;  %v3328_v61 = vadd.f32 %v3142_v49, %v10231_v55  ;;  %3651 = vst.msk [vmem:[#allocation3 + $0x48] sm:$0xff] %vm3422_vm4, %v3597_v40  ;;  %v7958_v27 = vpack.c.bf16 %v7217_v19, %v10388_v9  ;;  %v10505_v19 = vld [vmem:[%s12428_s3 + $0x170] sm:$0xff] }
 0x2c7   :  { %7131 = vmatprep.mubr.msk.f32.mxu0 %vm3422_vm4, %v3701_v51  ;;  %7153 = vmatprep.mubr.msk.f32.mxu1 %vm3422_vm4, %v3701_v51  ;;  %v10366_v62 = vmax.f32 %v1893_v36, %v3327_v34  ;;  %v1700_v63 = vpop.f32.mrb[20].mxu0  ;;  %v10371_v1 = vmax.f32 %v3548_v46, 0.0  ;;  %v7219_v39 = vld [vmem:[%s12428_s3 + $0x208] sm:$0xff] }
 0x2c8   :  { %3901 = vmatmul.mubr.f32.vlgmr.msra.gmra.mrb[56].mxu0 %v10265_v17  ;;  %4080 = vmatmul.mubr.f32.gmra.mrb[60].mxu1 %v10265_v17  ;;  %v3384_v32 = vmax.f32 %v1894_v48, %v3328_v61  ;;  %v1895_v2 = vadd.f32 %v10229_v54, %v1700_v63  ;;  %v3146_v4 = vpop.f32.mrb[20].mxu1  ;;  %v1702_v52 = vpop.f32.mrb[21].mxu0  ;;  %v3599_v5 = vmax.f32 %v3545_v60, 0.0  ;;  %v10382_v17 = vld [vmem:[%s12428_s3 + $0x148] sm:$0xff]  ;;  %v7961_v60 = vpack.c.bf16 %v7219_v39, %v10428_v28  ;;  %v10472_v61 = vld [vmem:[%s12428_s3 + $0x210] sm:$0xff] }
 0x2c9   :  { %7919 = vmatpush1.bf16.msra.mxu0 %v7918_v38  ;;  %7953 = vmatpush1.bf16.msra.mxu1 %v7952_v3  ;;  %v3493_v10 = vld [vmem:[#allocation2 + $0x78] sm:$0xff]  ;;  %v3550_v12 = vmax.f32 %v10333_v29, %v10366_v62  ;;  %v3329_v13 = vadd.f32 %v3146_v4, %v10229_v54  ;;  %v1896_v15 = vadd.f32 %v10231_v55, %v1702_v52  ;;  %v3148_v16 = vpop.f32.mrb[21].mxu1 }
 0x2ca   :  { %v3703_v18 = vld [vmem:[#allocation3 + $0x38] sm:$0xff]  ;;  %7920 = vmatprep.subr.bf16.mxu0 %v12440_v50  ;;  %3656 = vst [vmem:[#allocation3 + $0x70] sm:$0xff] %v10371_v1  ;;  %7954 = vmatprep.subr.bf16.mxu1 %v12440_v50  ;;  %v3547_v56 = vmax.f32 %v3491_v45, %v3493_v10  ;;  %3441 = vst.msk [vmem:[#allocation2 + $0x98] sm:$0xff] %vm3422_vm4, %v3384_v32  ;;  %v3330_v57 = vadd.f32 %v3148_v16, %v10231_v55 }
 0x2cb   :  { %7132 = vmatprep.mubr.msk.f32.mxu0 %vm3422_vm4, %v3703_v18  ;;  %7154 = vmatprep.mubr.msk.f32.mxu1 %vm3422_vm4, %v3703_v18  ;;  %3653 = vst.msk [vmem:[#allocation3 + $0x58] sm:$0xff] %vm3422_vm4, %v3599_v5  ;;  %v10405_v58 = vmax.f32 %v1895_v2, %v3329_v13  ;;  %v1706_v43 = vpop.f32.mrb[22].mxu0  ;;  %v7924_v47 = vpack.c.bf16 %v10382_v17, %v10377_v6  ;;  %v10411_v20 = vmax.f32 %v3550_v12, 0.0  ;;  %v7221_v52 = vld [vmem:[%s12428_s3 + $0x218] sm:$0xff] }
 0x2cc   :  { %3906 = vmatmul.mubr.f32.gmra.mrb[58].mxu0 %v10274_v31  ;;  %4085 = vmatmul.mubr.f32.gmra.mrb[62].mxu1 %v10274_v31  ;;  %v3386_v21 = vmax.f32 %v1896_v15, %v3330_v57  ;;  %v1897_v22 = vadd.f32 %v10229_v54, %v1706_v43  ;;  %v3152_v23 = vpop.f32.mrb[22].mxu1  ;;  %v1708_v24 = vpop.f32.mrb[23].mxu0  ;;  %v3601_v25 = vmax.f32 %v3547_v56, 0.0  ;;  %v10422_v31 = vld [vmem:[%s12428_s3 + $0x158] sm:$0xff]  ;;  %v7964_v56 = vpack.c.bf16 %v7221_v52, %v10472_v61  ;;  %v10516_v57 = vld [vmem:[%s12428_s3 + $0x220] sm:$0xff] }
 0x2cd   :  { %7922 = vmatpush1.bf16.msra.mxu0 %v7921_v0  ;;  %7956 = vmatpush1.bf16.msra.mxu1 %v7955_v8  ;;  %v3495_v29 = vld [vmem:[#allocation2 + $0x88] sm:$0xff]  ;;  %v3552_v30 = vmax.f32 %v10366_v62, %v10405_v58  ;;  %v3331_v38 = vadd.f32 %v3152_v23, %v10229_v54  ;;  %v1898_v35 = vadd.f32 %v10231_v55, %v1708_v24  ;;  %v3154_v36 = vpop.f32.mrb[23].mxu1 }
 0x2ce   :  { %v10434_v37 = vld [vmem:[#allocation3 + $0x48] sm:$0xff]  ;;  %7923 = vmatprep.subr.bf16.mxu0 %v12440_v50  ;;  %3658 = vst [vmem:[#allocation3 + $0x80] sm:$0xff] %v10411_v20  ;;  %7957 = vmatprep.subr.bf16.mxu1 %v12440_v50  ;;  %v3549_v40 = vmax.f32 %v3493_v10, %v3495_v29  ;;  %3443 = vst.msk [vmem:[#allocation2 + $0xa8] sm:$0xff] %vm3422_vm4, %v3386_v21  ;;  %v3332_v41 = vadd.f32 %v3154_v36, %v10231_v55 }
 0x2cf   :  { %7133 = vmatprep.mubr.msk.f32.mxu0 %vm3422_vm4, %v10434_v37  ;;  %7155 = vmatprep.mubr.msk.f32.mxu1 %vm3422_vm4, %v10434_v37  ;;  %3655 = vst.msk [vmem:[#allocation3 + $0x68] sm:$0xff] %vm3422_vm4, %v3601_v25  ;;  %v10449_v42 = vmax.f32 %v1897_v22, %v3331_v38  ;;  %v1712_v3 = vpop.f32.mrb[24].mxu0  ;;  %v7927_v44 = vpack.c.bf16 %v10422_v31, %v10417_v26  ;;  %v10455_v45 = vmax.f32 %v3552_v30, 0.0  ;;  %v7223_v24 = vld [vmem:[%s12428_s3 + $0x228] sm:$0xff] }
 0x2d0   :  { %3911 = vmatmul.mubr.f32.gmra.mrb[60].mxu0 %v10289_v53  ;;  %4090 = vmatmul.mubr.f32.gmra.mrb[64].mxu1 %v10289_v53  ;;  %v3388_v46 = vmax.f32 %v1898_v35, %v3332_v41  ;;  %v1899_v34 = vadd.f32 %v10229_v54, %v1712_v3  ;;  %v3158_v48 = vpop.f32.mrb[24].mxu1  ;;  %v1714_v49 = vpop.f32.mrb[25].mxu0  ;;  %v3603_v51 = vmax.f32 %v3549_v40, 0.0  ;;  %v10466_v53 = vld [vmem:[%s12428_s3 + $0x168] sm:$0xff]  ;;  %v7182_v40 = vld [vmem:[%s12428_s3 + $0x180] sm:$0xff]  ;;  %v7224_v3 = vld [vmem:[%s12428_s3 + $0x230] sm:$0xff] }
 0x2d1   :  { %7925 = vmatpush1.bf16.msra.mxu0 %v7924_v47  ;;  %7959 = vmatpush1.bf16.msra.mxu1 %v7958_v27  ;;  %v3497_v62 = vld [vmem:[#allocation2 + $0x98] sm:$0xff]  ;;  %v3554_v63 = vmax.f32 %v10405_v58, %v10449_v42  ;;  %v3333_v0 = vadd.f32 %v3158_v48, %v10229_v54  ;;  %v1900_v32 = vadd.f32 %v10231_v55, %v1714_v49  ;;  %v3160_v2 = vpop.f32.mrb[25].mxu1  ;;  %v7183_v41 = vld [vmem:[%s12428_s3 + $0x188] sm:$0xff] }
 0x2d2   :  { %v10478_v4 = vld [vmem:[#allocation3 + $0x58] sm:$0xff]  ;;  %7926 = vmatprep.subr.bf16.mxu0 %v12440_v50  ;;  %3660 = vst [vmem:[#allocation3 + $0x90] sm:$0xff] %v10455_v45  ;;  %7960 = vmatprep.subr.bf16.mxu1 %v12440_v50  ;;  %v3551_v5 = vmax.f32 %v3495_v29, %v3497_v62  ;;  %3445 = vst.msk [vmem:[#allocation2 + $0xb8] sm:$0xff] %vm3422_vm4, %v3388_v46  ;;  %v3334_v6 = vadd.f32 %v3160_v2, %v10231_v55 }
 0x2d3   :  { %7134 = vmatprep.mubr.msk.f32.mxu0 %vm3422_vm4, %v10478_v4  ;;  %7156 = vmatprep.mubr.msk.f32.mxu1 %vm3422_vm4, %v10478_v4  ;;  %3657 = vst.msk [vmem:[#allocation3 + $0x78] sm:$0xff] %vm3422_vm4, %v3603_v51  ;;  %v10493_v17 = vmax.f32 %v1899_v34, %v3333_v0  ;;  %v1718_v8 = vpop.f32.mrb[26].mxu0  ;;  %v10497_v9 = vmax.f32 %v3554_v63, 0.0  ;;  %v7930_v10 = vpack.c.bf16 %v10466_v53, %v10461_v59  ;;  %v7225_v59 = vld [vmem:[%s12428_s3 + $0x238] sm:$0xf] }
 0x2d4   :  { %3916 = vmatmul.mubr.f32.gmra.mrb[62].mxu0 %v10309_v14  ;;  %4095 = vmatmul.mubr.f32.gmra.mrb[66].mxu1 %v10309_v14  ;;  %v3390_v12 = vmax.f32 %v1900_v32, %v3334_v6  ;;  %v1901_v13 = vadd.f32 %v10229_v54, %v1718_v8  ;;  %v3164_v15 = vpop.f32.mrb[26].mxu1  ;;  %v1720_v16 = vpop.f32.mrb[27].mxu0  ;;  %v3605_v18 = vmax.f32 %v3551_v5, 0.0  ;;  %v10510_v14 = vld [vmem:[%s12428_s3 + $0x178] sm:$0xff]  ;;  %v7936_v0 = vpack.c.bf16 %v7183_v41, %v7182_v40 }
 0x2d5   :  { %7928 = vmatpush1.bf16.msra.mxu0 %v7927_v44  ;;  %7962 = vmatpush1.bf16.msra.mxu1 %v7961_v60  ;;  %v3499_v58 = vld [vmem:[#allocation2 + $0xa8] sm:$0xff]  ;;  %v3556_v43 = vmax.f32 %v10449_v42, %v10493_v17  ;;  %v3335_v47 = vadd.f32 %v3164_v15, %v10229_v54  ;;  %v1902_v21 = vadd.f32 %v10231_v55, %v1720_v16  ;;  %v3166_v22 = vpop.f32.mrb[27].mxu1 }
 0x2d6   :  { %v10522_v23 = vld [vmem:[#allocation3 + $0x68] sm:$0xff]  ;;  %3662 = vst [vmem:[#allocation3 + $0xa0] sm:$0xff] %v10497_v9  ;;  %7929 = vmatprep.subr.bf16.mxu0 %v12440_v50  ;;  %7963 = vmatprep.subr.bf16.mxu1 %v12440_v50  ;;  %v3553_v25 = vmax.f32 %v3497_v62, %v3499_v58  ;;  %3447 = vst.msk [vmem:[#allocation2 + $0xc8] sm:$0xff] %vm3422_vm4, %v3390_v12  ;;  %v3336_v26 = vadd.f32 %v3166_v22, %v10231_v55 }
 0x2d7   :  { %7135 = vmatprep.mubr.msk.f32.mxu0 %vm3422_vm4, %v10522_v23  ;;  %7157 = vmatprep.mubr.msk.f32.mxu1 %vm3422_vm4, %v10522_v23  ;;  %3659 = vst.msk [vmem:[#allocation3 + $0x88] sm:$0xff] %vm3422_vm4, %v3605_v18  ;;  %v10537_v31 = vmax.f32 %v1901_v13, %v3335_v47  ;;  %v1724_v27 = vpop.f32.mrb[28].mxu0  ;;  %v10541_v28 = vmax.f32 %v3556_v43, 0.0  ;;  %v7933_v29 = vpack.c.bf16 %v10510_v14, %v10505_v19  ;;  %v7185_v19 = vld [vmem:[%s12428_s3 + $0x198] sm:$0xff] }
 0x2d8   :  { %3921 = vmatmul.mubr.f32.gmra.mrb[64].mxu0 %v10336_v33  ;;  %4100 = vmatmul.mubr.f32.gmra.mrb[68].mxu1 %v10336_v33  ;;  %v3392_v30 = vmax.f32 %v1902_v21, %v3336_v26  ;;  %v1903_v38 = vadd.f32 %v10229_v54, %v1724_v27  ;;  %v3170_v35 = vpop.f32.mrb[28].mxu1  ;;  %v1726_v36 = vpop.f32.mrb[29].mxu0  ;;  %v3607_v39 = vmax.f32 %v3553_v25, 0.0  ;;  %v7967_v42 = vpack.c.bf16 %v7223_v24, %v10516_v57 }
 0x2d9   :  { %7931 = vmatpush1.bf16.msra.mxu0 %v7930_v10  ;;  %7965 = vmatpush1.bf16.msra.mxu1 %v7964_v56  ;;  %v3501_v44 = vld [vmem:[#allocation2 + $0xb8] sm:$0xff]  ;;  %v3558_v46 = vmax.f32 %v10493_v17, %v10537_v31  ;;  %v3337_v34 = vadd.f32 %v3170_v35, %v10229_v54  ;;  %v1904_v48 = vadd.f32 %v10231_v55, %v1726_v36  ;;  %v3172_v49 = vpop.f32.mrb[29].mxu1  ;;  %v7184_v17 = vld [vmem:[%s12428_s3 + $0x190] sm:$0xff] }
 0x2da   :  { %v10560_v51 = vld [vmem:[#allocation3 + $0x78] sm:$0xff]  ;;  %3664 = vst [vmem:[#allocation3 + $0xb0] sm:$0xff] %v10541_v28  ;;  %7932 = vmatprep.subr.bf16.mxu0 %v12440_v50  ;;  %7966 = vmatprep.subr.bf16.mxu1 %v12440_v50  ;;  %v3555_v53 = vmax.f32 %v3499_v58, %v3501_v44  ;;  %3449 = vst.msk [vmem:[#allocation2 + $0xd8] sm:$0xff] %vm3422_vm4, %v3392_v30  ;;  %v3338_v60 = vadd.f32 %v3172_v49, %v10231_v55 }
 0x2db   :  { %7136 = vmatprep.mubr.msk.f32.mxu0 %vm3422_vm4, %v10560_v51  ;;  %7158 = vmatprep.mubr.msk.f32.mxu1 %vm3422_vm4, %v10560_v51  ;;  %3661 = vst.msk [vmem:[#allocation3 + $0x98] sm:$0xff] %vm3422_vm4, %v3607_v39  ;;  %v10575_v61 = vmax.f32 %v1903_v38, %v3337_v34  ;;  %v1730_v62 = vpop.f32.mrb[30].mxu0  ;;  %v10579_v63 = vmax.f32 %v3558_v46, 0.0  ;;  %v7970_v8 = vpack.c.bf16 %v7225_v59, %v7224_v3  ;;  %v7187_v39 = vld [vmem:[%s12428_s3 + $0x1a8] sm:$0xf] }
 0x2dc   :  { %3926 = vmatmul.mubr.f32.gmra.mrb[66].mxu0 %v10371_v1  ;;  %4105 = vmatmul.mubr.f32.gmra.mrb[70].mxu1 %v10371_v1  ;;  %v3394_v32 = vmax.f32 %v1904_v48, %v3338_v60  ;;  %v1905_v2 = vadd.f32 %v10229_v54, %v1730_v62  ;;  %v3176_v52 = vpop.f32.mrb[30].mxu1  ;;  %v1732_v5 = vpop.f32.mrb[31].mxu0  ;;  %v3609_v6 = vmax.f32 %v3555_v53, 0.0  ;;  %v7939_v26 = vpack.c.bf16 %v7185_v19, %v7184_v17 }
 0x2dd   :  { %7934 = vmatpush1.bf16.msra.mxu0 %v7933_v29  ;;  %7968 = vmatpush1.bf16.msra.mxu1 %v7967_v42  ;;  %v3503_v10 = vld [vmem:[#allocation2 + $0xc8] sm:$0xff]  ;;  %v3560_v12 = vmax.f32 %v10537_v31, %v10575_v61  ;;  %v3339_v13 = vadd.f32 %v3176_v52, %v10229_v54  ;;  %v1906_v15 = vadd.f32 %v10231_v55, %v1732_v5  ;;  %v3178_v16 = vpop.f32.mrb[31].mxu1  ;;  %v7186_v31 = vld [vmem:[%s12428_s3 + $0x1a0] sm:$0xff] }
 0x2de   :  { %v10589_v18 = vld [vmem:[#allocation3 + $0x88] sm:$0xff]  ;;  %3666 = vst [vmem:[#allocation3 + $0xc0] sm:$0xff] %v10579_v63  ;;  %7935 = vmatprep.subr.bf16.mxu0 %v12440_v50  ;;  %7969 = vmatprep.subr.bf16.mxu1 %v12440_v50  ;;  %v3557_v14 = vmax.f32 %v3501_v44, %v3503_v10  ;;  %3451 = vst.msk [vmem:[#allocation2 + $0xe8] sm:$0xff] %vm3422_vm4, %v3394_v32  ;;  %v3340_v56 = vadd.f32 %v3178_v16, %v10231_v55 }
 0x2df   :  { %7137 = vmatprep.mubr.msk.f32.mxu0 %vm3422_vm4, %v10589_v18  ;;  %7159 = vmatprep.mubr.msk.f32.mxu1 %vm3422_vm4, %v10589_v18  ;;  %3663 = vst.msk [vmem:[#allocation3 + $0xa8] sm:$0xff] %vm3422_vm4, %v3609_v6  ;;  %v3395_v57 = vmax.f32 %v1905_v2, %v3339_v13  ;;  %v1736_v58 = vpop.f32.mrb[32].mxu0  ;;  %v10606_v43 = vmax.f32 %v3560_v12, 0.0  ;;  %v7942_v53 = vpack.c.bf16 %v7187_v39, %v7186_v31 }
 0x2e0   :  { %3931 = vmatmul.mubr.f32.gmra.mrb[68].mxu0 %v10411_v20  ;;  %4110 = vmatmul.mubr.f32.gmra.mrb[72].mxu1 %v10411_v20  ;;  %v3396_v47 = vmax.f32 %v1906_v15, %v3340_v56  ;;  %v1907_v21 = vadd.f32 %v10229_v54, %v1736_v58  ;;  %v3182_v22 = vpop.f32.mrb[32].mxu1  ;;  %v1738_v24 = vpop.f32.mrb[33].mxu0  ;;  %v3611_v25 = vmax.f32 %v3557_v14, 0.0 }
 0x2e1   :  { %7937 = vmatpush1.bf16.msra.mxu0 %v7936_v0  ;;  %7972 = vmatpush1.bf16.msk.msra.mxu1 %vm10209_vm3, %v7970_v8  ;;  %v3505_v27 = vld [vmem:[#allocation2 + $0xd8] sm:$0xff]  ;;  %v3562_v29 = vmax.f32 %v10575_v61, %v3395_v57  ;;  %v3341_v30 = vadd.f32 %v3182_v22, %v10229_v54  ;;  %v1908_v38 = vadd.f32 %v10231_v55, %v1738_v24  ;;  %v3184_v35 = vpop.f32.mrb[33].mxu1 }
 0x2e2   :  { %v10617_v36 = vld [vmem:[#allocation3 + $0x98] sm:$0xff]  ;;  %3668 = vst [vmem:[#allocation3 + $0xd0] sm:$0xff] %v10606_v43  ;;  %7938 = vmatprep.subr.bf16.mxu0 %v12440_v50  ;;  %8001 = vmatprep.subr.bf16.mxu1 %v12440_v50  ;;  %v3559_v40 = vmax.f32 %v3503_v10, %v3505_v27  ;;  %3453 = vst.msk [vmem:[#allocation2 + $0xf8] sm:$0xff] %vm3422_vm4, %v3396_v47  ;;  %v3342_v41 = vadd.f32 %v3184_v35, %v10231_v55 }
 0x2e3   :  { %7138 = vmatprep.mubr.msk.f32.mxu0 %vm3422_vm4, %v10617_v36  ;;  %7160 = vmatprep.mubr.msk.f32.mxu1 %vm3422_vm4, %v10617_v36  ;;  %3665 = vst.msk [vmem:[#allocation3 + $0xb8] sm:$0xff] %vm3422_vm4, %v3611_v25  ;;  %v3397_v42 = vmax.f32 %v1907_v21, %v3341_v30  ;;  %v1742_v3 = vpop.f32.mrb[34].mxu0  ;;  %v10634_v44 = vmax.f32 %v3562_v29, 0.0 }
 0x2e4   :  { %3936 = vmatmul.mubr.f32.gmra.mrb[70].mxu0 %v10455_v45  ;;  %4115 = vmatmul.mubr.f32.gmra.mrb[74].mxu1 %v10455_v45  ;;  %v3398_v46 = vmax.f32 %v1908_v38, %v3342_v41  ;;  %v1909_v34 = vadd.f32 %v10229_v54, %v1742_v3  ;;  %v3188_v48 = vpop.f32.mrb[34].mxu1  ;;  %v1744_v49 = vpop.f32.mrb[35].mxu0  ;;  %v3613_v59 = vmax.f32 %v3559_v40, 0.0 }
 0x2e5   :  { %7940 = vmatpush1.bf16.msra.mxu0 %v7939_v26  ;;  %v3507_v60 = vld [vmem:[#allocation2 + $0xe8] sm:$0xff]  ;;  %v3564_v61 = vmax.f32 %v3395_v57, %v3397_v42  ;;  %v3343_v62 = vadd.f32 %v3188_v48, %v10229_v54  ;;  %v1910_v0 = vadd.f32 %v10231_v55, %v1744_v49  ;;  %v3190_v32 = vpop.f32.mrb[35].mxu1  ;;  %3670 = vst [vmem:[#allocation3 + $0xe0] sm:$0xff] %v10634_v44 }
 0x2e6   :  { %v10639_v2 = vld [vmem:[#allocation3 + $0xa8] sm:$0xff]  ;;  %7941 = vmatprep.subr.bf16.mxu0 %v12440_v50  ;;  %v3561_v52 = vmax.f32 %v3505_v27, %v3507_v60  ;;  %3455 = vst.msk [vmem:[#allocation2 + $0x108] sm:$0xff] %vm3422_vm4, %v3398_v46  ;;  %v3344_v5 = vadd.f32 %v3190_v32, %v10231_v55  ;;  %3667 = vst.msk [vmem:[#allocation3 + $0xc8] sm:$0xff] %vm3422_vm4, %v3613_v59 }
 0x2e7   :  { %7139 = vmatprep.mubr.msk.f32.mxu0 %vm3422_vm4, %v10639_v2  ;;  %7161 = vmatprep.mubr.msk.f32.mxu1 %vm3422_vm4, %v10639_v2  ;;  %v3399_v6 = vmax.f32 %v1909_v34, %v3343_v62  ;;  %v1748_v17 = vpop.f32.mrb[36].mxu0  ;;  %v10652_v8 = vmax.f32 %v3564_v61, 0.0 }
 0x2e8   :  { %3941 = vmatmul.mubr.f32.gmra.mrb[72].mxu0 %v10497_v9  ;;  %4120 = vmatmul.mubr.f32.gmra.mrb[76].mxu1 %v10497_v9  ;;  %v3400_v10 = vmax.f32 %v1910_v0, %v3344_v5  ;;  %v1911_v12 = vadd.f32 %v10229_v54, %v1748_v17  ;;  %v3194_v13 = vpop.f32.mrb[36].mxu1  ;;  %v1750_v15 = vpop.f32.mrb[37].mxu0  ;;  %v3615_v16 = vmax.f32 %v3561_v52, 0.0 }
 0x2e9   :  { %7944 = vmatpush1.bf16.msk.msra.mxu0 %vm10209_vm3, %v7942_v53  ;;  %v3509_v19 = vld [vmem:[#allocation2 + $0xf8] sm:$0xff]  ;;  %v3566_v14 = vmax.f32 %v3397_v42, %v3399_v6  ;;  %v3345_v56 = vadd.f32 %v3194_v13, %v10229_v54  ;;  %v1912_v57 = vadd.f32 %v10231_v55, %v1750_v15  ;;  %v3196_v58 = vpop.f32.mrb[37].mxu1  ;;  %3672 = vst [vmem:[#allocation3 + $0xf0] sm:$0xff] %v10652_v8 }
 0x2ea   :  { %v10659_v47 = vld [vmem:[#allocation3 + $0xb8] sm:$0xff]  ;;  %7973 = vmatprep.subr.bf16.mxu0 %v12440_v50  ;;  %v3563_v21 = vmax.f32 %v3507_v60, %v3509_v19  ;;  %3457 = vst.msk [vmem:[#allocation2 + $0x118] sm:$0xff] %vm3422_vm4, %v3400_v10  ;;  %v3346_v22 = vadd.f32 %v3196_v58, %v10231_v55  ;;  %3669 = vst.msk [vmem:[#allocation3 + $0xd8] sm:$0xff] %vm3422_vm4, %v3615_v16 }
 0x2eb   :  { %7140 = vmatprep.mubr.msk.f32.mxu0 %vm3422_vm4, %v10659_v47  ;;  %7162 = vmatprep.mubr.msk.f32.mxu1 %vm3422_vm4, %v10659_v47  ;;  %v3401_v24 = vmax.f32 %v1911_v12, %v3345_v56  ;;  %v1754_v25 = vpop.f32.mrb[38].mxu0  ;;  %v10672_v26 = vmax.f32 %v3566_v14, 0.0 }
 0x2ec   :  { %3946 = vmatmul.mubr.f32.gmra.mrb[74].mxu0 %v10541_v28  ;;  %4125 = vmatmul.mubr.f32.gmra.mrb[78].mxu1 %v10541_v28  ;;  %v3402_v31 = vmax.f32 %v1912_v57, %v3346_v22  ;;  %v1913_v27 = vadd.f32 %v10229_v54, %v1754_v25  ;;  %v3200_v29 = vpop.f32.mrb[38].mxu1  ;;  %v1756_v30 = vpop.f32.mrb[39].mxu0  ;;  %v3617_v38 = vmax.f32 %v3563_v21, 0.0 }
 0x2ed   :  { %v3511_v35 = vld [vmem:[#allocation2 + $0x108] sm:$0xff]  ;;  %v3568_v39 = vmax.f32 %v3399_v6, %v3401_v24  ;;  %v3347_v40 = vadd.f32 %v3200_v29, %v10229_v54  ;;  %v1914_v41 = vadd.f32 %v10231_v55, %v1756_v30  ;;  %v3202_v42 = vpop.f32.mrb[39].mxu1  ;;  %3674 = vst [vmem:[#allocation3 + $0x100] sm:$0xff] %v10672_v26 }
 0x2ee   :  { %v10677_v3 = vld [vmem:[#allocation3 + $0xc8] sm:$0xff]  ;;  %v3565_v46 = vmax.f32 %v3509_v19, %v3511_v35  ;;  %3459 = vst.msk [vmem:[#allocation2 + $0x128] sm:$0xff] %vm3422_vm4, %v3402_v31  ;;  %v3348_v34 = vadd.f32 %v3202_v42, %v10231_v55  ;;  %3671 = vst.msk [vmem:[#allocation3 + $0xe8] sm:$0xff] %vm3422_vm4, %v3617_v38 }
 0x2ef   :  { %7141 = vmatprep.mubr.msk.f32.mxu0 %vm3422_vm4, %v10677_v3  ;;  %7163 = vmatprep.mubr.msk.f32.mxu1 %vm3422_vm4, %v10677_v3  ;;  %v3403_v48 = vmax.f32 %v1913_v27, %v3347_v40  ;;  %v1760_v49 = vpop.f32.mrb[40].mxu0  ;;  %v10689_v59 = vmax.f32 %v3568_v39, 0.0 }
 0x2f0   :  { %3951 = vmatmul.mubr.f32.gmra.mrb[76].mxu0 %v10579_v63  ;;  %4130 = vmatmul.mubr.f32.gmra.mrb[80].mxu1 %v10579_v63  ;;  %v3404_v53 = vmax.f32 %v1914_v41, %v3348_v34  ;;  %v1915_v60 = vadd.f32 %v10229_v54, %v1760_v49  ;;  %v3206_v61 = vpop.f32.mrb[40].mxu1  ;;  %v1762_v62 = vpop.f32.mrb[41].mxu0  ;;  %v3619_v0 = vmax.f32 %v3565_v46, 0.0 }
 0x2f1   :  { %v3513_v32 = vld [vmem:[#allocation2 + $0x118] sm:$0xff]  ;;  %v3570_v52 = vmax.f32 %v3401_v24, %v3403_v48  ;;  %v3349_v5 = vadd.f32 %v3206_v61, %v10229_v54  ;;  %v1916_v6 = vadd.f32 %v10231_v55, %v1762_v62  ;;  %v3208_v17 = vpop.f32.mrb[41].mxu1  ;;  %3676 = vst [vmem:[#allocation3 + $0x110] sm:$0xff] %v10689_v59 }
 0x2f2   :  { %v10694_v10 = vld [vmem:[#allocation3 + $0xd8] sm:$0xff]  ;;  %v3567_v12 = vmax.f32 %v3511_v35, %v3513_v32  ;;  %3461 = vst.msk [vmem:[#allocation2 + $0x138] sm:$0xff] %vm3422_vm4, %v3404_v53  ;;  %v3350_v13 = vadd.f32 %v3208_v17, %v10231_v55  ;;  %3673 = vst.msk [vmem:[#allocation3 + $0xf8] sm:$0xff] %vm3422_vm4, %v3619_v0 }
 0x2f3   :  { %7142 = vmatprep.mubr.msk.f32.mxu0 %vm3422_vm4, %v10694_v10  ;;  %7164 = vmatprep.mubr.msk.f32.mxu1 %vm3422_vm4, %v10694_v10  ;;  %v3405_v15 = vmax.f32 %v1915_v60, %v3349_v5  ;;  %v1766_v16 = vpop.f32.mrb[42].mxu0  ;;  %v10706_v19 = vmax.f32 %v3570_v52, 0.0 }
 0x2f4   :  { %3956 = vmatmul.mubr.f32.gmra.mrb[78].mxu0 %v10606_v43  ;;  %4135 = vmatmul.mubr.f32.gmra.mrb[82].mxu1 %v10606_v43  ;;  %v3406_v14 = vmax.f32 %v1916_v6, %v3350_v13  ;;  %v1917_v56 = vadd.f32 %v10229_v54, %v1766_v16  ;;  %v3212_v57 = vpop.f32.mrb[42].mxu1  ;;  %v1768_v58 = vpop.f32.mrb[43].mxu0  ;;  %v3621_v21 = vmax.f32 %v3567_v12, 0.0 }
 0x2f5   :  { %v3515_v22 = vld [vmem:[#allocation2 + $0x128] sm:$0xff]  ;;  %v3351_v24 = vadd.f32 %v3212_v57, %v10229_v54  ;;  %v1918_v25 = vadd.f32 %v10231_v55, %v1768_v58  ;;  %v3214_v31 = vpop.f32.mrb[43].mxu1  ;;  %3678 = vst [vmem:[#allocation3 + $0x120] sm:$0xff] %v10706_v19  ;;  %v3572_v29 = vmax.f32 %v3403_v48, %v3405_v15 }
 0x2f6   :  { %v10711_v27 = vld [vmem:[#allocation3 + $0xe8] sm:$0xff]  ;;  %v3569_v30 = vmax.f32 %v3513_v32, %v3515_v22  ;;  %3463 = vst.msk [vmem:[#allocation2 + $0x148] sm:$0xff] %vm3422_vm4, %v3406_v14  ;;  %v3352_v38 = vadd.f32 %v3214_v31, %v10231_v55  ;;  %3675 = vst.msk [vmem:[#allocation3 + $0x108] sm:$0xff] %vm3422_vm4, %v3621_v21 }
 0x2f7   :  { %7143 = vmatprep.mubr.msk.f32.mxu0 %vm3422_vm4, %v10711_v27  ;;  %7165 = vmatprep.mubr.msk.f32.mxu1 %vm3422_vm4, %v10711_v27  ;;  %v3407_v35 = vmax.f32 %v1917_v56, %v3351_v24  ;;  %v1772_v39 = vpop.f32.mrb[44].mxu0  ;;  %v10723_v40 = vmax.f32 %v3572_v29, 0.0 }
 0x2f8   :  { %3961 = vmatmul.mubr.f32.gmra.mrb[80].mxu0 %v10634_v44  ;;  %4140 = vmatmul.mubr.f32.gmra.mrb[84].mxu1 %v10634_v44  ;;  %v3408_v41 = vmax.f32 %v1918_v25, %v3352_v38  ;;  %v1919_v42 = vadd.f32 %v10229_v54, %v1772_v39  ;;  %v3218_v46 = vpop.f32.mrb[44].mxu1  ;;  %v1774_v34 = vpop.f32.mrb[45].mxu0  ;;  %v3623_v48 = vmax.f32 %v3569_v30, 0.0 }
 0x2f9   :  { %v3517_v49 = vld [vmem:[#allocation2 + $0x138] sm:$0xff]  ;;  %v3353_v53 = vadd.f32 %v3218_v46, %v10229_v54  ;;  %v1920_v60 = vadd.f32 %v10231_v55, %v1774_v34  ;;  %v3220_v61 = vpop.f32.mrb[45].mxu1  ;;  %3680 = vst [vmem:[#allocation3 + $0x130] sm:$0xff] %v10723_v40  ;;  %v3574_v0 = vmax.f32 %v3405_v15, %v3407_v35 }
 0x2fa   :  { %v10728_v62 = vld [vmem:[#allocation3 + $0xf8] sm:$0xff]  ;;  %v3571_v32 = vmax.f32 %v3515_v22, %v3517_v49  ;;  %3465 = vst.msk [vmem:[#allocation2 + $0x158] sm:$0xff] %vm3422_vm4, %v3408_v41  ;;  %v3354_v52 = vadd.f32 %v3220_v61, %v10231_v55  ;;  %3677 = vst.msk [vmem:[#allocation3 + $0x118] sm:$0xff] %vm3422_vm4, %v3623_v48 }
 0x2fb   :  { %7144 = vmatprep.mubr.msk.f32.mxu0 %vm3422_vm4, %v10728_v62  ;;  %7166 = vmatprep.mubr.msk.f32.mxu1 %vm3422_vm4, %v10728_v62  ;;  %v3409_v5 = vmax.f32 %v1919_v42, %v3353_v53  ;;  %v1778_v6 = vpop.f32.mrb[46].mxu0  ;;  %v10740_v17 = vmax.f32 %v3574_v0, 0.0 }
 0x2fc   :  { %3966 = vmatmul.mubr.f32.gmra.mrb[82].mxu0 %v10652_v8  ;;  %4145 = vmatmul.mubr.f32.gmra.mrb[86].mxu1 %v10652_v8  ;;  %v3410_v12 = vmax.f32 %v1920_v60, %v3354_v52  ;;  %v1921_v13 = vadd.f32 %v10229_v54, %v1778_v6  ;;  %v3224_v15 = vpop.f32.mrb[46].mxu1  ;;  %v1780_v16 = vpop.f32.mrb[47].mxu0  ;;  %v3625_v14 = vmax.f32 %v3571_v32, 0.0 }
 0x2fd   :  { %v3519_v56 = vld [vmem:[#allocation2 + $0x148] sm:$0xff]  ;;  %v3355_v57 = vadd.f32 %v3224_v15, %v10229_v54  ;;  %v1922_v58 = vadd.f32 %v10231_v55, %v1780_v16  ;;  %v3226_v21 = vpop.f32.mrb[47].mxu1  ;;  %3682 = vst [vmem:[#allocation3 + $0x140] sm:$0xff] %v10740_v17  ;;  %v3576_v24 = vmax.f32 %v3407_v35, %v3409_v5 }
 0x2fe   :  { %v10745_v22 = vld [vmem:[#allocation3 + $0x108] sm:$0xff]  ;;  %v3573_v25 = vmax.f32 %v3517_v49, %v3519_v56  ;;  %3467 = vst.msk [vmem:[#allocation2 + $0x168] sm:$0xff] %vm3422_vm4, %v3410_v12  ;;  %v3356_v31 = vadd.f32 %v3226_v21, %v10231_v55  ;;  %3679 = vst.msk [vmem:[#allocation3 + $0x128] sm:$0xff] %vm3422_vm4, %v3625_v14 }
 0x2ff   :  { %7145 = vmatprep.mubr.msk.f32.mxu0 %vm3422_vm4, %v10745_v22  ;;  %7167 = vmatprep.mubr.msk.f32.mxu1 %vm3422_vm4, %v10745_v22  ;;  %v3411_v29 = vmax.f32 %v1921_v13, %v3355_v57  ;;  %v1784_v30 = vpop.f32.mrb[48].mxu0  ;;  %v10757_v38 = vmax.f32 %v3576_v24, 0.0 }
 0x300   :  { %3971 = vmatmul.mubr.f32.gmra.mrb[84].mxu0 %v10672_v26  ;;  %4150 = vmatmul.mubr.f32.gmra.mrb[88].mxu1 %v10672_v26  ;;  %v3412_v35 = vmax.f32 %v1922_v58, %v3356_v31  ;;  %v1923_v39 = vadd.f32 %v10229_v54, %v1784_v30  ;;  %v3230_v41 = vpop.f32.mrb[48].mxu1  ;;  %v1786_v42 = vpop.f32.mrb[49].mxu0  ;;  %v3627_v46 = vmax.f32 %v3573_v25, 0.0  ;;  %v7304_v31 = vld [vmem:[%s12428_s3 + $0x368] sm:$0xff] }
 0x301   :  { %v3521_v34 = vld [vmem:[#allocation2 + $0x158] sm:$0xff]  ;;  %v3357_v48 = vadd.f32 %v3230_v41, %v10229_v54  ;;  %v1924_v49 = vadd.f32 %v10231_v55, %v1786_v42  ;;  %v3232_v53 = vpop.f32.mrb[49].mxu1  ;;  %3684 = vst [vmem:[#allocation3 + $0x150] sm:$0xff] %v10757_v38  ;;  %v3578_v61 = vmax.f32 %v3409_v5, %v3411_v29 }
 0x302   :  { %v10762_v60 = vld [vmem:[#allocation3 + $0x118] sm:$0xff]  ;;  %v3575_v0 = vmax.f32 %v3519_v56, %v3521_v34  ;;  %3469 = vst.msk [vmem:[#allocation2 + $0x178] sm:$0xff] %vm3422_vm4, %v3412_v35  ;;  %v3358_v32 = vadd.f32 %v3232_v53, %v10231_v55  ;;  %3681 = vst.msk [vmem:[#allocation3 + $0x138] sm:$0xff] %vm3422_vm4, %v3627_v46  ;;  %v7303_v56 = vld [vmem:[%s12428_s3 + $0x360] sm:$0xff] }
 0x303   :  { %7146 = vmatprep.mubr.msk.f32.mxu0 %vm3422_vm4, %v10762_v60  ;;  %7168 = vmatprep.mubr.msk.f32.mxu1 %vm3422_vm4, %v10762_v60  ;;  %v3413_v52 = vmax.f32 %v1923_v39, %v3357_v48  ;;  %v1790_v6 = vpop.f32.mrb[50].mxu0  ;;  %v10774_v5 = vmax.f32 %v3578_v61, 0.0  ;;  %v8002_v53 = vpack.c.bf16 %v7304_v31, %v7303_v56  ;;  %v7305_v56 = vld [vmem:[%s12428_s3 + $0x370] sm:$0xff] }
 0x304   :  { %3976 = vmatmul.mubr.f32.gmra.mrb[86].mxu0 %v10689_v59  ;;  %4155 = vmatmul.mubr.f32.gmra.mrb[90].mxu1 %v10689_v59  ;;  %v3414_v12 = vmax.f32 %v1924_v49, %v3358_v32  ;;  %v1925_v13 = vadd.f32 %v10229_v54, %v1790_v6  ;;  %v3236_v15 = vpop.f32.mrb[50].mxu1  ;;  %v1792_v16 = vpop.f32.mrb[51].mxu0  ;;  %v3629_v14 = vmax.f32 %v3575_v0, 0.0 }
 0x305   :  { %v3523_v57 = vld [vmem:[#allocation2 + $0x168] sm:$0xff]  ;;  %v3359_v58 = vadd.f32 %v3236_v15, %v10229_v54  ;;  %v1926_v21 = vadd.f32 %v10231_v55, %v1792_v16  ;;  %v3238_v24 = vpop.f32.mrb[51].mxu1  ;;  %3686 = vst [vmem:[#allocation3 + $0x160] sm:$0xff] %v10774_v5  ;;  %v3580_v30 = vmax.f32 %v3411_v29, %v3413_v52 }
 0x306   :  { %v10782_v25 = vld [vmem:[#allocation3 + $0x128] sm:$0xff]  ;;  %v3577_v35 = vmax.f32 %v3521_v34, %v3523_v57  ;;  %3471 = vst.msk [vmem:[#allocation2 + $0x188] sm:$0xff] %vm3422_vm4, %v3414_v12  ;;  %v3360_v39 = vadd.f32 %v3238_v24, %v10231_v55  ;;  %3683 = vst.msk [vmem:[#allocation3 + $0x148] sm:$0xff] %vm3422_vm4, %v3629_v14 }
 0x307   :  { %7147 = vmatprep.mubr.msk.f32.mxu0 %vm3422_vm4, %v10782_v25  ;;  %7169 = vmatprep.mubr.msk.f32.mxu1 %vm3422_vm4, %v10782_v25  ;;  %v3415_v41 = vmax.f32 %v1925_v13, %v3359_v58  ;;  %v1796_v42 = vpop.f32.mrb[52].mxu0  ;;  %v10797_v29 = vmax.f32 %v3580_v30, 0.0  ;;  %v7306_v58 = vld [vmem:[%s12428_s3 + $0x378] sm:$0xff] }
 0x308   :  { %3981 = vmatmul.mubr.f32.gmra.mrb[88].mxu0 %v10706_v19  ;;  %4160 = vmatmul.mubr.f32.gmra.mrb[92].mxu1 %v10706_v19  ;;  %v3416_v46 = vmax.f32 %v1926_v21, %v3360_v39  ;;  %v1927_v34 = vadd.f32 %v10229_v54, %v1796_v42  ;;  %v3242_v48 = vpop.f32.mrb[52].mxu1  ;;  %v1798_v49 = vpop.f32.mrb[53].mxu0  ;;  %v3631_v61 = vmax.f32 %v3577_v35, 0.0 }
 0x309   :  { %7227 = vmatprep.mubr.msk.f32.mxu1 %vm3422_vm4, %v10522_v23  ;;  %v3525_v0 = vld [vmem:[#allocation2 + $0x178] sm:$0xff]  ;;  %v3361_v32 = vadd.f32 %v3242_v48, %v10229_v54  ;;  %v1928_v6 = vadd.f32 %v10231_v55, %v1798_v49  ;;  %v3244_v12 = vpop.f32.mrb[53].mxu1  ;;  %3688 = vst [vmem:[#allocation3 + $0x170] sm:$0xff] %v10797_v29  ;;  %v3582_v15 = vmax.f32 %v3413_v52, %v3415_v41  ;;  %v7246_v49 = vld [vmem:[%s12428_s3 + $0x240] sm:$0xff] }
 0x30a   :  { %v10804_v13 = vld [vmem:[#allocation3 + $0x138] sm:$0xff]  ;;  %v3579_v16 = vmax.f32 %v3523_v57, %v3525_v0  ;;  %3473 = vst.msk [vmem:[#allocation2 + $0x198] sm:$0xff] %vm3422_vm4, %v3416_v46  ;;  %v3362_v14 = vadd.f32 %v3244_v12, %v10231_v55  ;;  %3685 = vst.msk [vmem:[#allocation3 + $0x158] sm:$0xff] %vm3422_vm4, %v3631_v61  ;;  %v8005_v61 = vpack.c.bf16 %v7306_v58, %v7305_v56  ;;  %v7307_v12 = vld [vmem:[%s12428_s3 + $0x380] sm:$0xff] }
 0x30b   :  { %7148 = vmatprep.mubr.msk.f32.mxu0 %vm3422_vm4, %v10804_v13  ;;  %v3417_v21 = vmax.f32 %v1927_v34, %v3361_v32  ;;  %v1802_v52 = vpop.f32.mrb[54].mxu0  ;;  %v10820_v57 = vmax.f32 %v3582_v15, 0.0  ;;  %v7248_v58 = vld [vmem:[%s12428_s3 + $0x250] sm:$0xff] }
 0x30c   :  { %3986 = vmatmul.mubr.f32.gmra.mrb[90].mxu0 %v10723_v40  ;;  %4643 = vmatmul.mubr.f32.vlgmr.msra.gmra.mrb[94].mxu1 %v10336_v33  ;;  %v3418_v24 = vmax.f32 %v1928_v6, %v3362_v14  ;;  %v1929_v31 = vadd.f32 %v10229_v54, %v1802_v52  ;;  %v3248_v30 = vpop.f32.mrb[54].mxu1  ;;  %v1804_v35 = vpop.f32.mrb[55].mxu0  ;;  %v3633_v39 = vmax.f32 %v3579_v16, 0.0  ;;  %v7247_v6 = vld [vmem:[%s12428_s3 + $0x248] sm:$0xff] }
 0x30d   :  { %7228 = vmatprep.mubr.msk.f32.mxu1 %vm3422_vm4, %v10560_v51  ;;  %8003 = vmatpush1.bf16.msra.mxu1 %v8002_v53  ;;  %v3527_v42 = vld [vmem:[#allocation2 + $0x188] sm:$0xff]  ;;  %v3363_v46 = vadd.f32 %v3248_v30, %v10229_v54  ;;  %v1930_v34 = vadd.f32 %v10231_v55, %v1804_v35  ;;  %v3250_v48 = vpop.f32.mrb[55].mxu1  ;;  %3690 = vst [vmem:[#allocation3 + $0x180] sm:$0xff] %v10820_v57  ;;  %v7310_v30 = vld [vmem:[%s12428_s3 + $0x398] sm:$0xff] }
 0x30e   :  { %v10827_v33 = vld [vmem:[#allocation3 + $0x148] sm:$0xff]  ;;  %8004 = vmatprep.subr.bf16.mxu1 %v12440_v50  ;;  %v3584_v32 = vmax.f32 %v3415_v41, %v3417_v21  ;;  %v3581_v53 = vmax.f32 %v3525_v0, %v3527_v42  ;;  %3475 = vst.msk [vmem:[#allocation2 + $0x1a8] sm:$0xff] %vm3422_vm4, %v3418_v24  ;;  %v3364_v54 = vadd.f32 %v3250_v48, %v10231_v55  ;;  %3687 = vst.msk [vmem:[#allocation3 + $0x168] sm:$0xff] %vm3422_vm4, %v3633_v39 }
 0x30f   :  { %7149 = vmatprep.mubr.msk.f32.mxu0 %vm3422_vm4, %v10827_v33  ;;  %v7308_v41 = vld [vmem:[%s12428_s3 + $0x388] sm:$0xff]  ;;  %v3419_v0 = vmax.f32 %v1929_v31, %v3363_v46  ;;  %v7974_v56 = vpack.c.bf16 %v7247_v6, %v7246_v49  ;;  %v7309_v31 = vld [vmem:[%s12428_s3 + $0x390] sm:$0xff]  ;;  %v7311_v49 = vld [vmem:[%s12428_s3 + $0x3a0] sm:$0xff] }
 0x310   :  { %3991 = vmatmul.mubr.f32.gmra.mrb[92].mxu0 %v10740_v17  ;;  %4648 = vmatmul.mubr.f32.gmra.mrb[96].mxu1 %v10371_v1  ;;  %v10850_v55 = vmax.f32 %v3584_v32, 0.0  ;;  %v3420_v15 = vmax.f32 %v1930_v34, %v3364_v54  ;;  %v3635_v16 = vmax.f32 %v3581_v53, 0.0  ;;  %v8008_v52 = vpack.c.bf16 %v7308_v41, %v7307_v12  ;;  %v7250_v34 = vld [vmem:[%s12428_s3 + $0x260] sm:$0xff]  ;;  %v10900_v32 = vld [vmem:[#allocation3 + $0x50] sm:$0xff] }
 0x311   :  { %7189 = vmatprep.mubr.msk.f32.mxu0 %vm3422_vm4, %v10434_v37  ;;  %7229 = vmatprep.mubr.msk.f32.mxu1 %vm3422_vm4, %v10589_v18  ;;  %v3529_v14 = vld [vmem:[#allocation2 + $0x198] sm:$0xff]  ;;  %v10860_v1 = vmax.f32 %v3417_v21, %v3419_v0  ;;  %v10874_v21 = vld [vmem:[#allocation3 + $0x40] sm:$0xff]  ;;  %v8011_v48 = vpack.c.bf16 %v7310_v30, %v7309_v31  ;;  %v7252_v12 = vld [vmem:[%s12428_s3 + $0x270] sm:$0xff] }
 0x312   :  { %8006 = vmatpush1.bf16.msra.mxu1 %v8005_v61  ;;  %3692 = vst [vmem:[#allocation3 + $0x190] sm:$0xff] %v10850_v55  ;;  %v3583_v24 = vmax.f32 %v3527_v42, %v3529_v14  ;;  %3477 = vst.msk [vmem:[#allocation2 + $0x1b8] sm:$0xff] %vm3422_vm4, %v3420_v15  ;;  %v7249_v37 = vld [vmem:[%s12428_s3 + $0x258] sm:$0xff]  ;;  %v7312_v61 = vld [vmem:[%s12428_s3 + $0x3a8] sm:$0xff] }
 0x313   :  { %8007 = vmatprep.subr.bf16.mxu1 %v12440_v50  ;;  %3689 = vst.msk [vmem:[#allocation3 + $0x178] sm:$0xff] %vm3422_vm4, %v3635_v16  ;;  %v12437_v35 = vmax.f32 %v10860_v1, 0.0  ;;  %v7977_v46 = vpack.c.bf16 %v7249_v37, %v7248_v58  ;;  %v8014_v41 = vpack.c.bf16 %v7312_v61, %v7311_v49  ;;  %v7314_v15 = vld [vmem:[%s12428_s3 + $0x3b8] sm:$0xff]  ;;  %v10923_v16 = vld [vmem:[#allocation3 + $0x60] sm:$0xff]  ;;  %v7316_v37 = vld [vmem:[%s12428_s3 + $0x3c8] sm:$0xff] }
 0x314   :  { %4347 = vmatmul.mubr.f32.vlgmr.msra.gmra.mrb[94].mxu0 %v10874_v21  ;;  %4653 = vmatmul.mubr.f32.gmra.mrb[98].mxu1 %v10411_v20  ;;  %v3637_v39 = vmax.f32 %v3583_v24, 0.0  ;;  %v7254_v58 = vld [vmem:[%s12428_s3 + $0x280] sm:$0xff]  ;;  %v7255_v24 = vld [vmem:[%s12428_s3 + $0x288] sm:$0xff]  ;;  %v10946_v31 = vld [vmem:[#allocation3 + $0x70] sm:$0xff] }
 0x315   :  { %7190 = vmatprep.mubr.msk.f32.mxu0 %vm3422_vm4, %v10478_v4  ;;  %7230 = vmatprep.mubr.msk.f32.mxu1 %vm3422_vm4, %v10617_v36  ;;  %v3531_v42 = vld [vmem:[#allocation2 + $0x1a8] sm:$0xff]  ;;  %3694 = vst [vmem:[#allocation3 + $0x1a0] sm:$0xff] %v12437_v35  ;;  %v7986_v30 = vpack.c.bf16 %v7255_v24, %v7254_v58  ;;  %v7285_v58 = vld [vmem:[%s12428_s3 + $0x2d0] sm:$0xff]  ;;  %v7286_v24 = vld [vmem:[%s12428_s3 + $0x2d8] sm:$0xff] }
 0x316   :  { %7975 = vmatpush1.bf16.msra.mxu0 %v7974_v56  ;;  %8009 = vmatpush1.bf16.msra.mxu1 %v8008_v52  ;;  %v3585_v20 = vmax.f32 %v3529_v14, %v3531_v42  ;;  %v7251_v4 = vld [vmem:[%s12428_s3 + $0x268] sm:$0xff]  ;;  %3691 = vst.msk [vmem:[#allocation3 + $0x188] sm:$0xff] %vm3422_vm4, %v3637_v39  ;;  %v7256_v39 = vld [vmem:[%s12428_s3 + $0x290] sm:$0xff] }
 0x317   :  { %7976 = vmatprep.subr.bf16.mxu0 %v12440_v50  ;;  %8010 = vmatprep.subr.bf16.mxu1 %v12440_v50  ;;  %v7980_v6 = vpack.c.bf16 %v7251_v4, %v7250_v34  ;;  %v7318_v34 = vld [vmem:[%s12428_s3 + $0x3d8] sm:$0xff]  ;;  %v7258_v4 = vld [vmem:[%s12428_s3 + $0x2a0] sm:$0xff]  ;;  %v7259_v61 = vld [vmem:[%s12428_s3 + $0x2a8] sm:$0xff] }
 0x318   :  { %4352 = vmatmul.mubr.f32.gmra.mrb[96].mxu0 %v10900_v32  ;;  %4658 = vmatmul.mubr.f32.gmra.mrb[100].mxu1 %v10455_v45  ;;  %v3639_v53 = vmax.f32 %v3585_v20, 0.0  ;;  %v7253_v45 = vld [vmem:[%s12428_s3 + $0x278] sm:$0xff]  ;;  %v7300_v35 = vld [vmem:[%s12428_s3 + $0x348] sm:$0xff] }
 0x319   :  { %7191 = vmatprep.mubr.msk.f32.mxu0 %vm3422_vm4, %v10522_v23  ;;  %7231 = vmatprep.mubr.msk.f32.mxu1 %vm3422_vm4, %v10639_v2  ;;  %v3533_v54 = vld [vmem:[#allocation2 + $0x1b8] sm:$0xff]  ;;  %v7313_v23 = vld [vmem:[%s12428_s3 + $0x3b0] sm:$0xff]  ;;  %v7983_v56 = vpack.c.bf16 %v7253_v45, %v7252_v12  ;;  %v7262_v45 = vld [vmem:[%s12428_s3 + $0x2c0] sm:$0xff] }
 0x31a   :  { %7978 = vmatpush1.bf16.msra.mxu0 %v7977_v46  ;;  %8012 = vmatpush1.bf16.msra.mxu1 %v8011_v48  ;;  %v3587_v0 = vmax.f32 %v3531_v42, %v3533_v54  ;;  %3693 = vst.msk [vmem:[#allocation3 + $0x198] sm:$0xff] %vm3422_vm4, %v3639_v53  ;;  %v8017_v52 = vpack.c.bf16 %v7314_v15, %v7313_v23  ;;  %v7257_v46 = vld [vmem:[%s12428_s3 + $0x298] sm:$0xff]  ;;  %v10968_v48 = vld [vmem:[#allocation3 + $0x80] sm:$0xff]  ;;  %v7320_v53 = vld [vmem:[%s12428_s3 + $0x3e8] sm:$0xf] }
 0x31b   :  { %7979 = vmatprep.subr.bf16.mxu0 %v12440_v50  ;;  %8013 = vmatprep.subr.bf16.mxu1 %v12440_v50  ;;  %v7989_v20 = vpack.c.bf16 %v7257_v46, %v7256_v39  ;;  %v10990_v54 = vld [vmem:[#allocation3 + $0x90] sm:$0xff]  ;;  %v7363_v23 = vld [vmem:[%s12428_s3 + $0x400] sm:$0xff]  ;;  %v7364_v15 = vld [vmem:[%s12428_s3 + $0x408] sm:$0xff] }
 0x31c   :  { %4357 = vmatmul.mubr.f32.gmra.mrb[98].mxu0 %v10923_v16  ;;  %4663 = vmatmul.mubr.f32.gmra.mrb[102].mxu1 %v10497_v9  ;;  %v3641_v14 = vmax.f32 %v3587_v0, 0.0  ;;  %v7261_v0 = vld [vmem:[%s12428_s3 + $0x2b8] sm:$0xff]  ;;  %v11135_v39 = vld [vmem:[#allocation3 + $0x88] sm:$0xff]  ;;  %v11143_v46 = vld [vmem:[#allocation3 + $0x80] sm:$0xff] }
 0x31d   :  { %7192 = vmatprep.mubr.msk.f32.mxu0 %vm3422_vm4, %v10560_v51  ;;  %7232 = vmatprep.mubr.msk.f32.mxu1 %vm3422_vm4, %v10659_v47  ;;  %v7315_v51 = vld [vmem:[%s12428_s3 + $0x3c0] sm:$0xff] }
 0x31e   :  { %7981 = vmatpush1.bf16.msra.mxu0 %v7980_v6  ;;  %8015 = vmatpush1.bf16.msra.mxu1 %v8014_v41  ;;  %3695 = vst.msk [vmem:[#allocation3 + $0x1a8] sm:$0xff] %vm3422_vm4, %v3641_v14  ;;  %v8020_v42 = vpack.c.bf16 %v7316_v37, %v7315_v51  ;;  %v7992_v6 = vpack.c.bf16 %v7259_v61, %v7258_v4  ;;  %v7260_v41 = vld [vmem:[%s12428_s3 + $0x2b0] sm:$0xff]  ;;  %v11109_v14 = vld [vmem:[#allocation3 + $0x20] sm:$0xff]  ;;  %v7366_v37 = vld [vmem:[%s12428_s3 + $0x418] sm:$0xff] }
 0x31f   :  { %7982 = vmatprep.subr.bf16.mxu0 %v12440_v50  ;;  %8016 = vmatprep.subr.bf16.mxu1 %v12440_v50  ;;  %v7365_v51 = vld [vmem:[%s12428_s3 + $0x410] sm:$0xff]  ;;  %v7288_v4 = vld [vmem:[%s12428_s3 + $0x2e8] sm:$0xff] }
 0x320   :  { %4362 = vmatmul.mubr.f32.gmra.mrb[100].mxu0 %v10946_v31  ;;  %4668 = vmatmul.mubr.f32.gmra.mrb[104].mxu1 %v10541_v28  ;;  %v7368_v61 = vld [vmem:[%s12428_s3 + $0x428] sm:$0xff] }
 0x321   :  { %7193 = vmatprep.mubr.msk.f32.mxu0 %vm3422_vm4, %v10589_v18  ;;  %7233 = vmatprep.mubr.msk.f32.mxu1 %vm3422_vm4, %v10677_v3  ;;  %v7317_v18 = vld [vmem:[%s12428_s3 + $0x3d0] sm:$0xff] }
 0x322   :  { %7984 = vmatpush1.bf16.msra.mxu0 %v7983_v56  ;;  %8018 = vmatpush1.bf16.msra.mxu1 %v8017_v52  ;;  %v8023_v49 = vpack.c.bf16 %v7318_v34, %v7317_v18  ;;  %v11114_v56 = vld [vmem:[#allocation3 + $0x38] sm:$0xff]  ;;  %v8061_v52 = vpack.c.bf16 %v7364_v15, %v7363_v23  ;;  %v8030_v18 = vpack.c.bf16 %v7286_v24, %v7285_v58  ;;  %v7287_v34 = vld [vmem:[%s12428_s3 + $0x2e0] sm:$0xff]  ;;  %v7292_v58 = vld [vmem:[%s12428_s3 + $0x308] sm:$0xff] }
 0x323   :  { %7985 = vmatprep.subr.bf16.mxu0 %v12440_v50  ;;  %8019 = vmatprep.subr.bf16.mxu1 %v12440_v50  ;;  %v7291_v23 = vld [vmem:[%s12428_s3 + $0x300] sm:$0xff]  ;;  %v7372_v24 = vld [vmem:[%s12428_s3 + $0x448] sm:$0xff] }
 0x324   :  { %4367 = vmatmul.mubr.f32.gmra.mrb[102].mxu0 %v10968_v48  ;;  %4673 = vmatmul.mubr.f32.gmra.mrb[106].mxu1 %v10579_v63 }
 0x325   :  { %7194 = vmatprep.mubr.msk.f32.mxu0 %vm3422_vm4, %v10617_v36  ;;  %7234 = vmatprep.mubr.msk.f32.mxu1 %vm3422_vm4, %v10694_v10  ;;  %v7319_v36 = vld [vmem:[%s12428_s3 + $0x3e0] sm:$0xff] }
 0x326   :  { %7987 = vmatpush1.bf16.msra.mxu0 %v7986_v30  ;;  %8021 = vmatpush1.bf16.msra.mxu1 %v8020_v42  ;;  %v8026_v12 = vpack.c.bf16 %v7320_v53, %v7319_v36  ;;  %v11132_v30 = vld [vmem:[#allocation3 + $0x30] sm:$0xff]  ;;  %v11139_v42 = vld [vmem:[#allocation3 + $0x48] sm:$0xff]  ;;  %v11160_v36 = vld [vmem:[#allocation3 + $0x98] sm:$0xff] }
 0x327   :  { %7988 = vmatprep.subr.bf16.mxu0 %v12440_v50  ;;  %8022 = vmatprep.subr.bf16.mxu1 %v12440_v50  ;;  %v11164_v53 = vld [vmem:[#allocation3 + $0x58] sm:$0xff] }
 0x328   :  { %4372 = vmatmul.mubr.f32.gmra.mrb[104].mxu0 %v10990_v54  ;;  %4678 = vmatmul.mubr.f32.gmra.mrb[108].mxu1 %v10606_v43 }
 0x329   :  { %7195 = vmatprep.mubr.msk.f32.mxu0 %vm3422_vm4, %v10639_v2  ;;  %7235 = vmatprep.mubr.msk.f32.mxu1 %vm3422_vm4, %v10711_v27  ;;  %v7995_v2 = vpack.c.bf16 %v7261_v0, %v7260_v41  ;;  %v7289_v41 = vld [vmem:[%s12428_s3 + $0x2f0] sm:$0xff] }
 0x32a   :  { %7990 = vmatpush1.bf16.msra.mxu0 %v7989_v20  ;;  %8024 = vmatpush1.bf16.msra.mxu1 %v8023_v49  ;;  %v8064_v20 = vpack.c.bf16 %v7366_v37, %v7365_v51  ;;  %v7367_v49 = vld [vmem:[%s12428_s3 + $0x420] sm:$0xff]  ;;  %v11212_v51 = vld [vmem:[#allocation3 + $0xb8] sm:$0xff] }
 0x32b   :  { %7991 = vmatprep.subr.bf16.mxu0 %v12440_v50  ;;  %8025 = vmatprep.subr.bf16.mxu1 %v12440_v50  ;;  %v8067_v0 = vpack.c.bf16 %v7368_v61, %v7367_v49  ;;  %v11216_v37 = vld [vmem:[#allocation3 + $0x78] sm:$0xff]  ;;  %v7373_v61 = vld [vmem:[%s12428_s3 + $0x450] sm:$0xff] }
 0x32c   :  { %4377 = vmatmul.mubr.f32.gmra.mrb[106].mxu0 %v10497_v9  ;;  %4683 = vmatmul.mubr.f32.gmra.mrb[110].mxu1 %v10634_v44  ;;  %v7263_v9 = vld [vmem:[%s12428_s3 + $0x2c8] sm:$0xf]  ;;  %v7294_v49 = vld [vmem:[%s12428_s3 + $0x318] sm:$0xff] }
 0x32d   :  { %7196 = vmatprep.mubr.msk.f32.mxu0 %vm3422_vm4, %v10659_v47  ;;  %7236 = vmatprep.mubr.msk.f32.mxu1 %vm3422_vm4, %v10728_v62  ;;  %v7998_v47 = vpack.c.bf16 %v7263_v9, %v7262_v45  ;;  %v7369_v45 = vld [vmem:[%s12428_s3 + $0x430] sm:$0xff]  ;;  %v7370_v9 = vld [vmem:[%s12428_s3 + $0x438] sm:$0xff] }
 0x32e   :  { %7993 = vmatpush1.bf16.msra.mxu0 %v7992_v6  ;;  %8028 = vmatpush1.bf16.msk.msra.mxu1 %vm10209_vm3, %v8026_v12  ;;  %v11168_v6 = vld [vmem:[#allocation3 + $0x90] sm:$0xff]  ;;  %v8033_v12 = vpack.c.bf16 %v7288_v4, %v7287_v34  ;;  %v8070_v15 = vpack.c.bf16 %v7370_v9, %v7369_v45  ;;  %v8039_v34 = vpack.c.bf16 %v7292_v58, %v7291_v23  ;;  %v7295_v9 = vld [vmem:[%s12428_s3 + $0x320] sm:$0xff]  ;;  %v7296_v23 = vld [vmem:[%s12428_s3 + $0x328] sm:$0xff] }
 0x32f   :  { %7994 = vmatprep.subr.bf16.mxu0 %v12440_v50  ;;  %8057 = vmatprep.subr.bf16.mxu1 %v12440_v50  ;;  %v7376_v58 = vld [vmem:[%s12428_s3 + $0x468] sm:$0xff] }
 0x330   :  { %4382 = vmatmul.mubr.f32.gmra.mrb[108].mxu0 %v10541_v28  ;;  %4688 = vmatmul.mubr.f32.gmra.mrb[112].mxu1 %v10652_v8  ;;  %v11058_v28 = vld [vmem:[#allocation3 + $0x158] sm:$0xff] }
 0x331   :  { %7197 = vmatprep.mubr.msk.f32.mxu0 %vm3422_vm4, %v10677_v3  ;;  %7237 = vmatprep.mubr.msk.f32.mxu1 %vm3422_vm4, %v10745_v22  ;;  %v11098_v3 = vld [vmem:[#allocation3 + $0x28] sm:$0xff] }
 0x332   :  { %7996 = vmatpush1.bf16.msra.mxu0 %v7995_v2  ;;  %v7290_v2 = vld [vmem:[%s12428_s3 + $0x2f8] sm:$0xff] }
 0x333   :  { %7997 = vmatprep.subr.bf16.mxu0 %v12440_v50 }
 0x334   :  { %4387 = vmatmul.mubr.f32.gmra.mrb[110].mxu0 %v10579_v63  ;;  %4693 = vmatmul.mubr.f32.gmra.mrb[114].mxu1 %v10672_v26  ;;  %v11066_v63 = vld [vmem:[#allocation3 + $0x168] sm:$0xff] }
 0x335   :  { %7198 = vmatprep.mubr.msk.f32.mxu0 %vm3422_vm4, %v10694_v10  ;;  %7238 = vmatprep.mubr.msk.f32.mxu1 %vm3422_vm4, %v10762_v60 }
 0x336   :  { %8000 = vmatpush1.bf16.msk.msra.mxu0 %vm10209_vm3, %v7998_v47  ;;  %v11186_v47 = vld [vmem:[#allocation3 + $0xa8] sm:$0xff] }
 0x337   :  { %8029 = vmatprep.subr.bf16.mxu0 %v12440_v50 }
 0x338   :  { %4392 = vmatmul.mubr.f32.gmra.mrb[112].mxu0 %v10606_v43  ;;  %4698 = vmatmul.mubr.f32.gmra.mrb[116].mxu1 %v10689_v59  ;;  %v11074_v43 = vld [vmem:[#allocation3 + $0x178] sm:$0xff] }
 0x339   :  { %7199 = vmatprep.mubr.msk.f32.mxu0 %vm3422_vm4, %v10711_v27  ;;  %7239 = vmatprep.mubr.msk.f32.mxu1 %vm3422_vm4, %v10782_v25 }
 0x33c   :  { %4397 = vmatmul.mubr.f32.gmra.mrb[114].mxu0 %v10634_v44  ;;  %4703 = vmatmul.mubr.f32.gmra.mrb[118].mxu1 %v10706_v19  ;;  %v11082_v44 = vld [vmem:[#allocation3 + $0x188] sm:$0xff] }
 0x33d   :  { %7200 = vmatprep.mubr.msk.f32.mxu0 %vm3422_vm4, %v10728_v62  ;;  %7240 = vmatprep.mubr.msk.f32.mxu1 %vm3422_vm4, %v10804_v13 }
 0x340   :  { %4402 = vmatmul.mubr.f32.gmra.mrb[116].mxu0 %v10652_v8  ;;  %4708 = vmatmul.mubr.f32.gmra.mrb[120].mxu1 %v10723_v40  ;;  %v7361_v8 = vld [vmem:[%s12428_s3 + $0x3f0] sm:$0xff] }
 0x341   :  { %7201 = vmatprep.mubr.msk.f32.mxu0 %vm3422_vm4, %v10745_v22  ;;  %7241 = vmatprep.mubr.msk.f32.mxu1 %vm3422_vm4, %v10827_v33 }
 0x344   :  { %4407 = vmatmul.mubr.f32.gmra.mrb[118].mxu0 %v10672_v26  ;;  %4713 = vmatmul.mubr.f32.gmra.mrb[122].mxu1 %v10740_v17  ;;  %v7362_v26 = vld [vmem:[%s12428_s3 + $0x3f8] sm:$0xff] }
 0x345   :  { %7202 = vmatprep.mubr.msk.f32.mxu0 %vm3422_vm4, %v10762_v60  ;;  %7242 = vmatprep.mubr.msk.f32.mxu1 %vm3422_vm4, %v11058_v28 }
 0x348   :  { %4412 = vmatmul.mubr.f32.gmra.mrb[120].mxu0 %v10689_v59  ;;  %4718 = vmatmul.mubr.f32.gmra.mrb[124].mxu1 %v10757_v38  ;;  %v8058_v59 = vpack.c.bf16 %v7362_v26, %v7361_v8  ;;  %v11190_v8 = vld [vmem:[#allocation3 + $0x68] sm:$0xff]  ;;  %v11194_v26 = vld [vmem:[#allocation3 + $0xa0] sm:$0xff] }
 0x349   :  { %7203 = vmatprep.mubr.msk.f32.mxu0 %vm3422_vm4, %v10782_v25  ;;  %7243 = vmatprep.mubr.msk.f32.mxu1 %vm3422_vm4, %v11066_v63 }
 0x34c   :  { %4417 = vmatmul.mubr.f32.gmra.mrb[122].mxu0 %v10706_v19  ;;  %4723 = vmatmul.mubr.f32.gmra.mrb[126].mxu1 %v10774_v5 }
 0x34d   :  { %7204 = vmatprep.mubr.msk.f32.mxu0 %vm3422_vm4, %v10804_v13  ;;  %7244 = vmatprep.mubr.msk.f32.mxu1 %vm3422_vm4, %v11074_v43 }
 0x350   :  { %4422 = vmatmul.mubr.f32.gmra.mrb[124].mxu0 %v10723_v40  ;;  %4728 = vmatmul.mubr.f32.gmra.mrb[128].mxu1 %v10797_v29 }
 0x351   :  { %7205 = vmatprep.mubr.msk.f32.mxu0 %vm3422_vm4, %v10827_v33  ;;  %7245 = vmatprep.mubr.msk.f32.mxu1 %vm3422_vm4, %v11082_v44 }
 0x354   :  { %4427 = vmatmul.mubr.f32.gmra.mrb[126].mxu0 %v10740_v17  ;;  %4733 = vmatmul.mubr.f32.gmra.mrb[130].mxu1 %v10820_v57 }
 0x355   :  { %7206 = vmatprep.mubr.msk.f32.mxu0 %vm3422_vm4, %v11058_v28  ;;  %7322 = vmatprep.mubr.msk.f32.mxu1 %vm3422_vm4, %v11098_v3 }
 0x358   :  { %4432 = vmatmul.mubr.f32.gmra.mrb[128].mxu0 %v10757_v38  ;;  %5185 = vmatmul.mubr.f32.vlgmr.msra.gmra.mrb[132].mxu1 %v11109_v14 }
 0x359   :  { %7207 = vmatprep.mubr.msk.f32.mxu0 %vm3422_vm4, %v11066_v63  ;;  %7323 = vmatprep.mubr.msk.f32.mxu1 %vm3422_vm4, %v11114_v56 }
 0x35a   :  { %8059 = vmatpush1.bf16.msra.mxu1 %v8058_v59  ;;  %v8036_v59 = vpack.c.bf16 %v7290_v2, %v7289_v41  ;;  %v11238_v41 = vld [vmem:[#allocation3 + $0xc8] sm:$0xff]  ;;  %v11246_v2 = vld [vmem:[#allocation3 + $0xc0] sm:$0xff] }
 0x35b   :  { %8060 = vmatprep.subr.bf16.mxu1 %v12440_v50 }
 0x35c   :  { %4437 = vmatmul.mubr.f32.gmra.mrb[130].mxu0 %v10774_v5  ;;  %5190 = vmatmul.mubr.f32.gmra.mrb[134].mxu1 %v11132_v30 }
 0x35d   :  { %7265 = vmatprep.mubr.msk.f32.mxu0 %vm3422_vm4, %v11135_v39  ;;  %7324 = vmatprep.mubr.msk.f32.mxu1 %vm3422_vm4, %v11139_v42 }
 0x35e   :  { %8062 = vmatpush1.bf16.msra.mxu1 %v8061_v52  ;;  %v7371_v52 = vld [vmem:[%s12428_s3 + $0x440] sm:$0xff] }
 0x35f   :  { %8063 = vmatprep.subr.bf16.mxu1 %v12440_v50  ;;  %v8073_v4 = vpack.c.bf16 %v7372_v24, %v7371_v52  ;;  %v11264_v52 = vld [vmem:[#allocation3 + $0xd8] sm:$0xff] }
 0x360   :  { %4939 = vmatmul.mubr.f32.vlgmr.msra.gmra.mrb[132].mxu0 %v11143_v46  ;;  %5195 = vmatmul.mubr.f32.gmra.mrb[136].mxu1 %v10874_v21  ;;  %v11268_v24 = vld [vmem:[#allocation3 + $0x98] sm:$0xff] }
 0x361   :  { %7266 = vmatprep.mubr.msk.f32.mxu0 %vm3422_vm4, %v11160_v36  ;;  %7325 = vmatprep.mubr.msk.f32.mxu1 %vm3422_vm4, %v11164_v53 }
 0x362   :  { %8031 = vmatpush1.bf16.msra.mxu0 %v8030_v18  ;;  %8065 = vmatpush1.bf16.msra.mxu1 %v8064_v20  ;;  %v11220_v18 = vld [vmem:[#allocation3 + $0xb0] sm:$0xff] }
 0x363   :  { %8032 = vmatprep.subr.bf16.mxu0 %v12440_v50  ;;  %8066 = vmatprep.subr.bf16.mxu1 %v12440_v50  ;;  %v7293_v20 = vld [vmem:[%s12428_s3 + $0x310] sm:$0xff] }
 0x364   :  { %4944 = vmatmul.mubr.f32.gmra.mrb[134].mxu0 %v11168_v6  ;;  %5200 = vmatmul.mubr.f32.gmra.mrb[138].mxu1 %v10900_v32  ;;  %v8042_v45 = vpack.c.bf16 %v7294_v49, %v7293_v20  ;;  %v8045_v20 = vpack.c.bf16 %v7296_v23, %v7295_v9  ;;  %v11290_v9 = vld [vmem:[#allocation3 + $0xe8] sm:$0xff] }
 0x365   :  { %7267 = vmatprep.mubr.msk.f32.mxu0 %vm3422_vm4, %v11186_v47  ;;  %7326 = vmatprep.mubr.msk.f32.mxu1 %vm3422_vm4, %v11190_v8  ;;  %12449 = vst [vmem:[#allocation10_spill] sm:$0xff] %v11290_v9 }
 0x366   :  { %8034 = vmatpush1.bf16.msra.mxu0 %v8033_v12  ;;  %8068 = vmatpush1.bf16.msra.mxu1 %v8067_v0  ;;  %v7374_v12 = vld [vmem:[%s12428_s3 + $0x458] sm:$0xff]  ;;  %v11242_v0 = vld [vmem:[#allocation3 + $0x88] sm:$0xff] }
 0x367   :  { %8035 = vmatprep.subr.bf16.mxu0 %v12440_v50  ;;  %8069 = vmatprep.subr.bf16.mxu1 %v12440_v50 }
 0x368   :  { %4949 = vmatmul.mubr.f32.gmra.mrb[136].mxu0 %v11194_v26  ;;  %5205 = vmatmul.mubr.f32.gmra.mrb[140].mxu1 %v10923_v16 }
 0x369   :  { %7268 = vmatprep.mubr.msk.f32.mxu0 %vm3422_vm4, %v11212_v51  ;;  %7327 = vmatprep.mubr.msk.f32.mxu1 %vm3422_vm4, %v11216_v37 }
 0x36a   :  { %8037 = vmatpush1.bf16.msra.mxu0 %v8036_v59  ;;  %8071 = vmatpush1.bf16.msra.mxu1 %v8070_v15  ;;  %v8076_v59 = vpack.c.bf16 %v7374_v12, %v7373_v61  ;;  %v7375_v15 = vld [vmem:[%s12428_s3 + $0x460] sm:$0xff]  ;;  %v7298_v61 = vld [vmem:[%s12428_s3 + $0x338] sm:$0xff]  ;;  %v7377_v12 = vld [vmem:[%s12428_s3 + $0x470] sm:$0xff] }
 0x36b   :  { %8038 = vmatprep.subr.bf16.mxu0 %v12440_v50  ;;  %8072 = vmatprep.subr.bf16.mxu1 %v12440_v50  ;;  %v8079_v49 = vpack.c.bf16 %v7376_v58, %v7375_v15  ;;  %v11298_v58 = vld [vmem:[#allocation3 + $0xe0] sm:$0xff] }
 0x36c   :  { %4954 = vmatmul.mubr.f32.gmra.mrb[138].mxu0 %v11220_v18  ;;  %5210 = vmatmul.mubr.f32.gmra.mrb[142].mxu1 %v10946_v31  ;;  %12450 = vst [vmem:[#allocation11_spill] sm:$0xff] %v11298_v58 }
 0x36d   :  { %7269 = vmatprep.mubr.msk.f32.mxu0 %vm3422_vm4, %v11238_v41  ;;  %7328 = vmatprep.mubr.msk.f32.mxu1 %vm3422_vm4, %v11242_v0 }
 0x36e   :  { %8040 = vmatpush1.bf16.msra.mxu0 %v8039_v34  ;;  %8074 = vmatpush1.bf16.msra.mxu1 %v8073_v4  ;;  %v11272_v34 = vld [vmem:[#allocation3 + $0xd0] sm:$0xff] }
 0x36f   :  { %8041 = vmatprep.subr.bf16.mxu0 %v12440_v50  ;;  %8075 = vmatprep.subr.bf16.mxu1 %v12440_v50  ;;  %12448 = vst [vmem:[#allocation9_spill] sm:$0xff] %v11272_v34  ;;  %v7297_v4 = vld [vmem:[%s12428_s3 + $0x330] sm:$0xff] }
 0x370   :  { %4959 = vmatmul.mubr.f32.gmra.mrb[140].mxu0 %v11246_v2  ;;  %5215 = vmatmul.mubr.f32.gmra.mrb[144].mxu1 %v10968_v48  ;;  %v8048_v23 = vpack.c.bf16 %v7298_v61, %v7297_v4  ;;  %v11314_v4 = vld [vmem:[#allocation3 + $0xb8] sm:$0xff]  ;;  %v7301_v61 = vld [vmem:[%s12428_s3 + $0x350] sm:$0xff] }
 0x371   :  { %7270 = vmatprep.mubr.msk.f32.mxu0 %vm3422_vm4, %v11264_v52  ;;  %7329 = vmatprep.mubr.msk.f32.mxu1 %vm3422_vm4, %v11268_v24 }
 0x372   :  { %8043 = vmatpush1.bf16.msra.mxu0 %v8042_v45  ;;  %8077 = vmatpush1.bf16.msra.mxu1 %v8076_v59  ;;  %v7378_v45 = vld [vmem:[%s12428_s3 + $0x478] sm:$0xf]  ;;  %v11294_v59 = vld [vmem:[#allocation3 + $0xa8] sm:$0xff] }
 0x373   :  { %8044 = vmatprep.subr.bf16.mxu0 %v12440_v50  ;;  %8078 = vmatprep.subr.bf16.mxu1 %v12440_v50  ;;  %v8082_v15 = vpack.c.bf16 %v7378_v45, %v7377_v12  ;;  %v7302_v12 = vld [vmem:[%s12428_s3 + $0x358] sm:$0xf]  ;;  %v11328_v45 = vld [vmem:[#allocation3 + $0xf0] sm:$0xff] }
 0x374   :  { %4964 = vmatmul.mubr.f32.gmra.mrb[142].mxu0 %v11272_v34  ;;  %5220 = vmatmul.mubr.f32.gmra.mrb[146].mxu1 %v10990_v54  ;;  %v7403_v34 = vld [vmem:[%s12428_s3 + $0x4a0] sm:$0xff] }
 0x375   :  { %7271 = vmatprep.mubr.msk.f32.mxu0 %vm3422_vm4, %v11290_v9  ;;  %7330 = vmatprep.mubr.msk.f32.mxu1 %vm3422_vm4, %v11294_v59 }
 0x376   :  { %8046 = vmatpush1.bf16.msra.mxu0 %v8045_v20  ;;  %8080 = vmatpush1.bf16.msra.mxu1 %v8079_v49  ;;  %v11309_v20 = vld [vmem:[#allocation3 + $0xa0] sm:$0xff]  ;;  %v8051_v49 = vpack.c.bf16 %v7300_v35, %v7299_v7  ;;  %v11331_v7 = vld [vmem:[#allocation3 + $0xb0] sm:$0xff]  ;;  %v11336_v35 = vld [vmem:[#allocation3 + $0xc8] sm:$0xff] }
 0x377   :  { %8047 = vmatprep.subr.bf16.mxu0 %v12440_v50  ;;  %8081 = vmatprep.subr.bf16.mxu1 %v12440_v50 }
 0x378   :  { %4969 = vmatmul.mubr.f32.gmra.mrb[144].mxu0 %v11298_v58  ;;  %5225 = vmatmul.mubr.f32.gmra.mrb[148].mxu1 %v11309_v20  ;;  %v11344_v58 = vld [vmem:[#allocation3 + $0xc0] sm:$0xff] }
 0x379   :  { %7272 = vmatprep.mubr.msk.f32.mxu0 %vm3422_vm4, %v10728_v62  ;;  %7331 = vmatprep.mubr.msk.f32.mxu1 %vm3422_vm4, %v11314_v4 }
 0x37a   :  { %8049 = vmatpush1.bf16.msra.mxu0 %v8048_v23  ;;  %8084 = vmatpush1.bf16.msk.msra.mxu1 %vm10209_vm3, %v8082_v15  ;;  %v8054_v23 = vpack.c.bf16 %v7302_v12, %v7301_v61  ;;  %v11341_v15 = vld [vmem:[#allocation3 + $0x100] sm:$0xff]  ;;  %v11357_v61 = vld [vmem:[#allocation3 + $0xd0] sm:$0xff] }
 0x37b   :  { %8050 = vmatprep.subr.bf16.mxu0 %v12440_v50  ;;  %8113 = vmatprep.subr.bf16.mxu1 %v12440_v50  ;;  %v11391_v12 = vld [vmem:[#allocation3 + $0x120] sm:$0xff] }
 0x37c   :  { %4974 = vmatmul.mubr.f32.gmra.mrb[146].mxu0 %v11328_v45  ;;  %5230 = vmatmul.mubr.f32.gmra.mrb[150].mxu1 %v11331_v7 }
 0x37d   :  { %7273 = vmatprep.mubr.msk.f32.mxu0 %vm3422_vm4, %v10745_v22  ;;  %7332 = vmatprep.mubr.msk.f32.mxu1 %vm3422_vm4, %v11336_v35 }
 0x37e   :  { %8052 = vmatpush1.bf16.msra.mxu0 %v8051_v49  ;;  %v11354_v49 = vld [vmem:[#allocation3 + $0x110] sm:$0xff] }
 0x37f   :  { %8053 = vmatprep.subr.bf16.mxu0 %v12440_v50 }
 0x380   :  { %4979 = vmatmul.mubr.f32.gmra.mrb[148].mxu0 %v11341_v15  ;;  %5235 = vmatmul.mubr.f32.gmra.mrb[152].mxu1 %v11344_v58 }
 0x381   :  { %7274 = vmatprep.mubr.msk.f32.mxu0 %vm3422_vm4, %v10762_v60  ;;  %7333 = vmatprep.mubr.msk.f32.mxu1 %vm3422_vm4, %v10694_v10  ;;  %v11365_v10 = vld [vmem:[#allocation3 + $0xe0] sm:$0xff] }
 0x382   :  { %8056 = vmatpush1.bf16.msk.msra.mxu0 %vm10209_vm3, %v8054_v23 }
 0x383   :  { %8085 = vmatprep.subr.bf16.mxu0 %v12440_v50 }
 0x384   :  { %4984 = vmatmul.mubr.f32.gmra.mrb[150].mxu0 %v11354_v49  ;;  %5240 = vmatmul.mubr.f32.gmra.mrb[154].mxu1 %v11357_v61 }
 0x385   :  { %7275 = vmatprep.mubr.msk.f32.mxu0 %vm3422_vm4, %v10782_v25  ;;  %7334 = vmatprep.mubr.msk.f32.mxu1 %vm3422_vm4, %v10711_v27 }
 0x388   :  { %4989 = vmatmul.mubr.f32.gmra.mrb[152].mxu0 %v10706_v19  ;;  %5245 = vmatmul.mubr.f32.gmra.mrb[156].mxu1 %v11365_v10 }
 0x389   :  { %7276 = vmatprep.mubr.msk.f32.mxu0 %vm3422_vm4, %v10804_v13  ;;  %7335 = vmatprep.mubr.msk.f32.mxu1 %vm3422_vm4, %v10728_v62 }
 0x38c   :  { %4994 = vmatmul.mubr.f32.gmra.mrb[154].mxu0 %v10723_v40  ;;  %5250 = vmatmul.mubr.f32.gmra.mrb[158].mxu1 %v11328_v45 }
 0x38d   :  { %7277 = vmatprep.mubr.msk.f32.mxu0 %vm3422_vm4, %v10827_v33  ;;  %7336 = vmatprep.mubr.msk.f32.mxu1 %vm3422_vm4, %v10745_v22 }
 0x390   :  { %4999 = vmatmul.mubr.f32.gmra.mrb[156].mxu0 %v10740_v17  ;;  %5255 = vmatmul.mubr.f32.gmra.mrb[160].mxu1 %v11341_v15 }
 0x391   :  { %7278 = vmatprep.mubr.msk.f32.mxu0 %vm3422_vm4, %v11058_v28  ;;  %7337 = vmatprep.mubr.msk.f32.mxu1 %vm3422_vm4, %v10762_v60 }
 0x393   :  { %v4071_v19 = vpop.f32.mrb[56].mxu1 }
 0x394   :  { %v4073_v27 = vpop.f32.mrb[57].mxu1  ;;  %5004 = vmatmul.mubr.f32.gmra.mrb[158].mxu0 %v10757_v38  ;;  %5260 = vmatmul.mubr.f32.gmra.mrb[162].mxu1 %v11354_v49 }
 0x395   :  { %7279 = vmatprep.mubr.msk.f32.mxu0 %vm3422_vm4, %v11066_v63  ;;  %7338 = vmatprep.mubr.msk.f32.mxu1 %vm3422_vm4, %v10782_v25 }
 0x397   :  { %v4076_v62 = vpop.f32.mrb[58].mxu1 }
 0x398   :  { %v4078_v22 = vpop.f32.mrb[59].mxu1  ;;  %5009 = vmatmul.mubr.f32.gmra.mrb[160].mxu0 %v10774_v5  ;;  %5265 = vmatmul.mubr.f32.gmra.mrb[164].mxu1 %v11391_v12 }
 0x399   :  { %7280 = vmatprep.mubr.msk.f32.mxu0 %vm3422_vm4, %v11074_v43  ;;  %7339 = vmatprep.mubr.msk.f32.mxu1 %vm3422_vm4, %v10804_v13  ;;  %v7437_v13 = vld [vmem:[%s12428_s3 + $0x510] sm:$0xff] }
 0x39b   :  { %v3902_v38 = vpop.f32.mrb[56].mxu0  ;;  %v4081_v60 = vpop.f32.mrb[60].mxu1 }
 0x39c   :  { %v11398_v23 = vadd.f32 %v4071_v19, %v3902_v38  ;;  %v3904_v27 = vpop.f32.mrb[57].mxu0  ;;  %v4083_v25 = vpop.f32.mrb[61].mxu1  ;;  %5014 = vmatmul.mubr.f32.gmra.mrb[162].mxu0 %v10797_v29  ;;  %5270 = vmatmul.mubr.f32.gmra.mrb[166].mxu1 %v10723_v40  ;;  %v7438_v19 = vld [vmem:[%s12428_s3 + $0x518] sm:$0xff] }
 0x39d   :  { %7281 = vmatprep.mubr.msk.f32.mxu0 %vm3422_vm4, %v11082_v44  ;;  %7340 = vmatprep.mubr.msk.f32.mxu1 %vm3422_vm4, %v10827_v33  ;;  %v11416_v44 = vld [vmem:[#allocation3 + $0x198] sm:$0xff]  ;;  %v8114_v33 = vpack.c.bf16 %v7438_v19, %v7437_v13  ;;  %v7399_v13 = vld [vmem:[%s12428_s3 + $0x480] sm:$0xff] }
 0x39e   :  { %12451 = vst [vmem:[#allocation12_spill] sm:$0xff] %v11416_v44 }
 0x39f   :  { %v3907_v5 = vpop.f32.mrb[58].mxu0  ;;  %v4086_v43 = vpop.f32.mrb[62].mxu1 }
 0x3a0   :  { %v11412_v22 = vadd.f32 %v4076_v62, %v3907_v5  ;;  %v3909_v29 = vpop.f32.mrb[59].mxu0  ;;  %v4088_v40 = vpop.f32.mrb[63].mxu1  ;;  %5019 = vmatmul.mubr.f32.gmra.mrb[164].mxu0 %v10820_v57  ;;  %5275 = vmatmul.mubr.f32.gmra.mrb[168].mxu1 %v10740_v17  ;;  %v7439_v62 = vld [vmem:[%s12428_s3 + $0x520] sm:$0xff]  ;;  %v7440_v57 = vld [vmem:[%s12428_s3 + $0x528] sm:$0xff] }
 0x3a1   :  { %7282 = vmatprep.mubr.msk.f32.mxu0 %vm3422_vm4, %v11416_v44  ;;  %7380 = vmatprep.mubr.msk.f32.mxu1 %vm3422_vm4, %v11139_v42  ;;  %v11432_v29 = vld [vmem:[#allocation3 + $0x1a8] sm:$0xff]  ;;  %v7401_v44 = vld [vmem:[%s12428_s3 + $0x490] sm:$0xff] }
 0x3a2   :  { %12452 = vst [vmem:[#allocation13_spill] sm:$0xff] %v11432_v29 }
 0x3a3   :  { %v3912_v38 = vpop.f32.mrb[60].mxu0  ;;  %v4091_v27 = vpop.f32.mrb[64].mxu1 }
 0x3a4   :  { %v11428_v17 = vadd.f32 %v4081_v60, %v3912_v38  ;;  %v3914_v25 = vpop.f32.mrb[61].mxu0  ;;  %v4093_v5 = vpop.f32.mrb[65].mxu1  ;;  %5024 = vmatmul.mubr.f32.gmra.mrb[166].mxu0 %v10850_v55  ;;  %5530 = vmatmul.mubr.f32.vlgmr.msra.gmra.mrb[170].mxu1 %v10874_v21  ;;  %v8117_v60 = vpack.c.bf16 %v7440_v57, %v7439_v62  ;;  %v7400_v55 = vld [vmem:[%s12428_s3 + $0x488] sm:$0xff]  ;;  %v7441_v38 = vld [vmem:[%s12428_s3 + $0x530] sm:$0xff]  ;;  %v12453_v57 = vmax.f32 %v10860_v1, 0.0  ;;  %v7402_v1 = vld [vmem:[%s12428_s3 + $0x498] sm:$0xff] }
 0x3a5   :  { %7283 = vmatprep.mubr.msk.f32.mxu0 %vm3422_vm4, %v11432_v29  ;;  %7381 = vmatprep.mubr.msk.f32.mxu1 %vm3422_vm4, %v11164_v53  ;;  %v7442_v25 = vld [vmem:[%s12428_s3 + $0x538] sm:$0xff]  ;;  %v8725_v29 = vld [vmem:[#allocation3 + $0x8] sm:$0xff]  ;;  %v8089_v9 = vpack.c.bf16 %v7402_v1, %v7401_v44 }
 0x3a6   :  { %8115 = vmatpush1.bf16.msra.mxu1 %v8114_v33  ;;  %v7446_v44 = vld [vmem:[%s12428_s3 + $0x558] sm:$0xff] }
 0x3a7   :  { %v3917_v19 = vpop.f32.mrb[62].mxu0  ;;  %v4096_v40 = vpop.f32.mrb[66].mxu1  ;;  %8116 = vmatprep.subr.bf16.mxu1 %v12440_v50  ;;  %v8086_v50 = vpack.c.bf16 %v7400_v55, %v7399_v13  ;;  %v7444_v13 = vld [vmem:[%s12428_s3 + $0x548] sm:$0xff] }
 0x3a8   :  { %v11451_v5 = vadd.f32 %v4086_v43, %v3917_v19  ;;  %v3919_v33 = vpop.f32.mrb[63].mxu0  ;;  %v4098_v62 = vpop.f32.mrb[67].mxu1  ;;  %5029 = vmatmul.mubr.f32.gmra.mrb[168].mxu0 %v12453_v57  ;;  %5535 = vmatmul.mubr.f32.gmra.mrb[172].mxu1 %v10900_v32  ;;  %v8120_v43 = vpack.c.bf16 %v7442_v25, %v7441_v38  ;;  %v8726_v25 = vld [vmem:[#allocation3] sm:$0xff]  ;;  %v8727_v57 = vld [vmem:[#allocation3 + $0x18] sm:$0xff] }
 0x3a9   :  { %7342 = vmatprep.mubr.msk.f32.mxu0 %vm3422_vm4, %v8725_v29  ;;  %7382 = vmatprep.mubr.msk.f32.mxu1 %vm3422_vm4, %v11190_v8  ;;  %v12454_v62 = vmov 0.0|0.0   ;;  %v7443_v29 = vld [vmem:[%s12428_s3 + $0x540] sm:$0xff] }
 0x3aa   :  { %8118 = vmatpush1.bf16.msra.mxu1 %v8117_v60 }
 0x3ab   :  { %v3922_v19 = vpop.f32.mrb[64].mxu0  ;;  %v4101_v33 = vpop.f32.mrb[68].mxu1  ;;  %8119 = vmatprep.subr.bf16.mxu1 %v12454_v62 }
 0x3ac   :  { %v11472_v55 = vadd.f32 %v4091_v27, %v3922_v19  ;;  %v3924_v60 = vpop.f32.mrb[65].mxu0  ;;  %v4103_v38 = vpop.f32.mrb[69].mxu1  ;;  %5348 = vmatmul.mubr.f32.vlgmr.msra.gmra.mrb[170].mxu0 %v8726_v25  ;;  %5540 = vmatmul.mubr.f32.gmra.mrb[174].mxu1 %v10923_v16  ;;  %v8123_v27 = vpack.c.bf16 %v7444_v13, %v7443_v29  ;;  %v8728_v13 = vld [vmem:[#allocation3 + $0x10] sm:$0xff] }
 0x3ad   :  { %7343 = vmatprep.mubr.msk.f32.mxu0 %vm3422_vm4, %v8727_v57  ;;  %7383 = vmatprep.mubr.msk.f32.mxu1 %vm3422_vm4, %v11216_v37  ;;  %v7404_v38 = vld [vmem:[%s12428_s3 + $0x4a8] sm:$0xff]  ;;  %v7405_v57 = vld [vmem:[%s12428_s3 + $0x4b0] sm:$0xff] }
 0x3ae   :  { %8087 = vmatpush1.bf16.msra.mxu0 %v8086_v50  ;;  %8121 = vmatpush1.bf16.msra.mxu1 %v8120_v43  ;;  %v7445_v50 = vld [vmem:[%s12428_s3 + $0x550] sm:$0xff]  ;;  %v8092_v25 = vpack.c.bf16 %v7404_v38, %v7403_v34  ;;  %v7448_v34 = vld [vmem:[%s12428_s3 + $0x568] sm:$0xff] }
 0x3af   :  { %v3927_v19 = vpop.f32.mrb[66].mxu0  ;;  %v4106_v60 = vpop.f32.mrb[70].mxu1  ;;  %8088 = vmatprep.subr.bf16.mxu0 %v12454_v62  ;;  %8122 = vmatprep.subr.bf16.mxu1 %v12454_v62 }
 0x3b0   :  { %v11492_v43 = vadd.f32 %v4096_v40, %v3927_v19  ;;  %v3929_v1 = vpop.f32.mrb[67].mxu0  ;;  %v4108_v29 = vpop.f32.mrb[71].mxu1  ;;  %5353 = vmatmul.mubr.f32.gmra.mrb[172].mxu0 %v8728_v13  ;;  %5545 = vmatmul.mubr.f32.gmra.mrb[176].mxu1 %v10946_v31  ;;  %v8126_v40 = vpack.c.bf16 %v7446_v44, %v7445_v50  ;;  %v7407_v44 = vld [vmem:[%s12428_s3 + $0x4c0] sm:$0xff] }
 0x3b1   :  { %7344 = vmatprep.mubr.msk.f32.mxu0 %vm3422_vm4, %v11098_v3  ;;  %7384 = vmatprep.mubr.msk.f32.mxu1 %vm3422_vm4, %v11242_v0  ;;  %v7406_v29 = vld [vmem:[%s12428_s3 + $0x4b8] sm:$0xff]  ;;  %v7447_v3 = vld [vmem:[%s12428_s3 + $0x560] sm:$0xff] }
 0x3b2   :  { %8090 = vmatpush1.bf16.msra.mxu0 %v8089_v9  ;;  %8124 = vmatpush1.bf16.msra.mxu1 %v8123_v27  ;;  %v8095_v50 = vpack.c.bf16 %v7406_v29, %v7405_v57 }
 0x3b3   :  { %v3932_v19 = vpop.f32.mrb[68].mxu0  ;;  %v4111_v1 = vpop.f32.mrb[72].mxu1  ;;  %8091 = vmatprep.subr.bf16.mxu0 %v12454_v62  ;;  %8125 = vmatprep.subr.bf16.mxu1 %v12454_v62 }
 0x3b4   :  { %v11513_v9 = vadd.f32 %v4101_v33, %v3932_v19  ;;  %v3934_v27 = vpop.f32.mrb[69].mxu0  ;;  %v4113_v38 = vpop.f32.mrb[73].mxu1  ;;  %5358 = vmatmul.mubr.f32.gmra.mrb[174].mxu0 %v11109_v14  ;;  %5550 = vmatmul.mubr.f32.gmra.mrb[178].mxu1 %v10968_v48  ;;  %v8129_v33 = vpack.c.bf16 %v7448_v34, %v7447_v3  ;;  %v7408_v14 = vld [vmem:[%s12428_s3 + $0x4c8] sm:$0xff]  ;;  %v7409_v34 = vld [vmem:[%s12428_s3 + $0x4d0] sm:$0xff] }
 0x3b5   :  { %7345 = vmatprep.mubr.msk.f32.mxu0 %vm3422_vm4, %v11114_v56  ;;  %7385 = vmatprep.mubr.msk.f32.mxu1 %vm3422_vm4, %v11268_v24  ;;  %v7449_v56 = vld [vmem:[%s12428_s3 + $0x570] sm:$0xff]  ;;  %v8098_v3 = vpack.c.bf16 %v7408_v14, %v7407_v44 }
 0x3b6   :  { %8093 = vmatpush1.bf16.msra.mxu0 %v8092_v25  ;;  %8127 = vmatpush1.bf16.msra.mxu1 %v8126_v40  ;;  %v7450_v25 = vld [vmem:[%s12428_s3 + $0x578] sm:$0xff] }
 0x3b7   :  { %v3937_v13 = vpop.f32.mrb[70].mxu0  ;;  %v4116_v19 = vpop.f32.mrb[74].mxu1  ;;  %8094 = vmatprep.subr.bf16.mxu0 %v12454_v62  ;;  %8128 = vmatprep.subr.bf16.mxu1 %v12454_v62 }
 0x3b8   :  { %v11535_v57 = vadd.f32 %v4106_v60, %v3937_v13  ;;  %v3939_v40 = vpop.f32.mrb[71].mxu0  ;;  %v4118_v29 = vpop.f32.mrb[75].mxu1  ;;  %5363 = vmatmul.mubr.f32.gmra.mrb[176].mxu0 %v11132_v30  ;;  %5555 = vmatmul.mubr.f32.gmra.mrb[180].mxu1 %v10990_v54  ;;  %v8132_v60 = vpack.c.bf16 %v7450_v25, %v7449_v56  ;;  %v7410_v30 = vld [vmem:[%s12428_s3 + $0x4d8] sm:$0xff]  ;;  %v7411_v56 = vld [vmem:[%s12428_s3 + $0x4e0] sm:$0xff] }
 0x3b9   :  { %7346 = vmatprep.mubr.msk.f32.mxu0 %vm3422_vm4, %v11139_v42  ;;  %7386 = vmatprep.mubr.msk.f32.mxu1 %vm3422_vm4, %v11294_v59  ;;  %v7451_v42 = vld [vmem:[%s12428_s3 + $0x580] sm:$0xff]  ;;  %v8101_v14 = vpack.c.bf16 %v7410_v30, %v7409_v34  ;;  %v7454_v29 = vld [vmem:[%s12428_s3 + $0x598] sm:$0xf] }
 0x3ba   :  { %8096 = vmatpush1.bf16.msra.mxu0 %v8095_v50  ;;  %8130 = vmatpush1.bf16.msra.mxu1 %v8129_v33  ;;  %v7452_v50 = vld [vmem:[%s12428_s3 + $0x588] sm:$0xff] }
 0x3bb   :  { %v3942_v27 = vpop.f32.mrb[72].mxu0  ;;  %v4121_v38 = vpop.f32.mrb[76].mxu1  ;;  %8097 = vmatprep.subr.bf16.mxu0 %v12454_v62  ;;  %8131 = vmatprep.subr.bf16.mxu1 %v12454_v62 }
 0x3bc   :  { %v11557_v44 = vadd.f32 %v4111_v1, %v3942_v27  ;;  %v3944_v33 = vpop.f32.mrb[73].mxu0  ;;  %v4123_v13 = vpop.f32.mrb[77].mxu1  ;;  %5368 = vmatmul.mubr.f32.gmra.mrb[178].mxu0 %v10874_v21  ;;  %5560 = vmatmul.mubr.f32.gmra.mrb[182].mxu1 %v11309_v20  ;;  %v8135_v1 = vpack.c.bf16 %v7452_v50, %v7451_v42  ;;  %v7412_v21 = vld [vmem:[%s12428_s3 + $0x4e8] sm:$0xff] }
 0x3bd   :  { %7347 = vmatprep.mubr.msk.f32.mxu0 %vm3422_vm4, %v11164_v53  ;;  %7387 = vmatprep.mubr.msk.f32.mxu1 %vm3422_vm4, %v11314_v4  ;;  %v7453_v53 = vld [vmem:[%s12428_s3 + $0x590] sm:$0xff]  ;;  %v8104_v27 = vpack.c.bf16 %v7412_v21, %v7411_v56  ;;  %v11601_v56 = vld [vmem:[#allocation3 + $0xd8] sm:$0xff]  ;;  %v7416_v21 = vld [vmem:[%s12428_s3 + $0x508] sm:$0xf] }
 0x3be   :  { %8099 = vmatpush1.bf16.msra.mxu0 %v8098_v3  ;;  %8133 = vmatpush1.bf16.msra.mxu1 %v8132_v60  ;;  %v8138_v30 = vpack.c.bf16 %v7454_v29, %v7453_v53 }
 0x3bf   :  { %v3947_v25 = vpop.f32.mrb[74].mxu0  ;;  %v4126_v40 = vpop.f32.mrb[78].mxu1  ;;  %8100 = vmatprep.subr.bf16.mxu0 %v12454_v62  ;;  %8134 = vmatprep.subr.bf16.mxu1 %v12454_v62 }
 0x3c0   :  { %v11579_v3 = vadd.f32 %v4116_v19, %v3947_v25  ;;  %v3949_v34 = vpop.f32.mrb[75].mxu0  ;;  %v4128_v60 = vpop.f32.mrb[79].mxu1  ;;  %5373 = vmatmul.mubr.f32.gmra.mrb[180].mxu0 %v10900_v32  ;;  %5565 = vmatmul.mubr.f32.gmra.mrb[184].mxu1 %v11331_v7  ;;  %v7413_v32 = vld [vmem:[%s12428_s3 + $0x4f0] sm:$0xff]  ;;  %v7414_v19 = vld [vmem:[%s12428_s3 + $0x4f8] sm:$0xff] }
 0x3c1   :  { %7348 = vmatprep.mubr.msk.f32.mxu0 %vm3422_vm4, %v11190_v8  ;;  %7388 = vmatprep.mubr.msk.f32.mxu1 %vm3422_vm4, %v11336_v35  ;;  %v11621_v60 = vld [vmem:[#allocation3 + $0xe8] sm:$0xff] }
 0x3c2   :  { %8102 = vmatpush1.bf16.msra.mxu0 %v8101_v14  ;;  %8136 = vmatpush1.bf16.msra.mxu1 %v8135_v1  ;;  %v8107_v1 = vpack.c.bf16 %v7414_v19, %v7413_v32  ;;  %v11632_v19 = vld [vmem:[#allocation3 + $0xf8] sm:$0xff] }
 0x3c3   :  { %v3952_v42 = vpop.f32.mrb[76].mxu0  ;;  %v4131_v50 = vpop.f32.mrb[80].mxu1  ;;  %8103 = vmatprep.subr.bf16.mxu0 %v12454_v62  ;;  %8137 = vmatprep.subr.bf16.mxu1 %v12454_v62 }
 0x3c4   :  { %v11595_v33 = vadd.f32 %v4121_v38, %v3952_v42  ;;  %v3954_v13 = vpop.f32.mrb[77].mxu0  ;;  %v4133_v14 = vpop.f32.mrb[81].mxu1  ;;  %5378 = vmatmul.mubr.f32.gmra.mrb[182].mxu0 %v10923_v16  ;;  %5570 = vmatmul.mubr.f32.gmra.mrb[186].mxu1 %v11344_v58  ;;  %v7415_v16 = vld [vmem:[%s12428_s3 + $0x500] sm:$0xff] }
 0x3c5   :  { %7349 = vmatprep.mubr.msk.f32.mxu0 %vm3422_vm4, %v11216_v37  ;;  %7389 = vmatprep.mubr.msk.f32.mxu1 %vm3422_vm4, %v11601_v56 }
 0x3c6   :  { %8105 = vmatpush1.bf16.msra.mxu0 %v8104_v27  ;;  %8140 = vmatpush1.bf16.msk.msra.mxu1 %vm10209_vm3, %v8138_v30  ;;  %v8110_v27 = vpack.c.bf16 %v7416_v21, %v7415_v16 }
 0x3c7   :  { %v3957_v38 = vpop.f32.mrb[78].mxu0  ;;  %v4136_v25 = vpop.f32.mrb[82].mxu1  ;;  %8106 = vmatprep.subr.bf16.mxu0 %v12454_v62  ;;  %8159 = vmatprep.subr.bf16.mxu1 %v12454_v62 }
 0x3c8   :  { %v11615_v53 = vadd.f32 %v4126_v40, %v3957_v38  ;;  %v3959_v29 = vpop.f32.mrb[79].mxu0  ;;  %v4138_v34 = vpop.f32.mrb[83].mxu1  ;;  %5383 = vmatmul.mubr.f32.gmra.mrb[184].mxu0 %v10946_v31  ;;  %5575 = vmatmul.mubr.f32.gmra.mrb[188].mxu1 %v11357_v61  ;;  %v11645_v38 = vld [vmem:[#allocation3 + $0x108] sm:$0xff] }
 0x3c9   :  { %7350 = vmatprep.mubr.msk.f32.mxu0 %vm3422_vm4, %v11242_v0  ;;  %7390 = vmatprep.mubr.msk.f32.mxu1 %vm3422_vm4, %v11621_v60 }
 0x3ca   :  { %8108 = vmatpush1.bf16.msra.mxu0 %v8107_v1 }
 0x3cb   :  { %v3962_v30 = vpop.f32.mrb[80].mxu0  ;;  %v4141_v42 = vpop.f32.mrb[84].mxu1  ;;  %8109 = vmatprep.subr.bf16.mxu0 %v12454_v62 }
 0x3cc   :  { %v11626_v40 = vadd.f32 %v4131_v50, %v3962_v30  ;;  %v3964_v32 = vpop.f32.mrb[81].mxu0  ;;  %v4143_v31 = vpop.f32.mrb[85].mxu1  ;;  %5388 = vmatmul.mubr.f32.gmra.mrb[186].mxu0 %v10968_v48  ;;  %5580 = vmatmul.mubr.f32.gmra.mrb[190].mxu1 %v11365_v10 }
 0x3cd   :  { %7351 = vmatprep.mubr.msk.f32.mxu0 %vm3422_vm4, %v11268_v24  ;;  %7391 = vmatprep.mubr.msk.f32.mxu1 %vm3422_vm4, %v11632_v19  ;;  %v11665_v31 = vld [vmem:[#allocation3 + $0x128] sm:$0xff] }
 0x3ce   :  { %8112 = vmatpush1.bf16.msk.msra.mxu0 %vm10209_vm3, %v8110_v27 }
 0x3cf   :  { %v3967_v13 = vpop.f32.mrb[82].mxu0  ;;  %v4146_v50 = vpop.f32.mrb[86].mxu1  ;;  %8141 = vmatprep.subr.bf16.mxu0 %v12454_v62 }
 0x3d0   :  { %v11639_v14 = vadd.f32 %v4136_v25, %v3967_v13  ;;  %v3969_v48 = vpop.f32.mrb[83].mxu0  ;;  %v4148_v1 = vpop.f32.mrb[87].mxu1  ;;  %5393 = vmatmul.mubr.f32.gmra.mrb[188].mxu0 %v10990_v54  ;;  %5585 = vmatmul.mubr.f32.gmra.mrb[192].mxu1 %v11328_v45  ;;  %v11655_v54 = vld [vmem:[#allocation3 + $0x118] sm:$0xff] }
 0x3d1   :  { %7352 = vmatprep.mubr.msk.f32.mxu0 %vm3422_vm4, %v11294_v59  ;;  %7392 = vmatprep.mubr.msk.f32.mxu1 %vm3422_vm4, %v11645_v38 }
 0x3d3   :  { %v3972_v11 = vpop.f32.mrb[84].mxu0  ;;  %v4151_v16 = vpop.f32.mrb[88].mxu1 }
 0x3d4   :  { %v11649_v21 = vadd.f32 %v4141_v42, %v3972_v11  ;;  %v3974_v25 = vpop.f32.mrb[85].mxu0  ;;  %v4153_v29 = vpop.f32.mrb[89].mxu1  ;;  %5398 = vmatmul.mubr.f32.gmra.mrb[190].mxu0 %v11309_v20  ;;  %5590 = vmatmul.mubr.f32.gmra.mrb[194].mxu1 %v11341_v15 }
 0x3d5   :  { %7353 = vmatprep.mubr.msk.f32.mxu0 %vm3422_vm4, %v11314_v4  ;;  %7393 = vmatprep.mubr.msk.f32.mxu1 %vm3422_vm4, %v11655_v54  ;;  %v11675_v25 = vld [vmem:[#allocation3 + $0x138] sm:$0xff] }
 0x3d7   :  { %v3977_v34 = vpop.f32.mrb[86].mxu0  ;;  %v4156_v27 = vpop.f32.mrb[90].mxu1 }
 0x3d8   :  { %v11659_v30 = vadd.f32 %v4146_v50, %v3977_v34  ;;  %v3979_v42 = vpop.f32.mrb[87].mxu0  ;;  %v4158_v32 = vpop.f32.mrb[91].mxu1  ;;  %5403 = vmatmul.mubr.f32.gmra.mrb[192].mxu0 %v11331_v7  ;;  %5595 = vmatmul.mubr.f32.gmra.mrb[196].mxu1 %v11354_v49 }
 0x3d9   :  { %7354 = vmatprep.mubr.msk.f32.mxu0 %vm3422_vm4, %v11336_v35  ;;  %7394 = vmatprep.mubr.msk.f32.mxu1 %vm3422_vm4, %v11665_v31 }
 0x3da   :  { %12455 = vst [vmem:[#allocation14_spill] sm:$0xff] %v11659_v30 }
 0x3db   :  { %v3982_v13 = vpop.f32.mrb[88].mxu0  ;;  %v4161_v48 = vpop.f32.mrb[92].mxu1 }
 0x3dc   :  { %v11669_v1 = vadd.f32 %v4151_v16, %v3982_v13  ;;  %v3984_v50 = vpop.f32.mrb[89].mxu0  ;;  %v4163_v11 = vpop.f32.mrb[93].mxu1  ;;  %5408 = vmatmul.mubr.f32.gmra.mrb[194].mxu0 %v11344_v58  ;;  %5600 = vmatmul.mubr.f32.gmra.mrb[198].mxu1 %v11391_v12  ;;  %v11682_v13 = vld [vmem:[#allocation3 + $0x130] sm:$0xff] }
 0x3dd   :  { %7355 = vmatprep.mubr.msk.f32.mxu0 %vm3422_vm4, %v11601_v56  ;;  %7395 = vmatprep.mubr.msk.f32.mxu1 %vm3422_vm4, %v11675_v25  ;;  %v11687_v50 = vld [vmem:[#allocation3 + $0x148] sm:$0xff] }
 0x3de   :  { %12456 = vst [vmem:[#allocation15_spill] sm:$0xff] %v11669_v1 }
 0x3df   :  { %v3987_v29 = vpop.f32.mrb[90].mxu0  ;;  %v4644_v34 = vpop.f32.mrb[94].mxu1 }
 0x3e0   :  { %v11679_v42 = vadd.f32 %v4156_v27, %v3987_v29  ;;  %v3989_v16 = vpop.f32.mrb[91].mxu0  ;;  %v4646_v32 = vpop.f32.mrb[95].mxu1  ;;  %5413 = vmatmul.mubr.f32.gmra.mrb[196].mxu0 %v11357_v61  ;;  %5605 = vmatmul.mubr.f32.gmra.mrb[200].mxu1 %v11682_v13 }
 0x3e1   :  { %7356 = vmatprep.mubr.msk.f32.mxu0 %vm3422_vm4, %v11621_v60  ;;  %7396 = vmatprep.mubr.msk.f32.mxu1 %vm3422_vm4, %v11687_v50  ;;  %v11694_v32 = vld [vmem:[#allocation3 + $0x140] sm:$0xff] }
 0x3e2   :  { %12457 = vst [vmem:[#allocation16_spill] sm:$0xff] %v11679_v42 }
 0x3e3   :  { %v3992_v11 = vpop.f32.mrb[92].mxu0  ;;  %v4649_v62 = vpop.f32.mrb[96].mxu1 }
 0x3e4   :  { %v11691_v27 = vadd.f32 %v4161_v48, %v3992_v11  ;;  %v3994_v29 = vpop.f32.mrb[93].mxu0  ;;  %v4651_v16 = vpop.f32.mrb[97].mxu1  ;;  %5418 = vmatmul.mubr.f32.gmra.mrb[198].mxu0 %v11365_v10  ;;  %5610 = vmatmul.mubr.f32.gmra.mrb[202].mxu1 %v11694_v32 }
 0x3e5   :  { %7357 = vmatprep.mubr.msk.f32.mxu0 %vm3422_vm4, %v11632_v19  ;;  %7397 = vmatprep.mubr.msk.f32.mxu1 %vm3422_vm4, %v11058_v28  ;;  %v11703_v29 = vld [vmem:[#allocation3 + $0x150] sm:$0xff] }
 0x3e6   :  { %12458 = vst [vmem:[#allocation17_spill] sm:$0xff] %v11691_v27 }
 0x3e7   :  { %v4348_v42 = vpop.f32.mrb[94].mxu0  ;;  %v4654_v1 = vpop.f32.mrb[98].mxu1 }
 0x3e8   :  { %v4442_v30 = vadd.f32 %v4348_v42, %v11398_v23  ;;  %v4350_v48 = vpop.f32.mrb[95].mxu0  ;;  %v4656_v11 = vpop.f32.mrb[99].mxu1  ;;  %5423 = vmatmul.mubr.f32.gmra.mrb[200].mxu0 %v11328_v45  ;;  %5615 = vmatmul.mubr.f32.gmra.mrb[204].mxu1 %v11703_v29 }
 0x3e9   :  { %7358 = vmatprep.mubr.msk.f32.mxu0 %vm3422_vm4, %v11645_v38  ;;  %7398 = vmatprep.mubr.msk.f32.mxu1 %vm3422_vm4, %v11066_v63  ;;  %v11714_v11 = vld [vmem:[#allocation3 + $0x160] sm:$0xff] }
 0x3ea   :  { %v11710_v16 = vadd.f32 %v4644_v34, %v4442_v30 }
 0x3eb   :  { %v4353_v28 = vpop.f32.mrb[96].mxu0  ;;  %v4659_v27 = vpop.f32.mrb[100].mxu1 }
 0x3ec   :  { %v4443_v23 = vadd.f32 %v4353_v28, %v11412_v22  ;;  %v4355_v42 = vpop.f32.mrb[97].mxu0  ;;  %v4661_v48 = vpop.f32.mrb[101].mxu1  ;;  %5428 = vmatmul.mubr.f32.gmra.mrb[202].mxu0 %v11341_v15  ;;  %5620 = vmatmul.mubr.f32.gmra.mrb[206].mxu1 %v11714_v11 }
 0x3ed   :  { %7359 = vmatprep.mubr.msk.f32.mxu0 %vm3422_vm4, %v11655_v54  ;;  %7456 = vmatprep.mubr.msk.f32.mxu1 %vm3422_vm4, %v11135_v39 }
 0x3ee   :  { %v11721_v63 = vadd.f32 %v4649_v62, %v4443_v23 }
 0x3ef   :  { %v4358_v30 = vpop.f32.mrb[98].mxu0  ;;  %v4664_v34 = vpop.f32.mrb[102].mxu1 }
 0x3f0   :  { %12459 = vst [vmem:[#allocation18_spill] sm:$0xff] %v11721_v63  ;;  %v4444_v22 = vadd.f32 %v4358_v30, %v11428_v17  ;;  %v4360_v28 = vpop.f32.mrb[99].mxu0  ;;  %v4666_v42 = vpop.f32.mrb[103].mxu1  ;;  %5433 = vmatmul.mubr.f32.gmra.mrb[204].mxu0 %v11354_v49  ;;  %5932 = vmatmul.mubr.f32.vlgmr.msra.gmra.mrb[208].mxu1 %v11143_v46 }
 0x3f1   :  { %7360 = vmatprep.mubr.msk.f32.mxu0 %vm3422_vm4, %v11665_v31  ;;  %7457 = vmatprep.mubr.msk.f32.mxu1 %vm3422_vm4, %v11160_v36  ;;  %v8742_v42 = vld [vmem:[#allocation3 + $0x70] sm:$0xff] }
 0x3f2   :  { %v11730_v48 = vadd.f32 %v4654_v1, %v4444_v22 }
 0x3f3   :  { %v4363_v39 = vpop.f32.mrb[100].mxu0  ;;  %v4669_v62 = vpop.f32.mrb[104].mxu1 }
 0x3f4   :  { %v4445_v23 = vadd.f32 %v4363_v39, %v11451_v5  ;;  %v4365_v63 = vpop.f32.mrb[101].mxu0  ;;  %v4671_v17 = vpop.f32.mrb[105].mxu1  ;;  %5438 = vmatmul.mubr.f32.gmra.mrb[206].mxu0 %v11391_v12  ;;  %5937 = vmatmul.mubr.f32.gmra.mrb[210].mxu1 %v11168_v6 }
 0x3f5   :  { %7418 = vmatprep.mubr.msk.f32.mxu0 %vm3422_vm4, %v11190_v8  ;;  %7458 = vmatprep.mubr.msk.f32.mxu1 %vm3422_vm4, %v11186_v47  ;;  %v8741_v63 = vld [vmem:[#allocation3 + $0x60] sm:$0xff] }
 0x3f6   :  { %v11739_v46 = vadd.f32 %v4659_v27, %v4445_v23  ;;  %v8743_v23 = vld [vmem:[#allocation3 + $0x80] sm:$0xff] }
 0x3f7   :  { %v4368_v36 = vpop.f32.mrb[102].mxu0  ;;  %v4674_v1 = vpop.f32.mrb[106].mxu1 }
 0x3f8   :  { %v4446_v30 = vadd.f32 %v4368_v36, %v11472_v55  ;;  %v4370_v22 = vpop.f32.mrb[103].mxu0  ;;  %v4676_v5 = vpop.f32.mrb[107].mxu1  ;;  %5731 = vmatmul.mubr.f32.vlgmr.msra.gmra.mrb[208].mxu0 %v8741_v63  ;;  %5942 = vmatmul.mubr.f32.gmra.mrb[212].mxu1 %v11194_v26  ;;  %v8744_v36 = vld [vmem:[#allocation3 + $0x90] sm:$0xff]  ;;  %v12462_v63 = vld [vmem:[#allocation11_spill] sm:$0xff] }
 0x3f9   :  { %7419 = vmatprep.mubr.msk.f32.mxu0 %vm3422_vm4, %v11216_v37  ;;  %7459 = vmatprep.mubr.msk.f32.mxu1 %vm3422_vm4, %v11212_v51 }
 0x3fa   :  { %v11747_v6 = vadd.f32 %v4664_v34, %v4446_v30  ;;  %v12460_v30 = vld [vmem:[#allocation9_spill] sm:$0xff] }
 0x3fb   :  { %v4373_v47 = vpop.f32.mrb[104].mxu0  ;;  %v4679_v8 = vpop.f32.mrb[108].mxu1 }
 0x3fc   :  { %v4447_v27 = vadd.f32 %v4373_v47, %v11492_v43  ;;  %v4375_v28 = vpop.f32.mrb[105].mxu0  ;;  %v4681_v55 = vpop.f32.mrb[109].mxu1  ;;  %5736 = vmatmul.mubr.f32.gmra.mrb[210].mxu0 %v8742_v42  ;;  %5947 = vmatmul.mubr.f32.gmra.mrb[214].mxu1 %v11220_v18 }
 0x3fd   :  { %7420 = vmatprep.mubr.msk.f32.mxu0 %vm3422_vm4, %v11242_v0  ;;  %7460 = vmatprep.mubr.msk.f32.mxu1 %vm3422_vm4, %v11238_v41 }
 0x3fe   :  { %v11755_v26 = vadd.f32 %v4669_v62, %v4447_v27 }
 0x3ff   :  { %v4378_v51 = vpop.f32.mrb[106].mxu0  ;;  %v4684_v37 = vpop.f32.mrb[110].mxu1 }
 0x400   :  { %v4448_v34 = vadd.f32 %v4378_v51, %v11513_v9  ;;  %v4380_v39 = vpop.f32.mrb[107].mxu0  ;;  %v4686_v43 = vpop.f32.mrb[111].mxu1  ;;  %5741 = vmatmul.mubr.f32.gmra.mrb[212].mxu0 %v8743_v23  ;;  %5952 = vmatmul.mubr.f32.gmra.mrb[216].mxu1 %v11246_v2  ;;  %v12461_v2 = vld [vmem:[#allocation10_spill] sm:$0xff] }
 0x401   :  { %7421 = vmatprep.mubr.msk.f32.mxu0 %vm3422_vm4, %v11268_v24  ;;  %7461 = vmatprep.mubr.msk.f32.mxu1 %vm3422_vm4, %v11264_v52 }
 0x402   :  { %v11763_v18 = vadd.f32 %v4674_v1, %v4448_v34 }
 0x403   :  { %v4383_v41 = vpop.f32.mrb[108].mxu0  ;;  %v4689_v0 = vpop.f32.mrb[112].mxu1 }
 0x404   :  { %v4449_v62 = vadd.f32 %v4383_v41, %v11535_v57  ;;  %v4385_v17 = vpop.f32.mrb[109].mxu0  ;;  %v4691_v9 = vpop.f32.mrb[113].mxu1  ;;  %5746 = vmatmul.mubr.f32.gmra.mrb[214].mxu0 %v8744_v36  ;;  %5957 = vmatmul.mubr.f32.gmra.mrb[218].mxu1 %v12460_v30 }
 0x405   :  { %7422 = vmatprep.mubr.msk.f32.mxu0 %vm3422_vm4, %v11294_v59  ;;  %7462 = vmatprep.mubr.msk.f32.mxu1 %vm3422_vm4, %v12461_v2 }
 0x406   :  { %v11771_v24 = vadd.f32 %v4679_v8, %v4449_v62 }
 0x407   :  { %v4388_v52 = vpop.f32.mrb[110].mxu0  ;;  %v4694_v1 = vpop.f32.mrb[114].mxu1 }
 0x408   :  { %v4450_v22 = vadd.f32 %v4388_v52, %v11557_v44  ;;  %v4390_v5 = vpop.f32.mrb[111].mxu0  ;;  %v4696_v57 = vpop.f32.mrb[115].mxu1  ;;  %5751 = vmatmul.mubr.f32.gmra.mrb[216].mxu0 %v11309_v20  ;;  %5962 = vmatmul.mubr.f32.gmra.mrb[220].mxu1 %v12462_v63 }
 0x409   :  { %7423 = vmatprep.mubr.msk.f32.mxu0 %vm3422_vm4, %v11314_v4  ;;  %7463 = vmatprep.mubr.msk.f32.mxu1 %vm3422_vm4, %v11632_v19 }
 0x40a   :  { %v11780_v59 = vadd.f32 %v4684_v37, %v4450_v22 }
 0x40b   :  { %v4393_v47 = vpop.f32.mrb[112].mxu0  ;;  %v4699_v8 = vpop.f32.mrb[116].mxu1 }
 0x40c   :  { %v4451_v27 = vadd.f32 %v4393_v47, %v11579_v3  ;;  %v4395_v28 = vpop.f32.mrb[113].mxu0  ;;  %v4701_v44 = vpop.f32.mrb[117].mxu1  ;;  %5756 = vmatmul.mubr.f32.gmra.mrb[218].mxu0 %v11331_v7  ;;  %5967 = vmatmul.mubr.f32.gmra.mrb[222].mxu1 %v11328_v45  ;;  %v12464_v47 = vld [vmem:[#allocation15_spill] sm:$0xff] }
 0x40d   :  { %7424 = vmatprep.mubr.msk.f32.mxu0 %vm3422_vm4, %v11336_v35  ;;  %7464 = vmatprep.mubr.msk.f32.mxu1 %vm3422_vm4, %v11645_v38 }
 0x40e   :  { %v11789_v20 = vadd.f32 %v4689_v0, %v4451_v27 }
 0x40f   :  { %v4398_v4 = vpop.f32.mrb[114].mxu0  ;;  %v4704_v55 = vpop.f32.mrb[118].mxu1 }
 0x410   :  { %v4452_v42 = vadd.f32 %v4398_v4, %v11595_v33  ;;  %v4400_v51 = vpop.f32.mrb[115].mxu0  ;;  %v4706_v3 = vpop.f32.mrb[119].mxu1  ;;  %5761 = vmatmul.mubr.f32.gmra.mrb[220].mxu0 %v11344_v58  ;;  %5972 = vmatmul.mubr.f32.gmra.mrb[224].mxu1 %v11341_v15 }
 0x411   :  { %7425 = vmatprep.mubr.msk.f32.mxu0 %vm3422_vm4, %v11601_v56  ;;  %7465 = vmatprep.mubr.msk.f32.mxu1 %vm3422_vm4, %v11655_v54 }
 0x412   :  { %v11798_v7 = vadd.f32 %v4694_v1, %v4452_v42  ;;  %v12463_v1 = vld [vmem:[#allocation14_spill] sm:$0xff] }
 0x413   :  { %v4403_v35 = vpop.f32.mrb[116].mxu0  ;;  %v4709_v37 = vpop.f32.mrb[120].mxu1 }
 0x414   :  { %v4453_v34 = vadd.f32 %v4403_v35, %v11615_v53  ;;  %v4405_v39 = vpop.f32.mrb[117].mxu0  ;;  %v4711_v33 = vpop.f32.mrb[121].mxu1  ;;  %5766 = vmatmul.mubr.f32.gmra.mrb[222].mxu0 %v11357_v61  ;;  %5977 = vmatmul.mubr.f32.gmra.mrb[226].mxu1 %v11354_v49 }
 0x415   :  { %7426 = vmatprep.mubr.msk.f32.mxu0 %vm3422_vm4, %v11621_v60  ;;  %7466 = vmatprep.mubr.msk.f32.mxu1 %vm3422_vm4, %v11665_v31  ;;  %v12466_v39 = vld [vmem:[#allocation17_spill] sm:$0xff] }
 0x416   :  { %v11807_v58 = vadd.f32 %v4699_v8, %v4453_v34 }
 0x417   :  { %v4408_v56 = vpop.f32.mrb[118].mxu0  ;;  %v4714_v43 = vpop.f32.mrb[122].mxu1 }
 0x418   :  { %v4454_v23 = vadd.f32 %v4408_v56, %v11626_v40  ;;  %v4410_v41 = vpop.f32.mrb[119].mxu0  ;;  %v4716_v53 = vpop.f32.mrb[123].mxu1  ;;  %5771 = vmatmul.mubr.f32.gmra.mrb[224].mxu0 %v11365_v10  ;;  %5982 = vmatmul.mubr.f32.gmra.mrb[228].mxu1 %v11391_v12 }
 0x419   :  { %7427 = vmatprep.mubr.msk.f32.mxu0 %vm3422_vm4, %v11632_v19  ;;  %7467 = vmatprep.mubr.msk.f32.mxu1 %vm3422_vm4, %v11675_v25 }
 0x41a   :  { %v11816_v61 = vadd.f32 %v4704_v55, %v4454_v23  ;;  %v12465_v55 = vld [vmem:[#allocation16_spill] sm:$0xff] }
 0x41b   :  { %v4413_v60 = vpop.f32.mrb[120].mxu0  ;;  %v4719_v0 = vpop.f32.mrb[124].mxu1  ;;  %v12467_v23 = vld [vmem:[#allocation12_spill] sm:$0xff] }
 0x41c   :  { %v4455_v62 = vadd.f32 %v4413_v60, %v11639_v14  ;;  %v4415_v17 = vpop.f32.mrb[121].mxu0  ;;  %v4721_v40 = vpop.f32.mrb[125].mxu1  ;;  %5776 = vmatmul.mubr.f32.gmra.mrb[226].mxu0 %v11328_v45  ;;  %5987 = vmatmul.mubr.f32.gmra.mrb[230].mxu1 %v11682_v13  ;;  %v8745_v45 = vld [vmem:[#allocation3 + $0x158] sm:$0xff] }
 0x41d   :  { %7428 = vmatprep.mubr.msk.f32.mxu0 %vm3422_vm4, %v11645_v38  ;;  %7468 = vmatprep.mubr.msk.f32.mxu1 %vm3422_vm4, %v11687_v50  ;;  %v7475_v17 = vld [vmem:[%s12430_s5 + $0x68] sm:$0xff]  ;;  %v7476_v40 = vld [vmem:[%s12430_s5 + $0x70] sm:$0xff] }
 0x41e   :  { %v11825_v10 = vadd.f32 %v4709_v37, %v4455_v62 }
 0x41f   :  { %v4418_v19 = vpop.f32.mrb[122].mxu0  ;;  %v4724_v9 = vpop.f32.mrb[126].mxu1 }
 0x420   :  { %v4456_v36 = vadd.f32 %v4418_v19, %v11649_v21  ;;  %v4420_v30 = vpop.f32.mrb[123].mxu0  ;;  %v4726_v14 = vpop.f32.mrb[127].mxu1  ;;  %5781 = vmatmul.mubr.f32.gmra.mrb[228].mxu0 %v11341_v15  ;;  %5992 = vmatmul.mubr.f32.gmra.mrb[232].mxu1 %v11694_v32  ;;  %v8746_v15 = vld [vmem:[#allocation3 + $0x168] sm:$0xff]  ;;  %v12468_v19 = vld [vmem:[#allocation13_spill] sm:$0xff] }
 0x421   :  { %7429 = vmatprep.mubr.msk.f32.mxu0 %vm3422_vm4, %v11655_v54  ;;  %7469 = vmatprep.mubr.msk.f32.mxu1 %vm3422_vm4, %v8745_v45 }
 0x422   :  { %v11833_v38 = vadd.f32 %v4714_v43, %v4456_v36 }
 0x423   :  { %v4423_v2 = vpop.f32.mrb[124].mxu0  ;;  %v4729_v52 = vpop.f32.mrb[128].mxu1 }
 0x424   :  { %v4457_v22 = vadd.f32 %v4423_v2, %v12463_v1  ;;  %v4425_v5 = vpop.f32.mrb[125].mxu0  ;;  %v4731_v21 = vpop.f32.mrb[129].mxu1  ;;  %5786 = vmatmul.mubr.f32.gmra.mrb[230].mxu0 %v11354_v49  ;;  %5997 = vmatmul.mubr.f32.gmra.mrb[234].mxu1 %v11703_v29  ;;  %v8747_v49 = vld [vmem:[#allocation3 + $0x178] sm:$0xff]  ;;  %v8752_v2 = vld [vmem:[#allocation3 + $0x1a0] sm:$0xff] }
 0x425   :  { %7430 = vmatprep.mubr.msk.f32.mxu0 %vm3422_vm4, %v11665_v31  ;;  %7470 = vmatprep.mubr.msk.f32.mxu1 %vm3422_vm4, %v8746_v15 }
 0x426   :  { %v11841_v54 = vadd.f32 %v4719_v0, %v4457_v22 }
 0x427   :  { %v4428_v57 = vpop.f32.mrb[126].mxu0  ;;  %v4734_v63 = vpop.f32.mrb[130].mxu1 }
 0x428   :  { %v4458_v8 = vadd.f32 %v4428_v57, %v12464_v47  ;;  %v4430_v27 = vpop.f32.mrb[127].mxu0  ;;  %v4736_v28 = vpop.f32.mrb[131].mxu1  ;;  %5791 = vmatmul.mubr.f32.gmra.mrb[232].mxu0 %v11391_v12  ;;  %6002 = vmatmul.mubr.f32.gmra.mrb[236].mxu1 %v11714_v11  ;;  %v8748_v12 = vld [vmem:[#allocation3 + $0x170] sm:$0xff] }
 0x429   :  { %7431 = vmatprep.mubr.msk.f32.mxu0 %vm3422_vm4, %v11675_v25  ;;  %7471 = vmatprep.mubr.msk.f32.mxu1 %vm3422_vm4, %v8747_v49  ;;  %v8749_v25 = vld [vmem:[#allocation3 + $0x188] sm:$0xff]  ;;  %v7477_v27 = vld [vmem:[%s12430_s5 + $0x78] sm:$0xff] }
 0x42a   :  { %v11849_v31 = vadd.f32 %v4724_v9, %v4458_v8 }
 0x42b   :  { %v4433_v44 = vpop.f32.mrb[128].mxu0  ;;  %v11851_v4 = vpop.f32.mrb[132].mxu1 }
 0x42c   :  { %v4459_v42 = vadd.f32 %v4433_v44, %v12465_v55  ;;  %v4435_v51 = vpop.f32.mrb[129].mxu0  ;;  %v5188_v3 = vpop.f32.mrb[133].mxu1  ;;  %5796 = vmatmul.mubr.f32.gmra.mrb[234].mxu0 %v11682_v13  ;;  %6007 = vmatmul.mubr.f32.gmra.mrb[238].mxu1 %v8748_v12  ;;  %v8750_v13 = vld [vmem:[#allocation3 + $0x180] sm:$0xff] }
 0x42d   :  { %7432 = vmatprep.mubr.msk.f32.mxu0 %vm3422_vm4, %v11687_v50  ;;  %7472 = vmatprep.mubr.msk.f32.mxu1 %vm3422_vm4, %v8749_v25 }
 0x42e   :  { %v11858_v35 = vadd.f32 %v4729_v52, %v4459_v42  ;;  %v12470_v52 = vmov 0.0|0.0  }
 0x42f   :  { %v4438_v37 = vpop.f32.mrb[130].mxu0  ;;  %v11860_v34 = vpop.f32.mrb[134].mxu1 }
 0x430   :  { %v4460_v33 = vadd.f32 %v4438_v37, %v12466_v39  ;;  %v4440_v56 = vpop.f32.mrb[131].mxu0  ;;  %v5193_v43 = vpop.f32.mrb[135].mxu1  ;;  %5801 = vmatmul.mubr.f32.gmra.mrb[236].mxu0 %v11694_v32  ;;  %6012 = vmatmul.mubr.f32.gmra.mrb[240].mxu1 %v8750_v13  ;;  %v8751_v32 = vld [vmem:[#allocation3 + $0x190] sm:$0xff] }
 0x431   :  { %7433 = vmatprep.mubr.msk.f32.mxu0 %vm3422_vm4, %v8745_v45  ;;  %7473 = vmatprep.mubr.msk.f32.mxu1 %vm3422_vm4, %v12467_v23 }
 0x432   :  { %v11867_v50 = vadd.f32 %v4734_v63, %v4460_v33 }
 0x433   :  { %v4940_v41 = vpop.f32.mrb[132].mxu0  ;;  %v11869_v53 = vpop.f32.mrb[136].mxu1 }
 0x434   :  { %v11872_v60 = vadd.f32 %v4940_v41, %v11710_v16  ;;  %v4942_v0 = vpop.f32.mrb[133].mxu0  ;;  %v5198_v62 = vpop.f32.mrb[137].mxu1  ;;  %5806 = vmatmul.mubr.f32.gmra.mrb[238].mxu0 %v11703_v29  ;;  %6017 = vmatmul.mubr.f32.gmra.mrb[242].mxu1 %v8751_v32  ;;  %v8142_v16 = vpack.c.bf16 %v7476_v40, %v7475_v17  ;;  %v12469_v29 = vld [vmem:[#allocation18_spill] sm:$0xff] }
 0x435   :  { %7434 = vmatprep.mubr.msk.f32.mxu0 %vm3422_vm4, %v8746_v15  ;;  %7474 = vmatprep.mubr.msk.f32.mxu1 %vm3422_vm4, %v12468_v19 }
 0x436   :  { %8143 = vmatpush3.bf16.msra.mxu0 %v8142_v16  ;;  %v6176_v16 = vld [vmem:[%s12430_s5 + $0x8] sm:$0xff] }
 0x437   :  { %v4945_v9 = vpop.f32.mrb[134].mxu0  ;;  %v11884_v36 = vpop.f32.mrb[138].mxu1  ;;  %8144 = vmatprep.subr.bf16.mxu0 %v12470_v52 }
 0x438   :  { %v11887_v30 = vadd.f32 %v4945_v9, %v12469_v29  ;;  %v4947_v14 = vpop.f32.mrb[135].mxu0  ;;  %v5203_v45 = vpop.f32.mrb[139].mxu1  ;;  %5811 = vmatmul.mubr.f32.gmra.mrb[240].mxu0 %v11714_v11  ;;  %6022 = vmatmul.mubr.f32.gmra.mrb[244].mxu1 %v8752_v2  ;;  %v6177_v2 = vld [vmem:[%s12430_s5 + $0x10] sm:$0xff] }
 0x439   :  { %7435 = vmatprep.mubr.msk.f32.mxu0 %vm3422_vm4, %v8747_v49 }
 0x43b   :  { %v4950_v1 = vpop.f32.mrb[136].mxu0  ;;  %v11892_v22 = vpop.f32.mrb[140].mxu1 }
 0x43c   :  { %v11895_v5 = vadd.f32 %v4950_v1, %v11730_v48  ;;  %v4952_v21 = vpop.f32.mrb[137].mxu0  ;;  %v5208_v15 = vpop.f32.mrb[141].mxu1  ;;  %5816 = vmatmul.mubr.f32.gmra.mrb[242].mxu0 %v8748_v12  ;;  %v7478_v48 = vld [vmem:[%s12430_s5 + $0x80] sm:$0xff]  ;;  %v6178_v1 = vld [vmem:[%s12430_s5 + $0x18] sm:$0xff] }
 0x43d   :  { %7436 = vmatprep.mubr.msk.f32.mxu0 %vm3422_vm4, %v8749_v25  ;;  %v8145_v28 = vpack.c.bf16 %v7478_v48, %v7477_v27  ;;  %v8163_v21 = vpack.c.bf16 %v6178_v1, %v6177_v2  ;;  %v7481_v2 = vld [vmem:[%s12430_s5 + $0x98] sm:$0xff]  ;;  %v7482_v1 = vld [vmem:[%s12430_s5 + $0xa0] sm:$0xff] }
 0x43f   :  { %v4955_v57 = vpop.f32.mrb[138].mxu0  ;;  %v11898_v63 = vpop.f32.mrb[142].mxu1  ;;  %8146 = vmatpush3.bf16.msra.mxu0 %v8145_v28 }
 0x440   :  { %v11901_v11 = vadd.f32 %v4955_v57, %v11739_v46  ;;  %v4957_v47 = vpop.f32.mrb[139].mxu0  ;;  %v5213_v8 = vpop.f32.mrb[143].mxu1  ;;  %5821 = vmatmul.mubr.f32.gmra.mrb[244].mxu0 %v8750_v13  ;;  %8147 = vmatprep.subr.bf16.mxu0 %v12470_v52 }
 0x441   :  { %v7480_v47 = vld [vmem:[%s12430_s5 + $0x90] sm:$0xff] }
 0x443   :  { %v4960_v49 = vpop.f32.mrb[140].mxu0  ;;  %v11909_v44 = vpop.f32.mrb[144].mxu1 }
 0x444   :  { %v11912_v55 = vadd.f32 %v4960_v49, %v11747_v6  ;;  %v4962_v46 = vpop.f32.mrb[141].mxu0  ;;  %v5218_v42 = vpop.f32.mrb[145].mxu1  ;;  %v6179_v49 = vld [vmem:[%s12430_s5 + $0x20] sm:$0xff] }
 0x445   :  { %v6180_v46 = vld [vmem:[%s12430_s5 + $0x28] sm:$0xff] }
 0x446   :  { %v8166_v42 = vpack.c.bf16 %v6180_v46, %v6179_v49  ;;  %v12471_v46 = vmov 0.0  }
 0x447   :  { %v4965_v51 = vpop.f32.mrb[142].mxu0  ;;  %v11915_v3 = vpop.f32.mrb[146].mxu1  ;;  %7674 = vmatprep.mubr.msk.f32.mxu1 %vm8780_vm5, %v12471_v46  ;;  %7645 = vmatprep.mubr.msk.f32.mxu0 %vm8780_vm5, %v12471_v46 }
 0x448   :  { %v11918_v12 = vadd.f32 %v4965_v51, %v11755_v26  ;;  %v4967_v25 = vpop.f32.mrb[143].mxu0  ;;  %v5223_v37 = vpop.f32.mrb[147].mxu1 }
 0x44b   :  { %v4970_v39 = vpop.f32.mrb[144].mxu0  ;;  %v11920_v33 = vpop.f32.mrb[148].mxu1 }
 0x44c   :  { %v11923_v56 = vadd.f32 %v4970_v39, %v11763_v18  ;;  %v4972_v6 = vpop.f32.mrb[145].mxu0  ;;  %v5228_v43 = vpop.f32.mrb[149].mxu1  ;;  %v6175_v18 = vld [vmem:[%s12430_s5] sm:$0xff] }
 0x44d   :  { %v6181_v6 = vld [vmem:[%s12430_s5 + $0x30] sm:$0xff]  ;;  %v6182_v43 = vld [vmem:[%s12430_s5 + $0x38] sm:$0xff] }
 0x44f   :  { %v4975_v13 = vpop.f32.mrb[146].mxu0  ;;  %v11925_v23 = vpop.f32.mrb[150].mxu1 }
 0x450   :  { %v11928_v41 = vadd.f32 %v4975_v13, %v11771_v24  ;;  %v4977_v0 = vpop.f32.mrb[147].mxu0  ;;  %v5233_v62 = vpop.f32.mrb[151].mxu1  ;;  %v8160_v24 = vpack.c.bf16 %v6176_v16, %v6175_v18  ;;  %v8169_v13 = vpack.c.bf16 %v6182_v43, %v6181_v6  ;;  %v6184_v18 = vld [vmem:[%s12430_s5 + $0x48] sm:$0xff] }
 0x452   :  { %8161 = vmatpush3.bf16.msra.mxu1 %v8160_v24 }
 0x453   :  { %v4980_v26 = vpop.f32.mrb[148].mxu0  ;;  %v11930_v32 = vpop.f32.mrb[152].mxu1  ;;  %8162 = vmatprep.subr.bf16.mxu1 %v12470_v52 }
 0x454   :  { %v11933_v17 = vadd.f32 %v4980_v26, %v11780_v59  ;;  %v4982_v40 = vpop.f32.mrb[149].mxu0  ;;  %v5238_v19 = vpop.f32.mrb[153].mxu1 }
 0x455   :  { %v6183_v19 = vld [vmem:[%s12430_s5 + $0x40] sm:$0xff] }
 0x456   :  { %8164 = vmatpush3.bf16.msra.mxu1 %v8163_v21  ;;  %v8172_v16 = vpack.c.bf16 %v6184_v18, %v6183_v19  ;;  %v8151_v21 = vpack.c.bf16 %v7482_v1, %v7481_v2  ;;  %v7484_v19 = vld [vmem:[%s12430_s5 + $0xb0] sm:$0xff]  ;;  %v7485_v2 = vld [vmem:[%s12430_s5 + $0xb8] sm:$0xff]  ;;  %v7486_v1 = vld [vmem:[%s12430_s5 + $0xc0] sm:$0xff] }
 0x457   :  { %v4985_v9 = vpop.f32.mrb[150].mxu0  ;;  %v11941_v29 = vpop.f32.mrb[154].mxu1  ;;  %8165 = vmatprep.subr.bf16.mxu1 %v12470_v52 }
 0x458   :  { %v11944_v14 = vadd.f32 %v4985_v9, %v11789_v20  ;;  %v4987_v45 = vpop.f32.mrb[151].mxu0  ;;  %v5243_v59 = vpop.f32.mrb[155].mxu1  ;;  %v7479_v20 = vld [vmem:[%s12430_s5 + $0x88] sm:$0xff] }
 0x459   :  { %v8148_v28 = vpack.c.bf16 %v7480_v47, %v7479_v20 }
 0x45a   :  { %8167 = vmatpush3.bf16.msra.mxu1 %v8166_v42 }
 0x45b   :  { %v4990_v15 = vpop.f32.mrb[152].mxu0  ;;  %v11953_v57 = vpop.f32.mrb[156].mxu1  ;;  %8149 = vmatpush3.bf16.msra.mxu0 %v8148_v28  ;;  %8168 = vmatprep.subr.bf16.mxu1 %v12470_v52 }
 0x45c   :  { %v11962_v8 = vadd.f32 %v4990_v15, %v11798_v7  ;;  %v4992_v27 = vpop.f32.mrb[153].mxu0  ;;  %v5248_v48 = vpop.f32.mrb[157].mxu1  ;;  %8150 = vmatprep.subr.bf16.mxu0 %v12470_v52  ;;  %v6185_v15 = vld [vmem:[%s12430_s5 + $0x50] sm:$0xff] }
 0x45e   :  { %8170 = vmatpush3.bf16.msra.mxu1 %v8169_v13 }
 0x45f   :  { %v4995_v51 = vpop.f32.mrb[154].mxu0  ;;  %v11971_v25 = vpop.f32.mrb[158].mxu1  ;;  %8171 = vmatprep.subr.bf16.mxu1 %v12470_v52  ;;  %8152 = vmatpush3.bf16.msra.mxu0 %v8151_v21  ;;  %v8157_v21 = vpack.c.bf16 %v7486_v1, %v7485_v2 }
 0x460   :  { %v11975_v7 = vadd.f32 %v4995_v51, %v11807_v58  ;;  %v4997_v37 = vpop.f32.mrb[155].mxu0  ;;  %v5253_v39 = vpop.f32.mrb[159].mxu1  ;;  %8153 = vmatprep.subr.bf16.mxu0 %v12470_v52 }
 0x461   :  { %v6187_v37 = vld [vmem:[%s12430_s5 + $0x60] sm:$0xf] }
 0x462   :  { %8173 = vmatpush3.bf16.msra.mxu1 %v8172_v16 }
 0x463   :  { %v5000_v0 = vpop.f32.mrb[156].mxu0  ;;  %v11984_v62 = vpop.f32.mrb[160].mxu1  ;;  %8174 = vmatprep.subr.bf16.mxu1 %v12470_v52 }
 0x464   :  { %v11987_v58 = vadd.f32 %v5000_v0, %v11816_v61  ;;  %v5002_v26 = vpop.f32.mrb[157].mxu0  ;;  %v5258_v40 = vpop.f32.mrb[161].mxu1 }
 0x465   :  { %v7483_v40 = vld [vmem:[%s12430_s5 + $0xa8] sm:$0xff] }
 0x466   :  { %v8154_v18 = vpack.c.bf16 %v7484_v19, %v7483_v40 }
 0x467   :  { %v5005_v24 = vpop.f32.mrb[158].mxu0  ;;  %v11996_v9 = vpop.f32.mrb[162].mxu1 }
 0x468   :  { %v11999_v61 = vadd.f32 %v5005_v24, %v11825_v10  ;;  %v5007_v45 = vpop.f32.mrb[159].mxu0  ;;  %v5263_v59 = vpop.f32.mrb[163].mxu1  ;;  %v6186_v10 = vld [vmem:[%s12430_s5 + $0x58] sm:$0xff]  ;;  %8155 = vmatpush3.bf16.msra.mxu0 %v8154_v18 }
 0x469   :  { %v8175_v20 = vpack.c.bf16 %v6186_v10, %v6185_v15  ;;  %8156 = vmatprep.subr.bf16.mxu0 %v12470_v52 }
 0x46b   :  { %v5010_v47 = vpop.f32.mrb[160].mxu0  ;;  %v12014_v27 = vpop.f32.mrb[164].mxu1  ;;  %8176 = vmatpush3.bf16.msra.mxu1 %v8175_v20 }
 0x46c   :  { %v12017_v48 = vadd.f32 %v5010_v47, %v11833_v38  ;;  %v5012_v28 = vpop.f32.mrb[161].mxu0  ;;  %v5268_v49 = vpop.f32.mrb[165].mxu1  ;;  %7672 = vmatprep.subr.mxu1 %v12471_v46  ;;  %8158 = vmatpush3.bf16.msra.mxu0 %v8157_v21 }
 0x46d   :  { %7643 = vmatprep.subr.mxu0 %v12471_v46  ;;  %v7487_v28 = vld [vmem:[%s12430_s5 + $0xc8] sm:$0xf] }
 0x46f   :  { %v5015_v42 = vpop.f32.mrb[162].mxu0  ;;  %v12021_v51 = vpop.f32.mrb[166].mxu1  ;;  %7673 = vmatpush3.msk.msra.mxu1 %vm3832_vm1, %v6187_v37 }
 0x470   :  { %v12027_v39 = vadd.f32 %v5015_v42, %v11841_v54  ;;  %v5017_v6 = vpop.f32.mrb[163].mxu0  ;;  %v5273_v38 = vpop.f32.mrb[167].mxu1  ;;  %8195 = vmatprep.subr.bf16.mxu1 %v12470_v52  ;;  %7644 = vmatpush3.msk.msra.mxu0 %vm3832_vm1, %v7487_v28 }
 0x471   :  { %8177 = vmatprep.subr.bf16.mxu0 %v12470_v52 }
 0x473   :  { %v5020_v43 = vpop.f32.mrb[164].mxu0  ;;  %v12035_v13 = vpop.f32.mrb[168].mxu1 }
 0x474   :  { %v12038_v0 = vadd.f32 %v5020_v43, %v11849_v31  ;;  %v5022_v54 = vpop.f32.mrb[165].mxu0  ;;  %v5278_v26 = vpop.f32.mrb[169].mxu1 }
 0x477   :  { %v5025_v16 = vpop.f32.mrb[166].mxu0  ;;  %v5531_v24 = vpop.f32.mrb[170].mxu1 }
 0x478   :  { %v12047_v45 = vadd.f32 %v5025_v16, %v11858_v35  ;;  %v5027_v59 = vpop.f32.mrb[167].mxu0  ;;  %v5533_v31 = vpop.f32.mrb[171].mxu1 }
 0x47b   :  { %v5030_v15 = vpop.f32.mrb[168].mxu0  ;;  %v5536_v10 = vpop.f32.mrb[172].mxu1 }
 0x47c   :  { %v12057_v20 = vadd.f32 %v5030_v15, %v11867_v50  ;;  %v5032_v35 = vpop.f32.mrb[169].mxu0  ;;  %v5538_v47 = vpop.f32.mrb[173].mxu1 }
 0x47f   :  { %v5349_v49 = vpop.f32.mrb[170].mxu0  ;;  %v5541_v42 = vpop.f32.mrb[174].mxu1 }
 0x480   :  { %v5350_v37 = vadd.f32 %v5349_v49, %v11851_v4  ;;  %v5351_v6 = vpop.f32.mrb[171].mxu0  ;;  %v5543_v38 = vpop.f32.mrb[175].mxu1 }
 0x482   :  { %v12066_v50 = vadd.f32 %v5531_v24, %v5350_v37 }
 0x483   :  { %v5354_v43 = vpop.f32.mrb[172].mxu0  ;;  %v5546_v54 = vpop.f32.mrb[176].mxu1 }
 0x484   :  { %v5355_v26 = vadd.f32 %v5354_v43, %v11860_v34  ;;  %v5356_v40 = vpop.f32.mrb[173].mxu0  ;;  %v5548_v19 = vpop.f32.mrb[177].mxu1 }
 0x486   :  { %v12069_v18 = vadd.f32 %v5536_v10, %v5355_v26 }
 0x487   :  { %v5359_v16 = vpop.f32.mrb[174].mxu0  ;;  %v5551_v59 = vpop.f32.mrb[178].mxu1 }
 0x488   :  { %v5360_v31 = vadd.f32 %v5359_v16, %v11869_v53  ;;  %v5361_v2 = vpop.f32.mrb[175].mxu0  ;;  %v5553_v4 = vpop.f32.mrb[179].mxu1 }
 0x48a   :  { %v12072_v1 = vadd.f32 %v5541_v42, %v5360_v31 }
 0x48b   :  { %v5364_v21 = vpop.f32.mrb[176].mxu0  ;;  %v5556_v15 = vpop.f32.mrb[180].mxu1 }
 0x48c   :  { %v5365_v24 = vadd.f32 %v5364_v21, %v11884_v36  ;;  %v5366_v35 = vpop.f32.mrb[177].mxu0  ;;  %v5558_v47 = vpop.f32.mrb[181].mxu1 }
 0x48e   :  { %v12075_v28 = vadd.f32 %v5546_v54, %v5365_v24 }
 0x48f   :  { %v5369_v34 = vpop.f32.mrb[178].mxu0  ;;  %v5561_v49 = vpop.f32.mrb[182].mxu1 }
 0x490   :  { %v5370_v10 = vadd.f32 %v5369_v34, %v11892_v22  ;;  %v5371_v37 = vpop.f32.mrb[179].mxu0  ;;  %v5563_v6 = vpop.f32.mrb[183].mxu1 }
 0x492   :  { %v12078_v38 = vadd.f32 %v5551_v59, %v5370_v10 }
 0x493   :  { %v5374_v53 = vpop.f32.mrb[180].mxu0  ;;  %v5566_v43 = vpop.f32.mrb[184].mxu1 }
 0x494   :  { %v5375_v42 = vadd.f32 %v5374_v53, %v11898_v63  ;;  %v5376_v26 = vpop.f32.mrb[181].mxu0  ;;  %v5568_v40 = vpop.f32.mrb[185].mxu1 }
 0x496   :  { %v12081_v19 = vadd.f32 %v5556_v15, %v5375_v42 }
 0x497   :  { %v5379_v36 = vpop.f32.mrb[182].mxu0  ;;  %v5571_v16 = vpop.f32.mrb[186].mxu1 }
 0x498   :  { %v5380_v54 = vadd.f32 %v5379_v36, %v11909_v44  ;;  %v5381_v31 = vpop.f32.mrb[183].mxu0  ;;  %v5573_v2 = vpop.f32.mrb[187].mxu1 }
 0x49a   :  { %v12084_v4 = vadd.f32 %v5561_v49, %v5380_v54 }
 0x49b   :  { %v5384_v22 = vpop.f32.mrb[184].mxu0  ;;  %v5576_v21 = vpop.f32.mrb[188].mxu1 }
 0x49c   :  { %v5385_v59 = vadd.f32 %v5384_v22, %v11915_v3  ;;  %v5386_v24 = vpop.f32.mrb[185].mxu0  ;;  %v5578_v35 = vpop.f32.mrb[189].mxu1 }
 0x49e   :  { %v12087_v47 = vadd.f32 %v5566_v43, %v5385_v59 }
 0x49f   :  { %v5389_v63 = vpop.f32.mrb[186].mxu0  ;;  %v5581_v34 = vpop.f32.mrb[190].mxu1 }
 0x4a0   :  { %v5390_v15 = vadd.f32 %v5389_v63, %v11920_v33  ;;  %v5391_v10 = vpop.f32.mrb[187].mxu0  ;;  %v5583_v37 = vpop.f32.mrb[191].mxu1 }
 0x4a2   :  { %v12090_v6 = vadd.f32 %v5571_v16, %v5390_v15 }
 0x4a3   :  { %v5394_v44 = vpop.f32.mrb[188].mxu0  ;;  %v5586_v53 = vpop.f32.mrb[192].mxu1 }
 0x4a4   :  { %v5395_v49 = vadd.f32 %v5394_v44, %v11925_v23  ;;  %v5396_v42 = vpop.f32.mrb[189].mxu0  ;;  %v5588_v26 = vpop.f32.mrb[193].mxu1 }
 0x4a6   :  { %v12093_v40 = vadd.f32 %v5576_v21, %v5395_v49 }
 0x4a7   :  { %v5399_v3 = vpop.f32.mrb[190].mxu0  ;;  %v5591_v36 = vpop.f32.mrb[194].mxu1 }
 0x4a8   :  { %v5400_v43 = vadd.f32 %v5399_v3, %v11930_v32  ;;  %v5401_v54 = vpop.f32.mrb[191].mxu0  ;;  %v5593_v31 = vpop.f32.mrb[195].mxu1 }
 0x4aa   :  { %v12096_v2 = vadd.f32 %v5581_v34, %v5400_v43 }
 0x4ab   :  { %v5404_v33 = vpop.f32.mrb[192].mxu0  ;;  %v5596_v22 = vpop.f32.mrb[196].mxu1 }
 0x4ac   :  { %v5405_v16 = vadd.f32 %v5404_v33, %v11941_v29  ;;  %v5406_v59 = vpop.f32.mrb[193].mxu0  ;;  %v5598_v24 = vpop.f32.mrb[197].mxu1 }
 0x4ae   :  { %v12099_v35 = vadd.f32 %v5586_v53, %v5405_v16 }
 0x4af   :  { %v5409_v23 = vpop.f32.mrb[194].mxu0  ;;  %v5601_v63 = vpop.f32.mrb[198].mxu1 }
 0x4b0   :  { %v5410_v21 = vadd.f32 %v5409_v23, %v11953_v57  ;;  %v5411_v15 = vpop.f32.mrb[195].mxu0  ;;  %v5603_v10 = vpop.f32.mrb[199].mxu1 }
 0x4b2   :  { %v12102_v37 = vadd.f32 %v5591_v36, %v5410_v21 }
 0x4b3   :  { %v5414_v32 = vpop.f32.mrb[196].mxu0  ;;  %v5606_v44 = vpop.f32.mrb[200].mxu1 }
 0x4b4   :  { %v5415_v34 = vadd.f32 %v5414_v32, %v11971_v25  ;;  %v5416_v49 = vpop.f32.mrb[197].mxu0  ;;  %v5608_v42 = vpop.f32.mrb[201].mxu1 }
 0x4b6   :  { %v12105_v26 = vadd.f32 %v5596_v22, %v5415_v34 }
 0x4b7   :  { %v5419_v29 = vpop.f32.mrb[198].mxu0  ;;  %v5611_v3 = vpop.f32.mrb[202].mxu1 }
 0x4b8   :  { %v5420_v53 = vadd.f32 %v5419_v29, %v11984_v62  ;;  %v5421_v43 = vpop.f32.mrb[199].mxu0  ;;  %v5613_v54 = vpop.f32.mrb[203].mxu1 }
 0x4ba   :  { %v12108_v31 = vadd.f32 %v5601_v63, %v5420_v53 }
 0x4bb   :  { %v5424_v57 = vpop.f32.mrb[200].mxu0  ;;  %v5616_v33 = vpop.f32.mrb[204].mxu1 }
 0x4bc   :  { %v5425_v36 = vadd.f32 %v5424_v57, %v11996_v9  ;;  %v5426_v16 = vpop.f32.mrb[201].mxu0  ;;  %v5618_v59 = vpop.f32.mrb[205].mxu1 }
 0x4be   :  { %v12111_v24 = vadd.f32 %v5606_v44, %v5425_v36 }
 0x4bf   :  { %v5429_v25 = vpop.f32.mrb[202].mxu0  ;;  %v5621_v23 = vpop.f32.mrb[206].mxu1 }
 0x4c0   :  { %v5430_v22 = vadd.f32 %v5429_v25, %v12014_v27  ;;  %v5431_v21 = vpop.f32.mrb[203].mxu0  ;;  %v5623_v15 = vpop.f32.mrb[207].mxu1 }
 0x4c2   :  { %v12114_v10 = vadd.f32 %v5611_v3, %v5430_v22 }
 0x4c3   :  { %v5434_v62 = vpop.f32.mrb[204].mxu0  ;;  %v5933_v32 = vpop.f32.mrb[208].mxu1 }
 0x4c4   :  { %v5435_v63 = vadd.f32 %v5434_v62, %v12021_v51  ;;  %v5436_v34 = vpop.f32.mrb[205].mxu0  ;;  %v5935_v49 = vpop.f32.mrb[209].mxu1  ;;  %v12126_v51 = vld [vmem:[%s12429_s4] ss:$0 sm:$0xff] }
 0x4c5   :  { %v5061_v49 = vadd.f32 %v12126_v51, %v11887_v30 }
 0x4c6   :  { %v12117_v42 = vadd.f32 %v5616_v33, %v5435_v63 }
 0x4c7   :  { %v5439_v9 = vpop.f32.mrb[206].mxu0  ;;  %v5938_v29 = vpop.f32.mrb[210].mxu1 }
 0x4c8   :  { %v5440_v44 = vadd.f32 %v5439_v9, %v12035_v13  ;;  %v5441_v53 = vpop.f32.mrb[207].mxu0  ;;  %v5940_v43 = vpop.f32.mrb[211].mxu1  ;;  %v5060_v13 = vadd.f32 %v12126_v51, %v11872_v60 }
 0x4ca   :  { %v12120_v54 = vadd.f32 %v5621_v23, %v5440_v44 }
 0x4cb   :  { %v5732_v27 = vpop.f32.mrb[208].mxu0  ;;  %v5943_v57 = vpop.f32.mrb[212].mxu1 }
 0x4cc   :  { %v5826_v3 = vadd.f32 %v5732_v27, %v12066_v50  ;;  %v5734_v36 = vpop.f32.mrb[209].mxu0  ;;  %v5945_v16 = vpop.f32.mrb[213].mxu1 }
 0x4ce   :  { %v6027_v33 = vadd.f32 %v5933_v32, %v5826_v3 }
 0x4cf   :  { %v5737_v59 = vpop.f32.mrb[210].mxu0  ;;  %v5948_v25 = vpop.f32.mrb[214].mxu1 }
 0x4d0   :  { %v6046_v23 = vadd.f32 %v12126_v51, %v6027_v33  ;;  %v5827_v22 = vadd.f32 %v5737_v59, %v12069_v18  ;;  %v5739_v21 = vpop.f32.mrb[211].mxu0  ;;  %v5950_v15 = vpop.f32.mrb[215].mxu1 }
 0x4d2   :  { %v6065_v50 = vmax.f32 %v5060_v13, %v6046_v23  ;;  %v6028_v62 = vadd.f32 %v5938_v29, %v5827_v22  ;;  %v5062_v29 = vadd.f32 %v12126_v51, %v11895_v5 }
 0x4d3   :  { %v5742_v63 = vpop.f32.mrb[212].mxu0  ;;  %v5953_v34 = vpop.f32.mrb[216].mxu1 }
 0x4d4   :  { %6085 = vst.msk [vmem:[#allocation4] sm:$0xff] %vm6084_vm6, %v6065_v50  ;;  %v6047_v32 = vadd.f32 %v12126_v51, %v6028_v62  ;;  %v5828_v60 = vadd.f32 %v5742_v63, %v12072_v1  ;;  %v5744_v9 = vpop.f32.mrb[213].mxu0  ;;  %v5955_v44 = vpop.f32.mrb[217].mxu1 }
 0x4d6   :  { %v6066_v53 = vmax.f32 %v5061_v49, %v6047_v32  ;;  %v6029_v18 = vadd.f32 %v5943_v57, %v5828_v60  ;;  %v5063_v57 = vadd.f32 %v12126_v51, %v11901_v11 }
 0x4d7   :  { %v5747_v43 = vpop.f32.mrb[214].mxu0  ;;  %v5958_v27 = vpop.f32.mrb[218].mxu1 }
 0x4d8   :  { %6086 = vst.msk [vmem:[#allocation4 + $0x8] sm:$0xff] %vm6084_vm6, %v6066_v53  ;;  %v6048_v3 = vadd.f32 %v12126_v51, %v6029_v18  ;;  %v5829_v30 = vadd.f32 %v5747_v43, %v12075_v28  ;;  %v5749_v36 = vpop.f32.mrb[215].mxu0  ;;  %v5960_v16 = vpop.f32.mrb[219].mxu1 }
 0x4da   :  { %v6067_v33 = vmax.f32 %v5062_v29, %v6048_v3  ;;  %v6030_v59 = vadd.f32 %v5948_v25, %v5829_v30  ;;  %v5064_v25 = vadd.f32 %v12126_v51, %v11912_v55 }
 0x4db   :  { %v5752_v1 = vpop.f32.mrb[216].mxu0  ;;  %v5963_v13 = vpop.f32.mrb[220].mxu1 }
 0x4dc   :  { %6087 = vst.msk [vmem:[#allocation4 + $0x10] sm:$0xff] %vm6084_vm6, %v6067_v33  ;;  %v6049_v23 = vadd.f32 %v12126_v51, %v6030_v59  ;;  %v5830_v5 = vadd.f32 %v5752_v1, %v12078_v38  ;;  %v5754_v22 = vpop.f32.mrb[217].mxu0  ;;  %v5965_v21 = vpop.f32.mrb[221].mxu1  ;;  %v6104_v38 = vld [vmem:[#allocation4] sm:$0xff]  ;;  %v5066_v59 = vadd.f32 %v12126_v51, %v11923_v56  ;;  %v7508_v56 = vld [vmem:[%s12430_s5 + $0x140] sm:$0xff] }
 0x4de   :  { %v6068_v15 = vmax.f32 %v5063_v57, %v6049_v23  ;;  %v6031_v50 = vadd.f32 %v5953_v34, %v5830_v5  ;;  %v5065_v34 = vadd.f32 %v12126_v51, %v11918_v12 }
 0x4df   :  { %v5757_v28 = vpop.f32.mrb[218].mxu0  ;;  %v5968_v62 = vpop.f32.mrb[222].mxu1 }
 0x4e0   :  { %6088 = vst.msk [vmem:[#allocation4 + $0x18] sm:$0xff] %vm6084_vm6, %v6068_v15  ;;  %v6050_v63 = vadd.f32 %v12126_v51, %v6031_v50  ;;  %v5831_v11 = vadd.f32 %v5757_v28, %v12081_v19  ;;  %v5759_v49 = vpop.f32.mrb[219].mxu0  ;;  %v5970_v32 = vpop.f32.mrb[223].mxu1  ;;  %v5067_v50 = vadd.f32 %v12126_v51, %v11928_v41 }
 0x4e1   :  { %v7509_v32 = vld [vmem:[%s12430_s5 + $0x148] sm:$0xff] }
 0x4e2   :  { %v6069_v60 = vmax.f32 %v5064_v25, %v6050_v63  ;;  %v6032_v9 = vadd.f32 %v5958_v27, %v5831_v11 }
 0x4e3   :  { %v6106_v44 = vld [vmem:[#allocation4 + $0x10] sm:$0xff]  ;;  %v5762_v53 = vpop.f32.mrb[220].mxu0  ;;  %v5973_v18 = vpop.f32.mrb[224].mxu1 }
 0x4e4   :  { %v6123_v43 = vmax.f32 %v6104_v38, %v6106_v44  ;;  %6089 = vst.msk [vmem:[#allocation4 + $0x20] sm:$0xff] %vm6084_vm6, %v6069_v60  ;;  %v6051_v55 = vadd.f32 %v12126_v51, %v6032_v9  ;;  %v5832_v29 = vadd.f32 %v5762_v53, %v12084_v4  ;;  %v5764_v3 = vpop.f32.mrb[221].mxu0  ;;  %v5975_v19 = vpop.f32.mrb[225].mxu1  ;;  %v7510_v60 = vld [vmem:[%s12430_s5 + $0x150] sm:$0xff]  ;;  %v5068_v44 = vadd.f32 %v12126_v51, %v11933_v17  ;;  %v7511_v17 = vld [vmem:[%s12430_s5 + $0x158] sm:$0xff] }
 0x4e6   :  { %v6140_v30 = vmax.f32 %v6123_v43, 0.0  ;;  %v6070_v36 = vmax.f32 %v5065_v34, %v6051_v55  ;;  %v6033_v16 = vadd.f32 %v5963_v13, %v5832_v29  ;;  %v7507_v13 = vld [vmem:[%s12430_s5 + $0x138] sm:$0xff]  ;;  %v8199_v43 = vpack.c.bf16 %v7510_v60, %v7509_v32 }
 0x4e7   :  { %v5767_v27 = vpop.f32.mrb[222].mxu0  ;;  %v5978_v33 = vpop.f32.mrb[226].mxu1  ;;  %v8196_v63 = vpack.c.bf16 %v7508_v56, %v7507_v13  ;;  %v5071_v60 = vadd.f32 %v12126_v51, %v11975_v7  ;;  %v7495_v7 = vld [vmem:[%s12430_s5 + $0xe8] sm:$0xff] }
 0x4e8   :  { %6157 = vst.msk [vmem:[#allocation5] sm:$0xff] %vm6084_vm6, %v6140_v30  ;;  %6090 = vst.msk [vmem:[#allocation4 + $0x28] sm:$0xff] %vm6084_vm6, %v6070_v36  ;;  %v6052_v12 = vadd.f32 %v12126_v51, %v6033_v16  ;;  %v5833_v1 = vadd.f32 %v5767_v27, %v12087_v47  ;;  %v5769_v57 = vpop.f32.mrb[223].mxu0  ;;  %v5980_v4 = vpop.f32.mrb[227].mxu1  ;;  %v5069_v36 = vadd.f32 %v12126_v51, %v11944_v14  ;;  %v7513_v14 = vld [vmem:[%s12430_s5 + $0x168] sm:$0xff] }
 0x4ea   :  { %v6071_v23 = vmax.f32 %v5066_v59, %v6052_v12  ;;  %v6034_v5 = vadd.f32 %v5968_v62, %v5833_v1 }
 0x4eb   :  { %v6108_v22 = vld [vmem:[#allocation4 + $0x20] sm:$0xff]  ;;  %v5772_v21 = vpop.f32.mrb[224].mxu0  ;;  %v5983_v15 = vpop.f32.mrb[228].mxu1 }
 0x4ec   :  { %6091 = vst.msk [vmem:[#allocation4 + $0x30] sm:$0xff] %vm6084_vm6, %v6071_v23  ;;  %v6053_v47 = vadd.f32 %v12126_v51, %v6034_v5  ;;  %v5834_v28 = vadd.f32 %v5772_v21, %v12090_v6  ;;  %v5774_v62 = vpop.f32.mrb[225].mxu0  ;;  %v5985_v25 = vpop.f32.mrb[229].mxu1  ;;  %v7514_v5 = vld [vmem:[%s12430_s5 + $0x170] sm:$0xff] }
 0x4ee   :  { %v6072_v11 = vmax.f32 %v5067_v50, %v6053_v47  ;;  %v6035_v49 = vadd.f32 %v5973_v18, %v5834_v28  ;;  %v7492_v47 = vld [vmem:[%s12430_s5 + $0xd0] sm:$0xff]  ;;  %v8205_v28 = vpack.c.bf16 %v7514_v5, %v7513_v14 }
 0x4ef   :  { %v5777_v41 = vpop.f32.mrb[226].mxu0  ;;  %v5988_v9 = vpop.f32.mrb[230].mxu1  ;;  %v6174_v38 = vld [vmem:[#allocation5] sm:$0x3] }
 0x4f0   :  { %6092 = vst.msk [vmem:[#allocation4 + $0x38] sm:$0xff] %vm6084_vm6, %v6072_v11  ;;  %v6054_v6 = vadd.f32 %v12126_v51, %v6035_v49  ;;  %v5835_v53 = vadd.f32 %v5777_v41, %v12093_v40  ;;  %v5779_v18 = vpop.f32.mrb[227].mxu0  ;;  %v5990_v34 = vpop.f32.mrb[231].mxu1  ;;  %7675 = vmatmul.mubr.msk.f32.vlgmr.msra.gmra.mrb[246].mxu1 %vm6084_vm6, %v6174_v38  ;;  %v7512_v40 = vld [vmem:[%s12430_s5 + $0x160] sm:$0xff] }
 0x4f1   :  { %8197 = vmatpush3.bf16.msra.mxu1 %v8196_v63  ;;  %7732 = vmatprep.mubr.msk.f32.mxu1 %vm8780_vm5, %v12471_v46  ;;  %v8202_v1 = vpack.c.bf16 %v7512_v40, %v7511_v17  ;;  %v7516_v63 = vld [vmem:[%s12430_s5 + $0x180] sm:$0xff] }
 0x4f2   :  { %v6073_v55 = vmax.f32 %v5068_v44, %v6054_v6  ;;  %v6036_v29 = vadd.f32 %v5978_v33, %v5835_v53  ;;  %8198 = vmatprep.subr.bf16.mxu1 %v12470_v52  ;;  %v7494_v53 = vld [vmem:[%s12430_s5 + $0xe0] sm:$0xff] }
 0x4f3   :  { %v6110_v3 = vld [vmem:[#allocation4 + $0x30] sm:$0xff]  ;;  %v5782_v19 = vpop.f32.mrb[228].mxu0  ;;  %v5993_v30 = vpop.f32.mrb[232].mxu1 }
 0x4f4   :  { %v6127_v16 = vmax.f32 %v6108_v22, %v6110_v3  ;;  %6093 = vst.msk [vmem:[#allocation4 + $0x40] sm:$0xff] %vm6084_vm6, %v6073_v55  ;;  %v6055_v27 = vadd.f32 %v12126_v51, %v6036_v29  ;;  %v5836_v33 = vadd.f32 %v5782_v19, %v12096_v2  ;;  %v5784_v59 = vpop.f32.mrb[229].mxu0  ;;  %v5995_v12 = vpop.f32.mrb[233].mxu1  ;;  %v5070_v2 = vadd.f32 %v12126_v51, %v11962_v8  ;;  %v7493_v8 = vld [vmem:[%s12430_s5 + $0xd8] sm:$0xff]  ;;  %v7518_v55 = vld [vmem:[%s12430_s5 + $0x190] sm:$0xff] }
 0x4f5   :  { %8200 = vmatpush3.bf16.msra.mxu1 %v8199_v43  ;;  %v8178_v6 = vpack.c.bf16 %v7493_v8, %v7492_v47  ;;  %v5072_v3 = vadd.f32 %v12126_v51, %v11987_v58  ;;  %v7496_v58 = vld [vmem:[%s12430_s5 + $0xf0] sm:$0xff] }
 0x4f6   :  { %v6144_v57 = vmax.f32 %v6127_v16, 0.0  ;;  %v6074_v4 = vmax.f32 %v5069_v36, %v6055_v27  ;;  %v6037_v23 = vadd.f32 %v5983_v15, %v5836_v33  ;;  %8201 = vmatprep.subr.bf16.mxu1 %v12470_v52  ;;  %v8181_v27 = vpack.c.bf16 %v7495_v7, %v7494_v53 }
 0x4f7   :  { %v5787_v13 = vpop.f32.mrb[230].mxu0  ;;  %v5998_v56 = vpop.f32.mrb[234].mxu1 }
 0x4f8   :  { %6161 = vst.msk [vmem:[#allocation5 + $0x20] sm:$0xff] %vm6084_vm6, %v6144_v57  ;;  %6094 = vst.msk [vmem:[#allocation4 + $0x48] sm:$0xff] %vm6084_vm6, %v6074_v4  ;;  %v6056_v22 = vadd.f32 %v12126_v51, %v6037_v23  ;;  %v5837_v21 = vadd.f32 %v5787_v13, %v12099_v35  ;;  %v5789_v15 = vpop.f32.mrb[231].mxu0  ;;  %v6000_v50 = vpop.f32.mrb[235].mxu1  ;;  %v7515_v35 = vld [vmem:[%s12430_s5 + $0x178] sm:$0xff]  ;;  %v5073_v23 = vadd.f32 %v12126_v51, %v11999_v61  ;;  %v7498_v61 = vld [vmem:[%s12430_s5 + $0x100] sm:$0xff] }
 0x4f9   :  { %8203 = vmatpush3.bf16.msra.mxu1 %v8202_v1  ;;  %v8208_v18 = vpack.c.bf16 %v7516_v63, %v7515_v35  ;;  %v7499_v50 = vld [vmem:[%s12430_s5 + $0x108] sm:$0xff] }
 0x4fa   :  { %v6075_v62 = vmax.f32 %v5070_v2, %v6056_v22  ;;  %v6038_v25 = vadd.f32 %v5988_v9, %v5837_v21  ;;  %8204 = vmatprep.subr.bf16.mxu1 %v12470_v52 }
 0x4fb   :  { %v6112_v11 = vld [vmem:[#allocation4 + $0x40] sm:$0xff]  ;;  %v5792_v49 = vpop.f32.mrb[232].mxu0  ;;  %v6003_v32 = vpop.f32.mrb[236].mxu1 }
 0x4fc   :  { %6095 = vst.msk [vmem:[#allocation4 + $0x50] sm:$0xff] %vm6084_vm6, %v6075_v62  ;;  %v6057_v41 = vadd.f32 %v12126_v51, %v6038_v25  ;;  %v5838_v9 = vadd.f32 %v5792_v49, %v12102_v37  ;;  %v5794_v38 = vpop.f32.mrb[233].mxu0  ;;  %v6005_v44 = vpop.f32.mrb[237].mxu1  ;;  %v7517_v37 = vld [vmem:[%s12430_s5 + $0x188] sm:$0xff]  ;;  %v5074_v25 = vadd.f32 %v12126_v51, %v12017_v48  ;;  %v8187_v49 = vpack.c.bf16 %v7499_v50, %v7498_v61  ;;  %v7500_v48 = vld [vmem:[%s12430_s5 + $0x110] sm:$0xff] }
 0x4fd   :  { %8206 = vmatpush3.bf16.msra.mxu1 %v8205_v28  ;;  %v8211_v33 = vpack.c.bf16 %v7518_v55, %v7517_v37  ;;  %v5075_v44 = vadd.f32 %v12126_v51, %v12027_v39  ;;  %v7502_v55 = vld [vmem:[%s12430_s5 + $0x120] sm:$0xff]  ;;  %v7503_v39 = vld [vmem:[%s12430_s5 + $0x128] sm:$0xff]  ;;  %v7528_v50 = vld [vmem:[%s12430_s5 + $0x1d0] sm:$0xff] }
 0x4fe   :  { %v6076_v34 = vmax.f32 %v5071_v60, %v6057_v41  ;;  %v6039_v43 = vadd.f32 %v5993_v30, %v5838_v9  ;;  %8207 = vmatprep.subr.bf16.mxu1 %v12470_v52 }
 0x4ff   :  { %v5797_v29 = vpop.f32.mrb[234].mxu0  ;;  %v6008_v17 = vpop.f32.mrb[238].mxu1  ;;  %v6188_v40 = vld [vmem:[#allocation5 + $0x20] sm:$0x3] }
 0x500   :  { %6096 = vst.msk [vmem:[#allocation4 + $0x58] sm:$0xff] %vm6084_vm6, %v6076_v34  ;;  %v6058_v19 = vadd.f32 %v12126_v51, %v6039_v43  ;;  %v5839_v30 = vadd.f32 %v5797_v29, %v12105_v26  ;;  %v5799_v36 = vpop.f32.mrb[235].mxu0  ;;  %v6010_v16 = vpop.f32.mrb[239].mxu1  ;;  %7646 = vmatmul.mubr.msk.f32.vlgmr.msra.gmra.mrb[246].mxu0 %vm6084_vm6, %v6188_v40  ;;  %v7497_v26 = vld [vmem:[%s12430_s5 + $0xf8] sm:$0xff] }
 0x501   :  { %8179 = vmatpush3.bf16.msra.mxu0 %v8178_v6  ;;  %8209 = vmatpush3.bf16.msra.mxu1 %v8208_v18  ;;  %v8184_v22 = vpack.c.bf16 %v7497_v26, %v7496_v58  ;;  %v7523_v58 = vld [vmem:[%s12430_s5 + $0x1a8] sm:$0xff] }
 0x502   :  { %v6077_v59 = vmax.f32 %v5072_v3, %v6058_v19  ;;  %v6040_v12 = vadd.f32 %v5998_v56, %v5839_v30  ;;  %8180 = vmatprep.subr.bf16.mxu0 %v12470_v52  ;;  %7703 = vmatprep.mubr.msk.f32.mxu0 %vm8780_vm5, %v12471_v46  ;;  %v8193_v19 = vpack.c.bf16 %v7503_v39, %v7502_v55 }
 0x503   :  { %v6114_v1 = vld [vmem:[#allocation4 + $0x50] sm:$0xff]  ;;  %v5802_v57 = vpop.f32.mrb[236].mxu0  ;;  %v6013_v4 = vpop.f32.mrb[240].mxu1  ;;  %8210 = vmatprep.subr.bf16.mxu1 %v12470_v52 }
 0x504   :  { %6097 = vst.msk [vmem:[#allocation4 + $0x60] sm:$0xff] %vm6084_vm6, %v6077_v59  ;;  %v6059_v14 = vadd.f32 %v12126_v51, %v6040_v12  ;;  %v5840_v5 = vadd.f32 %v5802_v57, %v12108_v31  ;;  %v5804_v13 = vpop.f32.mrb[237].mxu0  ;;  %v6015_v56 = vpop.f32.mrb[241].mxu1  ;;  %v6131_v2 = vmax.f32 %v6112_v11, %v6114_v1  ;;  %v7519_v31 = vld [vmem:[%s12430_s5 + $0x198] sm:$0xf] }
 0x505   :  { %8182 = vmatpush3.bf16.msra.mxu0 %v8181_v27  ;;  %8212 = vmatpush3.bf16.msra.mxu1 %v8211_v33  ;;  %v5077_v33 = vadd.f32 %v12126_v51, %v12047_v45  ;;  %v7504_v45 = vld [vmem:[%s12430_s5 + $0x130] sm:$0xf]  ;;  %v7525_v13 = vld [vmem:[%s12430_s5 + $0x1b8] sm:$0xff] }
 0x506   :  { %v6078_v21 = vmax.f32 %v5073_v23, %v6059_v14  ;;  %v6041_v15 = vadd.f32 %v6003_v32, %v5840_v5  ;;  %8183 = vmatprep.subr.bf16.mxu0 %v12470_v52  ;;  %v6148_v47 = vmax.f32 %v6131_v2, 0.0  ;;  %7730 = vmatprep.subr.mxu1 %v12471_v46  ;;  %v5078_v23 = vadd.f32 %v12126_v51, %v12057_v20  ;;  %v7524_v5 = vld [vmem:[%s12430_s5 + $0x1b0] sm:$0xff] }
 0x507   :  { %v5807_v28 = vpop.f32.mrb[238].mxu0  ;;  %v6018_v62 = vpop.f32.mrb[242].mxu1 }
 0x508   :  { %6098 = vst.msk [vmem:[#allocation4 + $0x68] sm:$0xff] %vm6084_vm6, %v6078_v21  ;;  %v6060_v8 = vadd.f32 %v12126_v51, %v6041_v15  ;;  %v5841_v35 = vadd.f32 %v5807_v28, %v12111_v24  ;;  %v5809_v63 = vpop.f32.mrb[239].mxu0  ;;  %v6020_v11 = vpop.f32.mrb[243].mxu1  ;;  %6165 = vst.msk [vmem:[#allocation5 + $0x40] sm:$0xff] %vm6084_vm6, %v6148_v47  ;;  %v7501_v24 = vld [vmem:[%s12430_s5 + $0x118] sm:$0xff]  ;;  %v7527_v21 = vld [vmem:[%s12430_s5 + $0x1c8] sm:$0xff] }
 0x509   :  { %8185 = vmatpush3.bf16.msra.mxu0 %v8184_v22  ;;  %7731 = vmatpush3.msk.msra.mxu1 %vm3832_vm1, %v7519_v31  ;;  %v8190_v43 = vpack.c.bf16 %v7501_v24, %v7500_v48  ;;  %v7526_v22 = vld [vmem:[%s12430_s5 + $0x1c0] sm:$0xff]  ;;  %v7529_v47 = vld [vmem:[%s12430_s5 + $0x1d8] sm:$0xff]  ;;  %v7532_v11 = vld [vmem:[%s12430_s5 + $0x1f0] sm:$0xff] }
 0x50a   :  { %v6079_v32 = vmax.f32 %v5074_v25, %v6060_v8  ;;  %v6042_v60 = vadd.f32 %v6008_v17, %v5841_v35  ;;  %8186 = vmatprep.subr.bf16.mxu0 %v12470_v52  ;;  %8231 = vmatprep.subr.bf16.mxu1 %v12470_v52  ;;  %v8220_v61 = vpack.c.bf16 %v7527_v21, %v7526_v22  ;;  %v7531_v25 = vld [vmem:[%s12430_s5 + $0x1e8] sm:$0xff]  ;;  %v6640_v24 = vld [vmem:[%s12432_s7] sm:$0xff] }
 0x50b   :  { %v6116_v41 = vld [vmem:[#allocation4 + $0x60] sm:$0xff]  ;;  %v5812_v9 = vpop.f32.mrb[240].mxu0  ;;  %v6023_v38 = vpop.f32.mrb[244].mxu1  ;;  %v8223_v28 = vpack.c.bf16 %v7529_v47, %v7528_v50 }
 0x50c   :  { %6099 = vst.msk [vmem:[#allocation4 + $0x70] sm:$0xff] %vm6084_vm6, %v6079_v32  ;;  %v6061_v6 = vadd.f32 %v12126_v51, %v6042_v60  ;;  %v5842_v53 = vadd.f32 %v5812_v9, %v12114_v10  ;;  %v5814_v18 = vpop.f32.mrb[241].mxu0  ;;  %v6025_v34 = vpop.f32.mrb[245].mxu1  ;;  %v5076_v10 = vadd.f32 %v12126_v51, %v12038_v0  ;;  %v7534_v60 = vld [vmem:[%s12430_s5 + $0x200] sm:$0xf]  ;;  %v6642_v9 = vld [vmem:[%s12432_s7 + $0x10] sm:$0xff] }
 0x50d   :  { %8188 = vmatpush3.bf16.msra.mxu0 %v8187_v49  ;;  %v7533_v49 = vld [vmem:[%s12430_s5 + $0x1f8] sm:$0xff]  ;;  %v6645_v18 = vld [vmem:[%s12432_s7 + $0x28] sm:$0xff] }
 0x50e   :  { %v6080_v7 = vmax.f32 %v5075_v44, %v6061_v6  ;;  %v6043_v37 = vadd.f32 %v6013_v4, %v5842_v53  ;;  %8189 = vmatprep.subr.bf16.mxu0 %v12470_v52  ;;  %v8229_v32 = vpack.c.bf16 %v7533_v49, %v7532_v11  ;;  %v6643_v44 = vld [vmem:[%s12432_s7 + $0x18] sm:$0xff]  ;;  %v6644_v53 = vld [vmem:[%s12432_s7 + $0x20] sm:$0xff] }
 0x50f   :  { %v5817_v29 = vpop.f32.mrb[242].mxu0  ;;  %v6355_v56 = vld [vmem:[#allocation5 + $0x40] sm:$0x3]  ;;  %v8235_v6 = vpack.c.bf16 %v6643_v44, %v6642_v9  ;;  %v8238_v34 = vpack.c.bf16 %v6645_v18, %v6644_v53 }
 0x510   :  { %6100 = vst.msk [vmem:[#allocation4 + $0x78] sm:$0xff] %vm6084_vm6, %v6080_v7  ;;  %v6062_v17 = vadd.f32 %v12126_v51, %v6043_v37  ;;  %v5843_v40 = vadd.f32 %v5817_v29, %v12117_v42  ;;  %v5819_v3 = vpop.f32.mrb[243].mxu0  ;;  %v7522_v42 = vld [vmem:[%s12430_s5 + $0x1a0] sm:$0xff] }
 0x511   :  { %8191 = vmatpush3.bf16.msra.mxu0 %v8190_v43  ;;  %v8214_v4 = vpack.c.bf16 %v7523_v58, %v7522_v42  ;;  %v6646_v43 = vld [vmem:[%s12432_s7 + $0x30] sm:$0x3] }
 0x512   :  { %v6081_v30 = vmax.f32 %v5076_v10, %v6062_v17  ;;  %v6044_v36 = vadd.f32 %v6018_v62, %v5843_v40  ;;  %8192 = vmatprep.subr.bf16.mxu0 %v12470_v52  ;;  %v7530_v62 = vld [vmem:[%s12430_s5 + $0x1e0] sm:$0xff] }
 0x513   :  { %v6118_v16 = vld [vmem:[#allocation4 + $0x70] sm:$0xff]  ;;  %v5822_v27 = vpop.f32.mrb[244].mxu0  ;;  %v8226_v63 = vpack.c.bf16 %v7531_v25, %v7530_v62 }
 0x514   :  { %6101 = vst.msk [vmem:[#allocation4 + $0x80] sm:$0xff] %vm6084_vm6, %v6081_v30  ;;  %v6063_v0 = vadd.f32 %v12126_v51, %v6044_v36  ;;  %v5844_v59 = vadd.f32 %v5822_v27, %v12120_v54  ;;  %v5824_v12 = vpop.f32.mrb[245].mxu0  ;;  %v6135_v26 = vmax.f32 %v6116_v41, %v6118_v16  ;;  %v6641_v41 = vld [vmem:[%s12432_s7 + $0x8] sm:$0xff] }
 0x515   :  { %8194 = vmatpush3.bf16.msra.mxu0 %v8193_v19 }
 0x516   :  { %v6082_v1 = vmax.f32 %v5077_v33, %v6063_v0  ;;  %v6045_v57 = vadd.f32 %v6023_v38, %v5844_v59  ;;  %7701 = vmatprep.subr.mxu0 %v12471_v46  ;;  %v6152_v54 = vmax.f32 %v6135_v26, 0.0  ;;  %v8232_v38 = vpack.c.bf16 %v6641_v41, %v6640_v24  ;;  %v7538_v0 = vld [vmem:[%s12433_s8] ss:$0 sm:$0xff] }
 0x518   :  { %6102 = vst.msk [vmem:[#allocation4 + $0x88] sm:$0xff] %vm6084_vm6, %v6082_v1  ;;  %v6064_v14 = vadd.f32 %v12126_v51, %v6045_v57  ;;  %6169 = vst.msk [vmem:[#allocation5 + $0x60] sm:$0xff] %vm6084_vm6, %v6152_v54  ;;  %v8217_v51 = vpack.c.bf16 %v7525_v13, %v7524_v5 }
 0x519   :  { %7702 = vmatpush3.msk.msra.mxu0 %vm3832_vm1, %v7504_v45 }
 0x51a   :  { %v6083_v2 = vmax.f32 %v5078_v23, %v6064_v14  ;;  %7704 = vmatmul.mubr.msk.f32.vlgmr.msra.gmra.mrb[248].mxu0 %vm6084_vm6, %v6355_v56  ;;  %8213 = vmatprep.subr.bf16.mxu0 %v12470_v52 }
 0x51b   :  { %v6120_v20 = vld [vmem:[#allocation4 + $0x80] sm:$0xff]  ;;  %8215 = vmatpush3.bf16.msra.mxu0 %v8214_v4  ;;  %7761 = vmatprep.mubr.msk.f32.mxu0 %vm8780_vm5, %v12471_v46 }
 0x51c   :  { %6103 = vst.msk [vmem:[#allocation4 + $0x90] sm:$0xff] %vm6084_vm6, %v6083_v2  ;;  %8216 = vmatprep.subr.bf16.mxu0 %v12470_v52 }
 0x51f   :  { %8218 = vmatpush3.bf16.msra.mxu0 %v8217_v51  ;;  %v6447_v15 = vld [vmem:[#allocation5 + $0x60] sm:$0x3] }
 0x520   :  { %7733 = vmatmul.mubr.msk.f32.vlgmr.msra.gmra.mrb[248].mxu1 %vm6084_vm6, %v6447_v15  ;;  %8219 = vmatprep.subr.bf16.mxu0 %v12470_v52 }
 0x521   :  { %7778 = vmatprep.mubr.msk.f32.mxu1 %vm8780_vm5, %v12471_v46  ;;  %8233 = vmatpush3.bf16.msra.mxu1 %v8232_v38 }
 0x522   :  { %8234 = vmatprep.subr.bf16.mxu1 %v12470_v52 }
 0x523   :  { %v6122_v31 = vld [vmem:[#allocation4 + $0x90] sm:$0xff]  ;;  %8221 = vmatpush3.bf16.msra.mxu0 %v8220_v61 }
 0x524   :  { %8222 = vmatprep.subr.bf16.mxu0 %v12470_v52  ;;  %v6139_v8 = vmax.f32 %v6120_v20, %v6122_v31 }
 0x525   :  { %8236 = vmatpush3.bf16.msra.mxu1 %v8235_v6 }
 0x526   :  { %v6156_v35 = vmax.f32 %v6139_v8, 0.0  ;;  %8237 = vmatprep.subr.bf16.mxu1 %v12470_v52 }
 0x527   :  { %8224 = vmatpush3.bf16.msra.mxu0 %v8223_v28 }
 0x528   :  { %8225 = vmatprep.subr.bf16.mxu0 %v12470_v52  ;;  %6173 = vst.msk [vmem:[#allocation5 + $0x80] sm:$0xff] %vm6084_vm6, %v6156_v35 }
 0x529   :  { %8239 = vmatpush3.bf16.msra.mxu1 %v8238_v34 }
 0x52a   :  { %7776 = vmatprep.subr.mxu1 %v12471_v46 }
 0x52b   :  { %8227 = vmatpush3.bf16.msra.mxu0 %v8226_v63 }
 0x52c   :  { %8228 = vmatprep.subr.bf16.mxu0 %v12470_v52 }
 0x52d   :  { %7777 = vmatpush3.msk.msra.mxu1 %vm6658_vm7, %v6646_v43 }
 0x52f   :  { %8230 = vmatpush3.bf16.msra.mxu0 %v8229_v32  ;;  %v6539_v48 = vld [vmem:[#allocation5 + $0x80] sm:$0x3] }
 0x530   :  { %7759 = vmatprep.subr.mxu0 %v12471_v46  ;;  %v7537_v46 = vld [vmem:[%s12431_s6] ss:$0 sm:$0xff]  ;;  %s8781_s6 = smov [#allocation6]  }
 0x531   :  { %s6752_s8 = sshll.u32 %s8781_s6, 4  ;;  %s6753_s8 = int_to_ptr.vmem [resolvable:$true] %s6752_s8 }
 0x532   :  { %s8753_s29 = scalar_lea.vmem %s6753_s8, 32  ;;  %p8758_p1 = scmp.lt.s32.totalorder %s6753_s8, %s6753_s8 }
 0x533   :  { %7760 = vmatpush3.msk.msra.mxu0 %vm3832_vm1, %v7534_v60  ;;  %p8754_p0 = scmp.ne.s32.totalorder %s6753_s8, %s8753_s29  ;;  %p8759_p2 = scmp.lt.s32.totalorder %s8753_s29, %s8753_s29 }
 0x534   :  { %7762 = vmatmul.mubr.msk.f32.vlgmr.msra.gmra.mrb[250].mxu0 %vm6084_vm6, %v6539_v48 }
 0x535   :  { %p8760_p3 = por %p8759_p2, %p8758_p1 }
 0x537   :  { %p8761_p4 = pnand %p8760_p3, %p8754_p0 }
 0x5c3   :  { %v6351_v7 = vpop.f32.mrb[246].mxu1 }
 0x5c4   :  { %v7676_v52 = vpop.f32.mrb[247].mxu1 }
 0x5d3   :  { %v6275_v37 = vpop.f32.mrb[246].mxu0 }
 0x5d4   :  { %v6352_v55 = vadd.f32 %v6351_v7, %v6275_v37  ;;  %v7647_v39 = vpop.f32.mrb[247].mxu0 }
 0x5ed   :  { %v6442_v29 = vpop.f32.mrb[248].mxu0 }
 0x5ee   :  { %v6446_v10 = vadd.f32 %v6442_v29, %v6352_v55  ;;  %v7705_v17 = vpop.f32.mrb[249].mxu0 }
 0x5f3   :  { %v6534_v40 = vpop.f32.mrb[248].mxu1 }
 0x5f4   :  { %v6538_v3 = vadd.f32 %v6534_v40, %v6446_v10  ;;  %v7734_v19 = vpop.f32.mrb[249].mxu1 }
 0x607   :  { %v6626_v30 = vpop.f32.mrb[250].mxu0 }
 0x608   :  { %v6630_v36 = vadd.f32 %v6626_v30, %v6538_v3  ;;  %v7763_v16 = vpop.f32.mrb[251].mxu0 }
 0x60a   :  { %v6638_v27 = vadd.f32 %v7537_v46, %v6630_v36 }
 0x60c   :  { %v6639_v33 = vmax.f32 %v6638_v27, 0.0 }
 0x60e   :  { %7779 = vmatmul.mubr.msk.f32.vlgmr.msra.gmra.mrb[250].mxu1 %vm6654_vm8, %v6639_v33 }
 0x6e1   :  { %v6728_v59 = vpop.f32.mrb[250].mxu1 }
 0x6e2   :  { %v6729_v12 = vadd.f32 %v7538_v0, %v6728_v59  ;;  %v7780_v42 = vpop.f32.mrb[251].mxu1 }
 0x6e4   :  { %v6733_v58 = vsel %vm6732_vm9, %v6729_v12, -inf }
 0x6e5   :  { %6734 = vmax.xlane.f32.xlu0 %v6733_v58 }
 0x772   :  { %v6735_v26 = vpop.xlane.xlu0 %6734 }
 0x773   :  { %v6736_v1 = vsub.f32 %v6729_v12, %v6735_v26 }
 0x775   :  { %v6737_v57 = vmul.f32 1.442695, %v6736_v1 }
 0x777   :  { %8693 = vpow2.f32 %v6737_v57 }
 0x781   :  { %v8694_v45 = vpop.eup %8693 }
 0x782   :  { %v6739_v54 = vsel %vm6732_vm9, %v8694_v45, 0.0 }
 0x783   :  { %6740 = vadd.xlane.f32.xlu0 %v6739_v54 }
 0x810   :  { %v6741_v4 = vpop.xlane.xlu0 %6740 }
 0x811   :  { %8695 = vlog2.f32 %v6741_v4 }
 0x81b   :  { %v8696_v23 = vpop.eup %8695 }
 0x81c   :  { %v6743_v14 = vmul.f32 0.6931472, %v8696_v23 }
 0x81e   :  { %v6744_v5 = vsub.f32 %v6736_v1, %v6743_v14 }
 0x820   :  { %6745 = vst.msk [vmem:[#allocation6] sm:$0x3] %vm6732_vm9, %v6744_v5 }
 0x821   :  { %8764 = shalt.err (!%p8761_p4)
}
 0x822   :  { %s8765_s11 = scalar_lea.hbm %s12434_s9, 32 }
 0x823   :  { %p8766_p5 = scmp.ne.s32.totalorder %s12434_s9, %s8765_s11  ;;  %p8769_p6 = scmp.lt.u32.totalorder %s8765_s11, %s12434_s9 }
 0x825   :  { %p8771_p7 = pnand %p8769_p6, %p8766_p5 }
 0x827   :  { %8774 = shalt.err (!%p8771_p7)
}
 0x828   :  { %6755 = dma.vmem_to_hbm [thread:$0]  %s6753_s8, 32, %s12434_s9, [#allocation7]  }
 0x829   :  { %8775 = dma.done.wait [#allocation7], 32  }
 0x82a   :  { %8776 = vsyncadd [#allocation7], 4294967264 }
 0x82b   :  { %6759 = vsyncpa [#allocation7], 1 }

</bundles_post_ra>
